<compile_context>
chip_gen: v5e
topology: v5e:2x2
jax: 0.10.0
libtpu: 0.0.40
codegen_flags: <defaults>
</compile_context>

<pallas_src>
import math
import numpy as np
import jax
import jax.numpy as jnp
from jax import lax
from jax.experimental import pallas as pl
from jax.experimental.pallas import tpu as pltpu

# ----------------------------- configuration (small, synthetic) -------------
IMG_SIZE = 64                  # scaled-down (original compound_coef=2 -> 768)
PYRAMID_LEVELS = [3, 4, 5]     # scaled-down (original [3..7]); grids 8, 4, 2
NUM_CLASSES = 16               # scaled-down (original 90)
FEAT_DIM = 32                  # synthetic backbone feature width
RATIOS = [(1.0, 1.0), (1.4, 0.7), (0.7, 1.4)]
SCALES = [2.0 ** 0, 2.0 ** (1.0 / 3.0), 2.0 ** (2.0 / 3.0)]
NUM_BASE_ANCHORS = len(RATIOS) * len(SCALES)   # 9
SCORE_THRESHOLD = 0.05
IOU_THRESHOLD = 0.5
MAX_DETECTIONS = 100
PRE_NMS_TOPK = 128             # per-class candidate cap fed to greedy NMS
MAX_PER_CLASS = 32             # TODO(synk): static cap (torch NMS keeps all survivors)
BBOX_DWH_CLAMP = math.log(1000.0 / 16.0)

N_CELLS = sum((IMG_SIZE // (2 ** l)) ** 2 for l in PYRAMID_LEVELS)   # 84
N_ANCHORS = N_CELLS * NUM_BASE_ANCHORS                               # 756
N_CELL_PAD = ((N_CELLS + 7) // 8) * 8                                # 88
K_PAD = ((FEAT_DIM + 1 + 7) // 8) * 8                                # 40 (feat + ones col)
BOX_LANES = 4 * NUM_BASE_ANCHORS                                     # 36
OUT_LANES = 128                                                      # lane-dense output
assert 2 * BOX_LANES + NUM_CLASSES <= OUT_LANES

# per-lane selectors for duplicating W_reg columns into the fused weight
CTR_SEL = np.tile(np.array([0, 1, 0, 1], dtype=np.int32), NUM_BASE_ANCHORS)   # dx,dy,dx,dy
SIZE_SEL = np.tile(np.array([2, 3, 2, 3], dtype=np.int32), NUM_BASE_ANCHORS)  # dw,dh,dw,dh


# ----------------------------- anchor decode constants (numpy) --------------
def generate_cell_decode_constants():
    """Per-cell, lane-dense decode constants.

    Returns (ctr, wh, whh), each [N_CELL_PAD, 36] f32, lane 4*a+k:
      ctr = cell center (xca,yca,xca,yca)        (independent of base anchor a)
      wh  = base-anchor size (wa,ha,wa,ha)       (per level / base anchor)
      whh = (+-0.5) * wh  (sign -,-,+,+ for x1,y1,x2,y2)
    Ordering matches the original anchor generation: level-major, cell
    row-major (y, x), base anchor (ratio, scale) within a cell.
    """
    anchor_scale = 4.0
    ctr_list, wh_list = [], []
    for level in PYRAMID_LEVELS:
        stride = 2 ** level
        size = anchor_scale * 2 ** level
        grid = IMG_SIZE // stride
        shift = np.arange(grid, dtype=np.float32) * stride
        sy, sx = np.meshgrid(shift, shift, indexing="ij")
        cx = sx.ravel().astype(np.float32)                    # [cells]
        cy = sy.ravel().astype(np.float32)
        ws, hs = [], []
        for (r0, r1) in RATIOS:
            for s in SCALES:
                ws.append(size * s * math.sqrt(r0 / r1))
                hs.append(size * s * math.sqrt(r1 / r0))
        ws = np.asarray(ws, np.float32)                       # [9]
        hs = np.asarray(hs, np.float32)
        cells = grid * grid
        ctr = np.zeros((cells, NUM_BASE_ANCHORS, 4), np.float32)
        ctr[:, :, 0] = cx[:, None]; ctr[:, :, 2] = cx[:, None]
        ctr[:, :, 1] = cy[:, None]; ctr[:, :, 3] = cy[:, None]
        wh = np.zeros((cells, NUM_BASE_ANCHORS, 4), np.float32)
        wh[:, :, 0] = ws[None, :]; wh[:, :, 2] = ws[None, :]
        wh[:, :, 1] = hs[None, :]; wh[:, :, 3] = hs[None, :]
        ctr_list.append(ctr.reshape(cells, BOX_LANES))
        wh_list.append(wh.reshape(cells, BOX_LANES))
    ctr = np.concatenate(ctr_list, axis=0)                    # [N_CELLS, 36]
    wh = np.concatenate(wh_list, axis=0)
    sign = np.tile(np.array([-0.5, -0.5, 0.5, 0.5], np.float32), NUM_BASE_ANCHORS)[None, :]
    whh = wh * sign

    def pad(a):
        p = np.zeros((N_CELL_PAD, BOX_LANES), np.float32)
        p[: a.shape[0]] = a
        return p

    return pad(ctr), pad(wh), pad(whh)


# ----------------------------- fused head weight -----------------------------
def build_fused_weight(w_reg, b_reg, w_cls, b_cls):
    """Fused (K_PAD, 128) weight: [d_ctr x36 | d_size x36 | cls x C | 0-pad].

    Biases are folded in via the constant-1 feature column (row FEAT_DIM).
    """
    w = jnp.zeros((K_PAD, OUT_LANES), jnp.float32)
    w = w.at[:FEAT_DIM, 0:BOX_LANES].set(w_reg[:, CTR_SEL])
    w = w.at[:FEAT_DIM, BOX_LANES:2 * BOX_LANES].set(w_reg[:, SIZE_SEL])
    w = w.at[:FEAT_DIM, 2 * BOX_LANES:2 * BOX_LANES + NUM_CLASSES].set(w_cls)
    w = w.at[FEAT_DIM, 0:BOX_LANES].set(b_reg[CTR_SEL])
    w = w.at[FEAT_DIM, BOX_LANES:2 * BOX_LANES].set(b_reg[SIZE_SEL])
    w = w.at[FEAT_DIM, 2 * BOX_LANES:2 * BOX_LANES + NUM_CLASSES].set(b_cls)
    return w


# ----------------------------- Pallas kernel ---------------------------------
def head_decode_kernel(feat_ref, w_ref, ctr_ref, wh_ref, whh_ref, out_ref):
    # single fused matmul: regression (duplicated layout) + classification + bias
    y = jnp.dot(feat_ref[...], w_ref[...], preferred_element_type=jnp.float32)

    d_ctr = y[:, 0:BOX_LANES]                          # (Ncp, 36)  dx,dy,dx,dy x9
    d_size = y[:, BOX_LANES:2 * BOX_LANES]             # (Ncp, 36)  dw,dh,dw,dh x9
    logits = y[:, 2 * BOX_LANES:2 * BOX_LANES + NUM_CLASSES]

    # BBoxTransform + ClipBoxes, full-width:
    #   box = ctr + d_ctr*wh + (+-0.5)*exp(clamp(d_size))*wh
    size = jnp.exp(jnp.minimum(d_size, BBOX_DWH_CLAMP))
    boxes = ctr_ref[...] + d_ctr * wh_ref[...] + size * whh_ref[...]
    boxes = jnp.clip(boxes, 0.0, jnp.float32(IMG_SIZE))

    # sigmoid + in-kernel score threshold + padded-row mask
    scores = jax.nn.sigmoid(logits)
    row = lax.broadcasted_iota(jnp.int32, (N_CELL_PAD, NUM_CLASSES), 0)
    keep = (row < N_CELLS) & (scores > SCORE_THRESHOLD)
    scores = jnp.where(keep, scores, 0.0)

    pad = jnp.zeros((N_CELL_PAD, OUT_LANES - BOX_LANES - NUM_CLASSES), jnp.float32)
    out_ref[...] = jnp.concatenate([boxes, scores, pad], axis=1)   # one dense store


def run_head_decode(feat1, w_fused, ctr, wh, whh):
    """feat1: [N_CELL_PAD, K_PAD] -> lane-dense [N_CELL_PAD, 128] result."""
    in_specs = [
        pl.BlockSpec((N_CELL_PAD, K_PAD), lambda i: (0, 0)),
        pl.BlockSpec((K_PAD, OUT_LANES), lambda i: (0, 0)),
        pl.BlockSpec((N_CELL_PAD, BOX_LANES), lambda i: (0, 0)),
        pl.BlockSpec((N_CELL_PAD, BOX_LANES), lambda i: (0, 0)),
        pl.BlockSpec((N_CELL_PAD, BOX_LANES), lambda i: (0, 0)),
    ]
    out_specs = pl.BlockSpec((N_CELL_PAD, OUT_LANES), lambda i: (0, 0))
    return pl.pallas_call(
        head_decode_kernel,
        out_shape=jax.ShapeDtypeStruct((N_CELL_PAD, OUT_LANES), jnp.float32),
        grid_spec=pltpu.PrefetchScalarGridSpec(
            num_scalar_prefetch=0,
            grid=(1,),                      # single step: working set << VMEM
            in_specs=in_specs,
            out_specs=out_specs,
        ),
        compiler_params=pltpu.CompilerParams(
            dimension_semantics=("arbitrary",)),
    )(feat1, w_fused, ctr, wh, whh)


# ----------------------------- synthetic backbone stem (plain-JAX glue) -----
def backbone_features(x0, w_stem, b_stem):
    """x0: [3, H, W] -> per-CELL features [N_CELLS, F] (no x9 anchor repeat)."""
    feats = []
    h = x0.shape[1]
    for level in PYRAMID_LEVELS:
        stride = 2 ** level
        g = IMG_SIZE // stride
        win = h // g
        pooled = x0.reshape(3, g, win, g, win).mean(axis=(2, 4))     # [3, g, g]
        cells = pooled.transpose(1, 2, 0).reshape(g * g, 3)          # [cells, 3]
        feats.append(jax.nn.relu(cells @ w_stem + b_stem))           # [cells, F]
    return jnp.concatenate(feats, axis=0)                            # [N_CELLS, F]


# ----------------------------- NMS + detection assembly (plain JAX) ---------
# TODO(synk): PyTorch returns variable-length detections; JAX requires static
# shapes, so detections are padded to [MAX_DETECTIONS, 7] (invalid rows = 0)
# and per-class survivors are capped at MAX_PER_CLASS.
def nms_single_class(boxes, scores_c):
    # scores were already thresholded (and padded rows zeroed) in the kernel,
    # so a per-class pre-NMS top-k candidate set is sufficient and much cheaper.
    vals, idx = lax.top_k(scores_c, PRE_NMS_TOPK)
    b = boxes[idx]                                   # [K, 4]
    x1, y1, x2, y2 = b[:, 0], b[:, 1], b[:, 2], b[:, 3]
    areas = (x2 - x1) * (y2 - y1)
    cur0 = jnp.where(vals > 0.0, vals, -jnp.inf)
    cand = jnp.arange(PRE_NMS_TOPK)

    def body(k, state):
        cur, kb, ks = state
        i = jnp.argmax(cur)
        s = cur[i]
        valid = s > -jnp.inf
        kb = kb.at[k].set(jnp.where(valid, b[i], 0.0))
        ks = ks.at[k].set(jnp.where(valid, s, 0.0))
        xx1 = jnp.maximum(x1[i], x1)
        yy1 = jnp.maximum(y1[i], y1)
        xx2 = jnp.minimum(x2[i], x2)
        yy2 = jnp.minimum(y2[i], y2)
        inter = jnp.maximum(xx2 - xx1, 0.0) * jnp.maximum(yy2 - yy1, 0.0)
        iou = inter / (areas[i] + areas - inter + 1e-8)
        suppress = (iou > IOU_THRESHOLD) | (cand == i)
        cur = jnp.where(valid & suppress, -jnp.inf, cur)
        return cur, kb, ks

    kb0 = jnp.zeros((MAX_PER_CLASS, 4), jnp.float32)
    ks0 = jnp.zeros((MAX_PER_CLASS,), jnp.float32)
    _, kb, ks = lax.fori_loop(0, MAX_PER_CLASS, body, (cur0, kb0, ks0))
    return kb, ks


def postprocess_nms(boxes, scores):
    kb, ks = jax.vmap(nms_single_class, in_axes=(None, 1))(boxes, scores)
    labels = jnp.broadcast_to(
        jnp.arange(NUM_CLASSES, dtype=jnp.float32)[:, None],
        (NUM_CLASSES, MAX_PER_CLASS))
    all_boxes = kb.reshape(-1, 4)
    all_scores = ks.reshape(-1)
    all_labels = labels.reshape(-1)

    top_scores, top_idx = lax.top_k(all_scores, MAX_DETECTIONS)
    sel_boxes = all_boxes[top_idx]
    sel_labels = all_labels[top_idx]
    valid = top_scores > 0.0
    batch_ids = jnp.zeros((MAX_DETECTIONS, 1), jnp.float32)
    det = jnp.concatenate(
        [batch_ids, sel_boxes, top_scores[:, None], sel_labels[:, None]], axis=1)
    return jnp.where(valid[:, None], det, 0.0)


# ----------------------------- full forward ---------------------------------
def efficientdet_forward(x, params, consts):
    # backbone stem (glue) — post-processing uses batch index 0 only,
    # mirroring `regression[0]` / `classification[0]` in the PyTorch forward.
    feat = backbone_features(x[0], params["w_stem"], params["b_stem"])  # [84, F]

    # pad to sublane-aligned rows and append the constant-1 bias column
    feat1 = jnp.zeros((N_CELL_PAD, K_PAD), jnp.float32)
    feat1 = feat1.at[:N_CELLS, :FEAT_DIM].set(feat)
    feat1 = feat1.at[:N_CELLS, FEAT_DIM].set(1.0)

    w_fused = build_fused_weight(
        params["w_reg"], params["b_reg"], params["w_cls"], params["b_cls"])

    out = run_head_decode(feat1, w_fused, consts["ctr"], consts["wh"], consts["whh"])

    # lane-dense output -> per-anchor boxes / scores (cell-major, 9 anchors/cell)
    boxes = out[:N_CELLS, :BOX_LANES].reshape(N_ANCHORS, 4)
    cell_scores = out[:N_CELLS, BOX_LANES:BOX_LANES + NUM_CLASSES]
    scores = jnp.repeat(cell_scores, NUM_BASE_ANCHORS, axis=0)        # [756, C]

    return postprocess_nms(boxes, scores)


# ----------------------------- main ------------------------------------------
if __name__ == "__main__":
    key = jax.random.PRNGKey(0)
    k_x, k_ws, k_bs, k_wr, k_br, k_wc = jax.random.split(key, 6)

    batch = 2
    x = jax.random.normal(k_x, (batch, 3, IMG_SIZE, IMG_SIZE), jnp.float32)

    params = {
        "w_stem": jax.random.normal(k_ws, (3, FEAT_DIM), jnp.float32) * 0.2,
        "b_stem": jax.random.normal(k_bs, (FEAT_DIM,), jnp.float32) * 0.05,
        "w_reg": jax.random.normal(k_wr, (FEAT_DIM, 4), jnp.float32) * 0.05,
        "b_reg": jax.random.normal(k_br, (4,), jnp.float32) * 0.01,
        "w_cls": jax.random.normal(k_wc, (FEAT_DIM, NUM_CLASSES), jnp.float32) * 0.1,
        "b_cls": jnp.full((NUM_CLASSES,), -2.0, jnp.float32),
    }

    ctr_np, wh_np, whh_np = generate_cell_decode_constants()
    consts = {
        "ctr": jnp.asarray(ctr_np),
        "wh": jnp.asarray(wh_np),
        "whh": jnp.asarray(whh_np),
    }

    detections = jax.jit(efficientdet_forward)(x, params, consts)
    detections = jax.block_until_ready(detections)
    assert detections.shape == (MAX_DETECTIONS, 7)
    assert bool(jnp.all(jnp.isfinite(detections)))
    print("KERNEL_OK")
</pallas_src>

<mosaic_0001>
module attributes {stable_mosaic.version = 11 : i64} {
  func.func @head_decode_kernel(%arg0: i32, %arg1: memref<88x40xf32, #tpu.memory_space<vmem>>, %arg2: memref<40x128xf32, #tpu.memory_space<vmem>>, %arg3: memref<88x36xf32, #tpu.memory_space<vmem>>, %arg4: memref<88x36xf32, #tpu.memory_space<vmem>>, %arg5: memref<88x36xf32, #tpu.memory_space<vmem>>, %arg6: memref<88x128xf32, #tpu.memory_space<vmem>>) attributes {dimension_semantics = [#tpu.dimension_semantics<arbitrary>], iteration_bounds = array<i64: 1>, scalar_prefetch = 0 : i64, scratch_operands = 0 : i64, tpu.core_type = #tpu.core_type<tc>, window_params = [{pipeline_mode = #tpu.pipeline_mode<synchronous>, transform_indices = @transform_0, window_bounds = array<i64: 88, 40>}, {pipeline_mode = #tpu.pipeline_mode<synchronous>, transform_indices = @transform_1, window_bounds = array<i64: 40, 128>}, {pipeline_mode = #tpu.pipeline_mode<synchronous>, transform_indices = @transform_2, window_bounds = array<i64: 88, 36>}, {pipeline_mode = #tpu.pipeline_mode<synchronous>, transform_indices = @transform_3, window_bounds = array<i64: 88, 36>}, {pipeline_mode = #tpu.pipeline_mode<synchronous>, transform_indices = @transform_4, window_bounds = array<i64: 88, 36>}, {pipeline_mode = #tpu.pipeline_mode<synchronous>, transform_indices = @transform_5, window_bounds = array<i64: 88, 128>}]} {
    %c0 = arith.constant 0 : index
    %c0_0 = arith.constant 0 : index
    %0 = vector.load %arg1[%c0, %c0_0] : memref<88x40xf32, #tpu.memory_space<vmem>>, vector<88x40xf32>
    %c0_1 = arith.constant 0 : index
    %c0_2 = arith.constant 0 : index
    %1 = vector.load %arg2[%c0_1, %c0_2] : memref<40x128xf32, #tpu.memory_space<vmem>>, vector<40x128xf32>
    %cst = arith.constant dense<0.000000e+00> : vector<88x128xf32>
    %2 = tpu.matmul %0, %1, %cst {dimension_numbers = #tpu.dot_dimension_numbers<[1], [0], [0], [1], [0, 0, 1, 1], [], []>} : vector<88x40xf32>, vector<40x128xf32>, vector<88x128xf32> -> vector<88x128xf32>
    %3 = vector.extract_strided_slice %2 {offsets = [0, 0], sizes = [88, 36], strides = [1, 1]} : vector<88x128xf32> to vector<88x36xf32>
    %4 = vector.extract_strided_slice %2 {offsets = [0, 36], sizes = [88, 36], strides = [1, 1]} : vector<88x128xf32> to vector<88x36xf32>
    %5 = vector.extract_strided_slice %2 {offsets = [0, 72], sizes = [88, 16], strides = [1, 1]} : vector<88x128xf32> to vector<88x16xf32>
    %cst_3 = arith.constant 4.13516665 : f32
    %6 = vector.broadcast %cst_3 : f32 to vector<88x36xf32>
    %7 = arith.minimumf %4, %6 : vector<88x36xf32>
    %8 = math.exp %7 : vector<88x36xf32>
    %c0_4 = arith.constant 0 : index
    %c0_5 = arith.constant 0 : index
    %9 = vector.load %arg3[%c0_4, %c0_5] : memref<88x36xf32, #tpu.memory_space<vmem>>, vector<88x36xf32>
    %c0_6 = arith.constant 0 : index
    %c0_7 = arith.constant 0 : index
    %10 = vector.load %arg4[%c0_6, %c0_7] : memref<88x36xf32, #tpu.memory_space<vmem>>, vector<88x36xf32>
    %11 = arith.mulf %3, %10 : vector<88x36xf32>
    %12 = arith.addf %9, %11 : vector<88x36xf32>
    %c0_8 = arith.constant 0 : index
    %c0_9 = arith.constant 0 : index
    %13 = vector.load %arg5[%c0_8, %c0_9] : memref<88x36xf32, #tpu.memory_space<vmem>>, vector<88x36xf32>
    %14 = arith.mulf %8, %13 : vector<88x36xf32>
    %15 = arith.addf %12, %14 : vector<88x36xf32>
    %cst_10 = arith.constant 0.000000e+00 : f32
    %cst_11 = arith.constant 6.400000e+01 : f32
    %16 = vector.broadcast %cst_10 : f32 to vector<88x36xf32>
    %17 = arith.maximumf %16, %15 : vector<88x36xf32>
    %18 = vector.broadcast %cst_11 : f32 to vector<88x36xf32>
    %19 = arith.minimumf %18, %17 : vector<88x36xf32>
    %20 = arith.negf %5 : vector<88x16xf32>
    %21 = math.exp %20 : vector<88x16xf32>
    %cst_12 = arith.constant 1.000000e+00 : f32
    %22 = vector.broadcast %cst_12 : f32 to vector<88x16xf32>
    %23 = arith.addf %22, %21 : vector<88x16xf32>
    %24 = arith.divf %22, %23 : vector<88x16xf32>
    %25 = tpu.iota {dimensions = array<i32: 0>} : vector<88x16xi32>
    %c84_i32 = arith.constant 84 : i32
    %26 = vector.broadcast %c84_i32 : i32 to vector<88x16xi32>
    %27 = arith.cmpi slt, %25, %26 : vector<88x16xi32>
    %cst_13 = arith.constant 5.000000e-02 : f32
    %28 = vector.broadcast %cst_13 : f32 to vector<88x16xf32>
    %29 = arith.cmpf ogt, %24, %28 : vector<88x16xf32>
    %30 = arith.andi %27, %29 : vector<88x16xi1>
    %cst_14 = arith.constant 0.000000e+00 : f32
    %31 = vector.broadcast %cst_14 : f32 to vector<88x16xf32>
    %32 = arith.select %30, %24, %31 : vector<88x16xi1>, vector<88x16xf32>
    %cst_15 = arith.constant 0.000000e+00 : f32
    %33 = vector.broadcast %cst_15 : f32 to vector<88x76xf32>
    %34 = tpu.concatenate %19, %32, %33 in 1 : vector<88x36xf32>, vector<88x16xf32>, vector<88x76xf32> -> vector<88x128xf32>
    %c0_16 = arith.constant 0 : index
    %c0_17 = arith.constant 0 : index
    %35 = vector.load %arg6[%c0_16, %c0_17] : memref<88x128xf32, #tpu.memory_space<vmem>>, vector<88x128xf32>
    tpu.vector_store %arg6[%c0_16, %c0_17], %34 {strides = array<i32>} : memref<88x128xf32, #tpu.memory_space<vmem>>, vector<88x128xf32>,
    return
  }
  func.func @transform_0(%arg0: i32) -> (i32, i32) {
    %c0_i32 = arith.constant 0 : i32
    %c0_i32_0 = arith.constant 0 : i32
    %c0_i32_1 = arith.constant 0 : i32
    return %c0_i32, %c0_i32_0 : i32, i32
  }
  func.func @transform_1(%arg0: i32) -> (i32, i32) {
    %c0_i32 = arith.constant 0 : i32
    %c0_i32_0 = arith.constant 0 : i32
    %c0_i32_1 = arith.constant 0 : i32
    return %c0_i32, %c0_i32_0 : i32, i32
  }
  func.func @transform_2(%arg0: i32) -> (i32, i32) {
    %c0_i32 = arith.constant 0 : i32
    %c0_i32_0 = arith.constant 0 : i32
    %c0_i32_1 = arith.constant 0 : i32
    return %c0_i32, %c0_i32_0 : i32, i32
  }
  func.func @transform_3(%arg0: i32) -> (i32, i32) {
    %c0_i32 = arith.constant 0 : i32
    %c0_i32_0 = arith.constant 0 : i32
    %c0_i32_1 = arith.constant 0 : i32
    return %c0_i32, %c0_i32_0 : i32, i32
  }
  func.func @transform_4(%arg0: i32) -> (i32, i32) {
    %c0_i32 = arith.constant 0 : i32
    %c0_i32_0 = arith.constant 0 : i32
    %c0_i32_1 = arith.constant 0 : i32
    return %c0_i32, %c0_i32_0 : i32, i32
  }
  func.func @transform_5(%arg0: i32) -> (i32, i32) {
    %c0_i32 = arith.constant 0 : i32
    %c0_i32_0 = arith.constant 0 : i32
    %c0_i32_1 = arith.constant 0 : i32
    return %c0_i32, %c0_i32_0 : i32, i32
  }
}

</mosaic_0001>

<bundles_post_ra>
// kernel: squeeze.11
= control target key start
LH: loop header
LB: loop body
LE: loop exit
PB: predicated region body
PF: predicated region fallthrough
CT: control target
= control target key end

     0   :  { %s2245_s10 = smov 120   ;;  %vm3_vm0 = vcmask 64512   ;;  %s2247_s3 = smov 104   ;;  %s4387_s0 = inlined_call_operand.vmem [shape: f32[1,3,64,64], index: 0, kind: input, shape index: {}]   ;;  %s4388_s1 = inlined_call_operand.vmem [shape: f32[3,8,8,8,8], index: 1, kind: output, shape index: {}]  }
   0x1   :  { %v2265_v0 = vld [vmem:[%s4387_s0 + $0x10] sm:$0xff]   ;;  %v2270_v1 = vld [vmem:[%s4387_s0] sm:$0xff]   ;;  %v2286_v3 = vld [vmem:[%s4387_s0 + $0x18] sm:$0xff]   ;;  %s2248_s16 = smov 96   ;;  %s2249_s27 = smov 88  }
   0x2   :  { %186 = vrot.lane.b32.xlu1 %v2265_v0, %s2245_s10  ;;  %168 = vrot.lane.b32.xlu0 %v2270_v1, %s2245_s10  ;;  %v2279_v2 = vld [vmem:[%s4387_s0 + $0x20] sm:$0xff]   ;;  %v2291_v4 = vld [vmem:[%s4387_s0 + $0x8] sm:$0xff]   ;;  %s2250_s18 = smov 80   ;;  %s2251_s14 = smov 72  }
   0x3   :  { %204 = vrot.lane.b32.xlu2 %v2279_v2, %s2245_s10  ;;  %v2296_v5 = vld [vmem:[%s4387_s0 + $0x28] sm:$0xff]   ;;  %v2307_v6 = vld [vmem:[%s4387_s0 + $0x38] sm:$0xff]   ;;  %v2312_v7 = vld [vmem:[%s4387_s0 + $0x30] sm:$0xff]  }
   0x4   :  { %v2317_v8 = vld [vmem:[%s4387_s0 + $0x40] sm:$0xff]   ;;  %v2328_v9 = vld [vmem:[%s4387_s0 + $0x50] sm:$0xff]   ;;  %v2333_v10 = vld [vmem:[%s4387_s0 + $0x48] sm:$0xff]  }
   0x5   :  { %v2338_v11 = vld [vmem:[%s4387_s0 + $0x58] sm:$0xff]   ;;  %v2349_v12 = vld [vmem:[%s4387_s0 + $0x68] sm:$0xff]   ;;  %v2354_v13 = vld [vmem:[%s4387_s0 + $0x60] sm:$0xff]  }
   0x6   :  { %v2359_v14 = vld [vmem:[%s4387_s0 + $0x70] sm:$0xff]   ;;  %v2370_v15 = vld [vmem:[%s4387_s0 + $0x80] sm:$0xff]   ;;  %v2375_v16 = vld [vmem:[%s4387_s0 + $0x78] sm:$0xff]  }
   0x7   :  { %v2380_v17 = vld [vmem:[%s4387_s0 + $0x88] sm:$0xff]   ;;  %v2391_v18 = vld [vmem:[%s4387_s0 + $0x98] sm:$0xff]   ;;  %v2396_v19 = vld [vmem:[%s4387_s0 + $0x90] sm:$0xff]  }
   0x8   :  { %v2401_v20 = vld [vmem:[%s4387_s0 + $0xa0] sm:$0xff]   ;;  %v2412_v21 = vld [vmem:[%s4387_s0 + $0xb0] sm:$0xff]   ;;  %v2417_v22 = vld [vmem:[%s4387_s0 + $0xa8] sm:$0xff]  }
   0x9   :  { %v2422_v23 = vld [vmem:[%s4387_s0 + $0xb8] sm:$0xff]  }
   0xa   :  { %195 = vrot.lane.b32.xlu1 %v2286_v3, %s2245_s10  ;;  %177 = vrot.lane.b32.xlu0 %v2291_v4, %s2245_s10 }
   0xb   :  { %213 = vrot.lane.b32.xlu2 %v2296_v5, %s2245_s10 }
  0x12   :  { %231 = vrot.lane.b32.xlu1 %v2307_v6, %s2245_s10  ;;  %222 = vrot.lane.b32.xlu0 %v2312_v7, %s2245_s10 }
  0x13   :  { %240 = vrot.lane.b32.xlu2 %v2317_v8, %s2245_s10 }
  0x1a   :  { %258 = vrot.lane.b32.xlu1 %v2328_v9, %s2245_s10  ;;  %249 = vrot.lane.b32.xlu0 %v2333_v10, %s2245_s10 }
  0x1b   :  { %267 = vrot.lane.b32.xlu2 %v2338_v11, %s2245_s10 }
  0x22   :  { %285 = vrot.lane.b32.xlu1 %v2349_v12, %s2245_s10  ;;  %276 = vrot.lane.b32.xlu0 %v2354_v13, %s2245_s10 }
  0x23   :  { %294 = vrot.lane.b32.xlu2 %v2359_v14, %s2245_s10 }
  0x2a   :  { %312 = vrot.lane.b32.xlu1 %v2370_v15, %s2245_s10  ;;  %303 = vrot.lane.b32.xlu0 %v2375_v16, %s2245_s10 }
  0x2b   :  { %321 = vrot.lane.b32.xlu2 %v2380_v17, %s2245_s10 }
  0x32   :  { %339 = vrot.lane.b32.xlu1 %v2391_v18, %s2245_s10  ;;  %330 = vrot.lane.b32.xlu0 %v2396_v19, %s2245_s10 }
  0x33   :  { %348 = vrot.lane.b32.xlu2 %v2401_v20, %s2245_s10 }
  0x3a   :  { %366 = vrot.lane.b32.xlu1 %v2412_v21, %s2245_s10  ;;  %357 = vrot.lane.b32.xlu0 %v2417_v22, %s2245_s10 }
  0x3b   :  { %375 = vrot.lane.b32.xlu2 %v2422_v23, %s2245_s10  ;;  %s2246_s10 = smov 112  }
  0x42   :  { %392 = vrot.lane.b32.xlu1 %v2291_v4, %s2246_s10  ;;  %383 = vrot.lane.b32.xlu0 %v2270_v1, %s2246_s10 }
  0x43   :  { %401 = vrot.lane.b32.xlu2 %v2265_v0, %s2246_s10 }
  0x4a   :  { %419 = vrot.lane.b32.xlu1 %v2279_v2, %s2246_s10  ;;  %410 = vrot.lane.b32.xlu0 %v2286_v3, %s2246_s10 }
  0x4b   :  { %428 = vrot.lane.b32.xlu2 %v2296_v5, %s2246_s10 }
  0x52   :  { %446 = vrot.lane.b32.xlu1 %v2307_v6, %s2246_s10  ;;  %437 = vrot.lane.b32.xlu0 %v2312_v7, %s2246_s10 }
  0x53   :  { %455 = vrot.lane.b32.xlu2 %v2317_v8, %s2246_s10 }
  0x5a   :  { %473 = vrot.lane.b32.xlu1 %v2328_v9, %s2246_s10  ;;  %464 = vrot.lane.b32.xlu0 %v2333_v10, %s2246_s10 }
  0x5b   :  { %482 = vrot.lane.b32.xlu2 %v2338_v11, %s2246_s10 }
  0x5d   :  { %v205_v24 = vpop.permute.xlu2 %204  }
  0x5e   :  { %1753 = vst.msk [vmem:[%s4388_s1 + $0x101] ss:$8 sm:$0xf] %vm3_vm0, %v205_v24  }
  0x5f   :  { %1754 = vst.msk [vmem:[%s4388_s1 + $0x101] ss:$8 sm:$0xf0] %vm3_vm0, %v205_v24  }
  0x62   :  { %500 = vrot.lane.b32.xlu1 %v2349_v12, %s2246_s10  ;;  %491 = vrot.lane.b32.xlu0 %v2354_v13, %s2246_s10 }
  0x63   :  { %509 = vrot.lane.b32.xlu2 %v2359_v14, %s2246_s10 }
  0x65   :  { %v214_v25 = vpop.permute.xlu2 %213  }
  0x66   :  { %1756 = vst.msk [vmem:[%s4388_s1 + $0x141] ss:$8 sm:$0xf] %vm3_vm0, %v214_v25  }
  0x67   :  { %1757 = vst.msk [vmem:[%s4388_s1 + $0x141] ss:$8 sm:$0xf0] %vm3_vm0, %v214_v25  }
  0x6a   :  { %527 = vrot.lane.b32.xlu1 %v2370_v15, %s2246_s10  ;;  %518 = vrot.lane.b32.xlu0 %v2375_v16, %s2246_s10 }
  0x6b   :  { %536 = vrot.lane.b32.xlu2 %v2380_v17, %s2246_s10 }
  0x6d   :  { %v241_v26 = vpop.permute.xlu2 %240  }
  0x6e   :  { %1765 = vst.msk [vmem:[%s4388_s1 + $0x201] ss:$8 sm:$0xf] %vm3_vm0, %v241_v26  }
  0x6f   :  { %1766 = vst.msk [vmem:[%s4388_s1 + $0x201] ss:$8 sm:$0xf0] %vm3_vm0, %v241_v26  }
  0x72   :  { %554 = vrot.lane.b32.xlu1 %v2391_v18, %s2246_s10  ;;  %545 = vrot.lane.b32.xlu0 %v2396_v19, %s2246_s10 }
  0x73   :  { %563 = vrot.lane.b32.xlu2 %v2401_v20, %s2246_s10 }
  0x74   :  { %v187_v27 = vpop.permute.xlu1 %186   ;;  %v169_v28 = vpop.permute.xlu0 %168  }
  0x75   :  { %1747 = vst.msk [vmem:[%s4388_s1 + $0x81] ss:$8 sm:$0xf] %vm3_vm0, %v187_v27   ;;  %v268_v29 = vpop.permute.xlu2 %267  }
  0x76   :  { %1748 = vst.msk [vmem:[%s4388_s1 + $0x81] ss:$8 sm:$0xf0] %vm3_vm0, %v187_v27  }
  0x77   :  { %1741 = vst.msk [vmem:[%s4388_s1 + $0x1] ss:$8 sm:$0xf] %vm3_vm0, %v169_v28  }
  0x78   :  { %1742 = vst.msk [vmem:[%s4388_s1 + $0x1] ss:$8 sm:$0xf0] %vm3_vm0, %v169_v28  }
  0x79   :  { %1774 = vst.msk [vmem:[%s4388_s1 + $0x2c1] ss:$8 sm:$0xf] %vm3_vm0, %v268_v29  }
  0x7a   :  { %581 = vrot.lane.b32.xlu1 %v2412_v21, %s2246_s10  ;;  %572 = vrot.lane.b32.xlu0 %v2417_v22, %s2246_s10  ;;  %1775 = vst.msk [vmem:[%s4388_s1 + $0x2c1] ss:$8 sm:$0xf0] %vm3_vm0, %v268_v29  }
  0x7b   :  { %590 = vrot.lane.b32.xlu2 %v2422_v23, %s2246_s10 }
  0x7c   :  { %v196_v30 = vpop.permute.xlu1 %195   ;;  %v178_v31 = vpop.permute.xlu0 %177  }
  0x7d   :  { %1750 = vst.msk [vmem:[%s4388_s1 + $0xc1] ss:$8 sm:$0xf] %vm3_vm0, %v196_v30   ;;  %v295_v32 = vpop.permute.xlu2 %294  }
  0x7e   :  { %1751 = vst.msk [vmem:[%s4388_s1 + $0xc1] ss:$8 sm:$0xf0] %vm3_vm0, %v196_v30  }
  0x7f   :  { %1744 = vst.msk [vmem:[%s4388_s1 + $0x41] ss:$8 sm:$0xf] %vm3_vm0, %v178_v31  }
  0x80   :  { %1745 = vst.msk [vmem:[%s4388_s1 + $0x41] ss:$8 sm:$0xf0] %vm3_vm0, %v178_v31  }
  0x81   :  { %1783 = vst.msk [vmem:[%s4388_s1 + $0x381] ss:$8 sm:$0xf] %vm3_vm0, %v295_v32  }
  0x82   :  { %607 = vrot.lane.b32.xlu1 %v2291_v4, %s2247_s3  ;;  %598 = vrot.lane.b32.xlu0 %v2270_v1, %s2247_s3  ;;  %1784 = vst.msk [vmem:[%s4388_s1 + $0x381] ss:$8 sm:$0xf0] %vm3_vm0, %v295_v32  }
  0x83   :  { %616 = vrot.lane.b32.xlu2 %v2265_v0, %s2247_s3 }
  0x84   :  { %v232_v33 = vpop.permute.xlu1 %231   ;;  %v223_v34 = vpop.permute.xlu0 %222  }
  0x85   :  { %1762 = vst.msk [vmem:[%s4388_s1 + $0x1c1] ss:$8 sm:$0xf] %vm3_vm0, %v232_v33   ;;  %v322_v35 = vpop.permute.xlu2 %321  }
  0x86   :  { %1763 = vst.msk [vmem:[%s4388_s1 + $0x1c1] ss:$8 sm:$0xf0] %vm3_vm0, %v232_v33  }
  0x87   :  { %1759 = vst.msk [vmem:[%s4388_s1 + $0x181] ss:$8 sm:$0xf] %vm3_vm0, %v223_v34  }
  0x88   :  { %1760 = vst.msk [vmem:[%s4388_s1 + $0x181] ss:$8 sm:$0xf0] %vm3_vm0, %v223_v34  }
  0x89   :  { %1792 = vst.msk [vmem:[%s4388_s1 + $0x441] ss:$8 sm:$0xf] %vm3_vm0, %v322_v35  }
  0x8a   :  { %634 = vrot.lane.b32.xlu1 %v2279_v2, %s2247_s3  ;;  %625 = vrot.lane.b32.xlu0 %v2286_v3, %s2247_s3  ;;  %1793 = vst.msk [vmem:[%s4388_s1 + $0x441] ss:$8 sm:$0xf0] %vm3_vm0, %v322_v35  }
  0x8b   :  { %643 = vrot.lane.b32.xlu2 %v2296_v5, %s2247_s3 }
  0x8c   :  { %v259_v36 = vpop.permute.xlu1 %258   ;;  %v250_v37 = vpop.permute.xlu0 %249  }
  0x8d   :  { %1771 = vst.msk [vmem:[%s4388_s1 + $0x281] ss:$8 sm:$0xf] %vm3_vm0, %v259_v36   ;;  %v349_v38 = vpop.permute.xlu2 %348  }
  0x8e   :  { %1772 = vst.msk [vmem:[%s4388_s1 + $0x281] ss:$8 sm:$0xf0] %vm3_vm0, %v259_v36  }
  0x8f   :  { %1768 = vst.msk [vmem:[%s4388_s1 + $0x241] ss:$8 sm:$0xf] %vm3_vm0, %v250_v37  }
  0x90   :  { %1769 = vst.msk [vmem:[%s4388_s1 + $0x241] ss:$8 sm:$0xf0] %vm3_vm0, %v250_v37  }
  0x91   :  { %1801 = vst.msk [vmem:[%s4388_s1 + $0x501] ss:$8 sm:$0xf] %vm3_vm0, %v349_v38  }
  0x92   :  { %661 = vrot.lane.b32.xlu1 %v2307_v6, %s2247_s3  ;;  %652 = vrot.lane.b32.xlu0 %v2312_v7, %s2247_s3  ;;  %1802 = vst.msk [vmem:[%s4388_s1 + $0x501] ss:$8 sm:$0xf0] %vm3_vm0, %v349_v38  }
  0x93   :  { %670 = vrot.lane.b32.xlu2 %v2317_v8, %s2247_s3 }
  0x94   :  { %v286_v39 = vpop.permute.xlu1 %285   ;;  %v277_v40 = vpop.permute.xlu0 %276  }
  0x95   :  { %1780 = vst.msk [vmem:[%s4388_s1 + $0x341] ss:$8 sm:$0xf] %vm3_vm0, %v286_v39   ;;  %v376_v41 = vpop.permute.xlu2 %375  }
  0x96   :  { %1781 = vst.msk [vmem:[%s4388_s1 + $0x341] ss:$8 sm:$0xf0] %vm3_vm0, %v286_v39  }
  0x97   :  { %1777 = vst.msk [vmem:[%s4388_s1 + $0x301] ss:$8 sm:$0xf] %vm3_vm0, %v277_v40  }
  0x98   :  { %1778 = vst.msk [vmem:[%s4388_s1 + $0x301] ss:$8 sm:$0xf0] %vm3_vm0, %v277_v40  }
  0x99   :  { %1810 = vst.msk [vmem:[%s4388_s1 + $0x5c1] ss:$8 sm:$0xf] %vm3_vm0, %v376_v41  }
  0x9a   :  { %688 = vrot.lane.b32.xlu1 %v2328_v9, %s2247_s3  ;;  %679 = vrot.lane.b32.xlu0 %v2333_v10, %s2247_s3  ;;  %1811 = vst.msk [vmem:[%s4388_s1 + $0x5c1] ss:$8 sm:$0xf0] %vm3_vm0, %v376_v41  }
  0x9b   :  { %697 = vrot.lane.b32.xlu2 %v2338_v11, %s2247_s3 }
  0x9c   :  { %v313_v42 = vpop.permute.xlu1 %312   ;;  %v304_v43 = vpop.permute.xlu0 %303  }
  0x9d   :  { %1789 = vst.msk [vmem:[%s4388_s1 + $0x401] ss:$8 sm:$0xf] %vm3_vm0, %v313_v42   ;;  %v402_v44 = vpop.permute.xlu2 %401  }
  0x9e   :  { %1790 = vst.msk [vmem:[%s4388_s1 + $0x401] ss:$8 sm:$0xf0] %vm3_vm0, %v313_v42  }
  0x9f   :  { %1786 = vst.msk [vmem:[%s4388_s1 + $0x3c1] ss:$8 sm:$0xf] %vm3_vm0, %v304_v43  }
  0xa0   :  { %1787 = vst.msk [vmem:[%s4388_s1 + $0x3c1] ss:$8 sm:$0xf0] %vm3_vm0, %v304_v43  }
  0xa1   :  { %1818 = vst.msk [vmem:[%s4388_s1 + $0x82] ss:$8 sm:$0xf] %vm3_vm0, %v402_v44  }
  0xa2   :  { %715 = vrot.lane.b32.xlu1 %v2349_v12, %s2247_s3  ;;  %706 = vrot.lane.b32.xlu0 %v2354_v13, %s2247_s3  ;;  %1819 = vst.msk [vmem:[%s4388_s1 + $0x82] ss:$8 sm:$0xf0] %vm3_vm0, %v402_v44  }
  0xa3   :  { %724 = vrot.lane.b32.xlu2 %v2359_v14, %s2247_s3 }
  0xa4   :  { %v340_v45 = vpop.permute.xlu1 %339   ;;  %v331_v46 = vpop.permute.xlu0 %330  }
  0xa5   :  { %1798 = vst.msk [vmem:[%s4388_s1 + $0x4c1] ss:$8 sm:$0xf] %vm3_vm0, %v340_v45   ;;  %v429_v47 = vpop.permute.xlu2 %428  }
  0xa6   :  { %1799 = vst.msk [vmem:[%s4388_s1 + $0x4c1] ss:$8 sm:$0xf0] %vm3_vm0, %v340_v45  }
  0xa7   :  { %1795 = vst.msk [vmem:[%s4388_s1 + $0x481] ss:$8 sm:$0xf] %vm3_vm0, %v331_v46  }
  0xa8   :  { %1796 = vst.msk [vmem:[%s4388_s1 + $0x481] ss:$8 sm:$0xf0] %vm3_vm0, %v331_v46  }
  0xa9   :  { %1827 = vst.msk [vmem:[%s4388_s1 + $0x142] ss:$8 sm:$0xf] %vm3_vm0, %v429_v47  }
  0xaa   :  { %742 = vrot.lane.b32.xlu1 %v2370_v15, %s2247_s3  ;;  %733 = vrot.lane.b32.xlu0 %v2375_v16, %s2247_s3  ;;  %1828 = vst.msk [vmem:[%s4388_s1 + $0x142] ss:$8 sm:$0xf0] %vm3_vm0, %v429_v47  }
  0xab   :  { %751 = vrot.lane.b32.xlu2 %v2380_v17, %s2247_s3 }
  0xac   :  { %v367_v48 = vpop.permute.xlu1 %366   ;;  %v358_v49 = vpop.permute.xlu0 %357  }
  0xad   :  { %1807 = vst.msk [vmem:[%s4388_s1 + $0x581] ss:$8 sm:$0xf] %vm3_vm0, %v367_v48   ;;  %v456_v50 = vpop.permute.xlu2 %455  }
  0xae   :  { %1808 = vst.msk [vmem:[%s4388_s1 + $0x581] ss:$8 sm:$0xf0] %vm3_vm0, %v367_v48  }
  0xaf   :  { %1804 = vst.msk [vmem:[%s4388_s1 + $0x541] ss:$8 sm:$0xf] %vm3_vm0, %v358_v49  }
  0xb0   :  { %1805 = vst.msk [vmem:[%s4388_s1 + $0x541] ss:$8 sm:$0xf0] %vm3_vm0, %v358_v49  }
  0xb1   :  { %1836 = vst.msk [vmem:[%s4388_s1 + $0x202] ss:$8 sm:$0xf] %vm3_vm0, %v456_v50  }
  0xb2   :  { %769 = vrot.lane.b32.xlu1 %v2391_v18, %s2247_s3  ;;  %760 = vrot.lane.b32.xlu0 %v2396_v19, %s2247_s3  ;;  %1837 = vst.msk [vmem:[%s4388_s1 + $0x202] ss:$8 sm:$0xf0] %vm3_vm0, %v456_v50  }
  0xb3   :  { %778 = vrot.lane.b32.xlu2 %v2401_v20, %s2247_s3 }
  0xb4   :  { %v393_v51 = vpop.permute.xlu1 %392   ;;  %v384_v52 = vpop.permute.xlu0 %383  }
  0xb5   :  { %1815 = vst.msk [vmem:[%s4388_s1 + $0x42] ss:$8 sm:$0xf] %vm3_vm0, %v393_v51   ;;  %v483_v53 = vpop.permute.xlu2 %482  }
  0xb6   :  { %1816 = vst.msk [vmem:[%s4388_s1 + $0x42] ss:$8 sm:$0xf0] %vm3_vm0, %v393_v51  }
  0xb7   :  { %1812 = vst.msk [vmem:[%s4388_s1 + $0x2] ss:$8 sm:$0xf] %vm3_vm0, %v384_v52  }
  0xb8   :  { %1813 = vst.msk [vmem:[%s4388_s1 + $0x2] ss:$8 sm:$0xf0] %vm3_vm0, %v384_v52  }
  0xb9   :  { %1845 = vst.msk [vmem:[%s4388_s1 + $0x2c2] ss:$8 sm:$0xf] %vm3_vm0, %v483_v53  }
  0xba   :  { %796 = vrot.lane.b32.xlu1 %v2412_v21, %s2247_s3  ;;  %787 = vrot.lane.b32.xlu0 %v2417_v22, %s2247_s3  ;;  %1846 = vst.msk [vmem:[%s4388_s1 + $0x2c2] ss:$8 sm:$0xf0] %vm3_vm0, %v483_v53  }
  0xbb   :  { %805 = vrot.lane.b32.xlu2 %v2422_v23, %s2247_s3 }
  0xbc   :  { %v420_v54 = vpop.permute.xlu1 %419   ;;  %v411_v55 = vpop.permute.xlu0 %410  }
  0xbd   :  { %1824 = vst.msk [vmem:[%s4388_s1 + $0x102] ss:$8 sm:$0xf] %vm3_vm0, %v420_v54   ;;  %v510_v56 = vpop.permute.xlu2 %509  }
  0xbe   :  { %1825 = vst.msk [vmem:[%s4388_s1 + $0x102] ss:$8 sm:$0xf0] %vm3_vm0, %v420_v54  }
  0xbf   :  { %1821 = vst.msk [vmem:[%s4388_s1 + $0xc2] ss:$8 sm:$0xf] %vm3_vm0, %v411_v55  }
  0xc0   :  { %1822 = vst.msk [vmem:[%s4388_s1 + $0xc2] ss:$8 sm:$0xf0] %vm3_vm0, %v411_v55  }
  0xc1   :  { %1854 = vst.msk [vmem:[%s4388_s1 + $0x382] ss:$8 sm:$0xf] %vm3_vm0, %v510_v56  }
  0xc2   :  { %822 = vrot.lane.b32.xlu1 %v2291_v4, %s2248_s16  ;;  %813 = vrot.lane.b32.xlu0 %v2270_v1, %s2248_s16  ;;  %1855 = vst.msk [vmem:[%s4388_s1 + $0x382] ss:$8 sm:$0xf0] %vm3_vm0, %v510_v56  }
  0xc3   :  { %831 = vrot.lane.b32.xlu2 %v2265_v0, %s2248_s16 }
  0xc4   :  { %v447_v57 = vpop.permute.xlu1 %446   ;;  %v438_v58 = vpop.permute.xlu0 %437  }
  0xc5   :  { %1833 = vst.msk [vmem:[%s4388_s1 + $0x1c2] ss:$8 sm:$0xf] %vm3_vm0, %v447_v57   ;;  %v537_v59 = vpop.permute.xlu2 %536  }
  0xc6   :  { %1834 = vst.msk [vmem:[%s4388_s1 + $0x1c2] ss:$8 sm:$0xf0] %vm3_vm0, %v447_v57  }
  0xc7   :  { %1830 = vst.msk [vmem:[%s4388_s1 + $0x182] ss:$8 sm:$0xf] %vm3_vm0, %v438_v58  }
  0xc8   :  { %1831 = vst.msk [vmem:[%s4388_s1 + $0x182] ss:$8 sm:$0xf0] %vm3_vm0, %v438_v58   ;;  %v3456_v58 = vld [vmem:[%s4387_s0 + $0x68] sm:$0xff]  }
  0xc9   :  { %1863 = vst.msk [vmem:[%s4388_s1 + $0x442] ss:$8 sm:$0xf] %vm3_vm0, %v537_v59  }
  0xca   :  { %849 = vrot.lane.b32.xlu1 %v2279_v2, %s2248_s16  ;;  %840 = vrot.lane.b32.xlu0 %v2286_v3, %s2248_s16  ;;  %1864 = vst.msk [vmem:[%s4388_s1 + $0x442] ss:$8 sm:$0xf0] %vm3_vm0, %v537_v59   ;;  %v3469_v59 = vld [vmem:[%s4387_s0 + $0x70] sm:$0xff]  }
  0xcb   :  { %858 = vrot.lane.b32.xlu2 %v2296_v5, %s2248_s16  ;;  %1709 = vst.msk [vmem:[%s4388_s1 + $0x340] ss:$8 sm:$0xf] %vm3_vm0, %v3456_v58  }
  0xcc   :  { %v474_v60 = vpop.permute.xlu1 %473   ;;  %v465_v61 = vpop.permute.xlu0 %464   ;;  %1710 = vst.msk [vmem:[%s4388_s1 + $0x340] ss:$8 sm:$0xf0] %vm3_vm0, %v3456_v58  }
  0xcd   :  { %1842 = vst.msk [vmem:[%s4388_s1 + $0x282] ss:$8 sm:$0xf] %vm3_vm0, %v474_v60   ;;  %v564_v62 = vpop.permute.xlu2 %563  }
  0xce   :  { %1843 = vst.msk [vmem:[%s4388_s1 + $0x282] ss:$8 sm:$0xf0] %vm3_vm0, %v474_v60   ;;  %v3482_v60 = vld [vmem:[%s4387_s0] sm:$0xff]  }
  0xcf   :  { %1839 = vst.msk [vmem:[%s4388_s1 + $0x242] ss:$8 sm:$0xf] %vm3_vm0, %v465_v61  }
  0xd0   :  { %1840 = vst.msk [vmem:[%s4388_s1 + $0x242] ss:$8 sm:$0xf0] %vm3_vm0, %v465_v61  }
  0xd1   :  { %1872 = vst.msk [vmem:[%s4388_s1 + $0x502] ss:$8 sm:$0xf] %vm3_vm0, %v564_v62  }
  0xd2   :  { %876 = vrot.lane.b32.xlu1 %v2307_v6, %s2248_s16  ;;  %867 = vrot.lane.b32.xlu0 %v2312_v7, %s2248_s16  ;;  %1873 = vst.msk [vmem:[%s4388_s1 + $0x502] ss:$8 sm:$0xf0] %vm3_vm0, %v564_v62  }
  0xd3   :  { %885 = vrot.lane.b32.xlu2 %v2317_v8, %s2248_s16  ;;  %4 = vst.msk [vmem:[%s4388_s1] ss:$8 sm:$0xf] %vm3_vm0, %v3482_v60  }
  0xd4   :  { %v501_v63 = vpop.permute.xlu1 %500   ;;  %v492_v24 = vpop.permute.xlu0 %491   ;;  %5 = vst.msk [vmem:[%s4388_s1] ss:$8 sm:$0xf0] %vm3_vm0, %v3482_v60  }
  0xd5   :  { %1851 = vst.msk [vmem:[%s4388_s1 + $0x342] ss:$8 sm:$0xf] %vm3_vm0, %v501_v63   ;;  %v591_v25 = vpop.permute.xlu2 %590  }
  0xd6   :  { %1852 = vst.msk [vmem:[%s4388_s1 + $0x342] ss:$8 sm:$0xf0] %vm3_vm0, %v501_v63  }
  0xd7   :  { %1848 = vst.msk [vmem:[%s4388_s1 + $0x302] ss:$8 sm:$0xf] %vm3_vm0, %v492_v24  }
  0xd8   :  { %1849 = vst.msk [vmem:[%s4388_s1 + $0x302] ss:$8 sm:$0xf0] %vm3_vm0, %v492_v24   ;;  %v3511_v24 = vld [vmem:[%s4387_s0 + $0x80] sm:$0xff]  }
  0xd9   :  { %1881 = vst.msk [vmem:[%s4388_s1 + $0x5c2] ss:$8 sm:$0xf] %vm3_vm0, %v591_v25  }
  0xda   :  { %903 = vrot.lane.b32.xlu1 %v2328_v9, %s2248_s16  ;;  %894 = vrot.lane.b32.xlu0 %v2333_v10, %s2248_s16  ;;  %1882 = vst.msk [vmem:[%s4388_s1 + $0x5c2] ss:$8 sm:$0xf0] %vm3_vm0, %v591_v25   ;;  %v3516_v25 = vld [vmem:[%s4387_s0 + $0x78] sm:$0xff]  }
  0xdb   :  { %912 = vrot.lane.b32.xlu2 %v2338_v11, %s2248_s16  ;;  %1712 = vst.msk [vmem:[%s4388_s1 + $0x380] ss:$8 sm:$0xf] %vm3_vm0, %v3469_v59  }
  0xdc   :  { %v528_v26 = vpop.permute.xlu1 %527   ;;  %v519_v27 = vpop.permute.xlu0 %518   ;;  %1713 = vst.msk [vmem:[%s4388_s1 + $0x380] ss:$8 sm:$0xf0] %vm3_vm0, %v3469_v59  }
  0xdd   :  { %1860 = vst.msk [vmem:[%s4388_s1 + $0x402] ss:$8 sm:$0xf] %vm3_vm0, %v528_v26   ;;  %v617_v28 = vpop.permute.xlu2 %616  }
  0xde   :  { %1861 = vst.msk [vmem:[%s4388_s1 + $0x402] ss:$8 sm:$0xf0] %vm3_vm0, %v528_v26   ;;  %v3529_v26 = vld [vmem:[%s4387_s0 + $0x88] sm:$0xff]  }
  0xdf   :  { %1857 = vst.msk [vmem:[%s4388_s1 + $0x3c2] ss:$8 sm:$0xf] %vm3_vm0, %v519_v27  }
  0xe0   :  { %1858 = vst.msk [vmem:[%s4388_s1 + $0x3c2] ss:$8 sm:$0xf0] %vm3_vm0, %v519_v27   ;;  %v2169_v27 = vld [vmem:[%s4387_s0 + $0x8] sm:$0xff]  }
  0xe1   :  { %1889 = vst.msk [vmem:[%s4388_s1 + $0x83] ss:$8 sm:$0xf] %vm3_vm0, %v617_v28  }
  0xe2   :  { %930 = vrot.lane.b32.xlu1 %v2349_v12, %s2248_s16  ;;  %921 = vrot.lane.b32.xlu0 %v2354_v13, %s2248_s16  ;;  %1890 = vst.msk [vmem:[%s4388_s1 + $0x83] ss:$8 sm:$0xf0] %vm3_vm0, %v617_v28  }
  0xe3   :  { %939 = vrot.lane.b32.xlu2 %v2359_v14, %s2248_s16  ;;  %1673 = vst.msk [vmem:[%s4388_s1 + $0x40] ss:$8 sm:$0xf] %vm3_vm0, %v2169_v27  }
  0xe4   :  { %v555_v29 = vpop.permute.xlu1 %554   ;;  %v546_v30 = vpop.permute.xlu0 %545   ;;  %1674 = vst.msk [vmem:[%s4388_s1 + $0x40] ss:$8 sm:$0xf0] %vm3_vm0, %v2169_v27  }
  0xe5   :  { %1869 = vst.msk [vmem:[%s4388_s1 + $0x4c2] ss:$8 sm:$0xf] %vm3_vm0, %v555_v29   ;;  %v644_v31 = vpop.permute.xlu2 %643  }
  0xe6   :  { %1870 = vst.msk [vmem:[%s4388_s1 + $0x4c2] ss:$8 sm:$0xf0] %vm3_vm0, %v555_v29  }
  0xe7   :  { %1866 = vst.msk [vmem:[%s4388_s1 + $0x482] ss:$8 sm:$0xf] %vm3_vm0, %v546_v30  }
  0xe8   :  { %1867 = vst.msk [vmem:[%s4388_s1 + $0x482] ss:$8 sm:$0xf0] %vm3_vm0, %v546_v30  }
  0xe9   :  { %1898 = vst.msk [vmem:[%s4388_s1 + $0x143] ss:$8 sm:$0xf] %vm3_vm0, %v644_v31  }
  0xea   :  { %957 = vrot.lane.b32.xlu1 %v2370_v15, %s2248_s16  ;;  %948 = vrot.lane.b32.xlu0 %v2375_v16, %s2248_s16  ;;  %1899 = vst.msk [vmem:[%s4388_s1 + $0x143] ss:$8 sm:$0xf0] %vm3_vm0, %v644_v31   ;;  %v3567_v31 = vld [vmem:[%s4387_s0 + $0x98] sm:$0xff]  }
  0xeb   :  { %966 = vrot.lane.b32.xlu2 %v2380_v17, %s2248_s16  ;;  %1715 = vst.msk [vmem:[%s4388_s1 + $0x3c0] ss:$8 sm:$0xf] %vm3_vm0, %v3516_v25  }
  0xec   :  { %v582_v32 = vpop.permute.xlu1 %581   ;;  %v573_v33 = vpop.permute.xlu0 %572   ;;  %1716 = vst.msk [vmem:[%s4388_s1 + $0x3c0] ss:$8 sm:$0xf0] %vm3_vm0, %v3516_v25  }
  0xed   :  { %1878 = vst.msk [vmem:[%s4388_s1 + $0x582] ss:$8 sm:$0xf] %vm3_vm0, %v582_v32   ;;  %v671_v34 = vpop.permute.xlu2 %670  }
  0xee   :  { %1879 = vst.msk [vmem:[%s4388_s1 + $0x582] ss:$8 sm:$0xf0] %vm3_vm0, %v582_v32   ;;  %v3572_v32 = vld [vmem:[%s4387_s0 + $0x90] sm:$0xff]  }
  0xef   :  { %1875 = vst.msk [vmem:[%s4388_s1 + $0x542] ss:$8 sm:$0xf] %vm3_vm0, %v573_v33  }
  0xf0   :  { %1876 = vst.msk [vmem:[%s4388_s1 + $0x542] ss:$8 sm:$0xf0] %vm3_vm0, %v573_v33   ;;  %v3585_v33 = vld [vmem:[%s4387_s0 + $0xa0] sm:$0xff]  }
  0xf1   :  { %1907 = vst.msk [vmem:[%s4388_s1 + $0x203] ss:$8 sm:$0xf] %vm3_vm0, %v671_v34  }
  0xf2   :  { %984 = vrot.lane.b32.xlu1 %v2391_v18, %s2248_s16  ;;  %975 = vrot.lane.b32.xlu0 %v2396_v19, %s2248_s16  ;;  %1908 = vst.msk [vmem:[%s4388_s1 + $0x203] ss:$8 sm:$0xf0] %vm3_vm0, %v671_v34   ;;  %v2175_v34 = vld [vmem:[%s4387_s0 + $0x18] sm:$0xff]  }
  0xf3   :  { %993 = vrot.lane.b32.xlu2 %v2401_v20, %s2248_s16  ;;  %1679 = vst.msk [vmem:[%s4388_s1 + $0xc0] ss:$8 sm:$0xf] %vm3_vm0, %v2175_v34  }
  0xf4   :  { %v608_v35 = vpop.permute.xlu1 %607   ;;  %v599_v36 = vpop.permute.xlu0 %598   ;;  %1680 = vst.msk [vmem:[%s4388_s1 + $0xc0] ss:$8 sm:$0xf0] %vm3_vm0, %v2175_v34  }
  0xf5   :  { %1886 = vst.msk [vmem:[%s4388_s1 + $0x43] ss:$8 sm:$0xf] %vm3_vm0, %v608_v35   ;;  %v698_v37 = vpop.permute.xlu2 %697  }
  0xf6   :  { %1887 = vst.msk [vmem:[%s4388_s1 + $0x43] ss:$8 sm:$0xf0] %vm3_vm0, %v608_v35  }
  0xf7   :  { %1883 = vst.msk [vmem:[%s4388_s1 + $0x3] ss:$8 sm:$0xf] %vm3_vm0, %v599_v36  }
  0xf8   :  { %1884 = vst.msk [vmem:[%s4388_s1 + $0x3] ss:$8 sm:$0xf0] %vm3_vm0, %v599_v36  }
  0xf9   :  { %1916 = vst.msk [vmem:[%s4388_s1 + $0x2c3] ss:$8 sm:$0xf] %vm3_vm0, %v698_v37  }
  0xfa   :  { %1011 = vrot.lane.b32.xlu1 %v2412_v21, %s2248_s16  ;;  %1002 = vrot.lane.b32.xlu0 %v2417_v22, %s2248_s16  ;;  %1917 = vst.msk [vmem:[%s4388_s1 + $0x2c3] ss:$8 sm:$0xf0] %vm3_vm0, %v698_v37  }
  0xfb   :  { %1020 = vrot.lane.b32.xlu2 %v2422_v23, %s2248_s16  ;;  %1718 = vst.msk [vmem:[%s4388_s1 + $0x400] ss:$8 sm:$0xf] %vm3_vm0, %v3511_v24  }
  0xfc   :  { %v635_v38 = vpop.permute.xlu1 %634   ;;  %v626_v39 = vpop.permute.xlu0 %625   ;;  %1719 = vst.msk [vmem:[%s4388_s1 + $0x400] ss:$8 sm:$0xf0] %vm3_vm0, %v3511_v24  }
  0xfd   :  { %1895 = vst.msk [vmem:[%s4388_s1 + $0x103] ss:$8 sm:$0xf] %vm3_vm0, %v635_v38   ;;  %v725_v40 = vpop.permute.xlu2 %724  }
  0xfe   :  { %1896 = vst.msk [vmem:[%s4388_s1 + $0x103] ss:$8 sm:$0xf0] %vm3_vm0, %v635_v38   ;;  %v3623_v38 = vld [vmem:[%s4387_s0 + $0xb0] sm:$0xff]  }
  0xff   :  { %1892 = vst.msk [vmem:[%s4388_s1 + $0xc3] ss:$8 sm:$0xf] %vm3_vm0, %v626_v39  }
 0x100   :  { %1893 = vst.msk [vmem:[%s4388_s1 + $0xc3] ss:$8 sm:$0xf0] %vm3_vm0, %v626_v39   ;;  %v3628_v39 = vld [vmem:[%s4387_s0 + $0xa8] sm:$0xff]  }
 0x101   :  { %1925 = vst.msk [vmem:[%s4388_s1 + $0x383] ss:$8 sm:$0xf] %vm3_vm0, %v725_v40  }
 0x102   :  { %1037 = vrot.lane.b32.xlu1 %v2291_v4, %s2249_s27  ;;  %1028 = vrot.lane.b32.xlu0 %v2270_v1, %s2249_s27  ;;  %1926 = vst.msk [vmem:[%s4388_s1 + $0x383] ss:$8 sm:$0xf0] %vm3_vm0, %v725_v40   ;;  %v3641_v40 = vld [vmem:[%s4387_s0 + $0xb8] sm:$0xff]  }
 0x103   :  { %1046 = vrot.lane.b32.xlu2 %v2265_v0, %s2249_s27  ;;  %1721 = vst.msk [vmem:[%s4388_s1 + $0x440] ss:$8 sm:$0xf] %vm3_vm0, %v3529_v26  }
 0x104   :  { %v662_v41 = vpop.permute.xlu1 %661   ;;  %v653_v42 = vpop.permute.xlu0 %652   ;;  %1722 = vst.msk [vmem:[%s4388_s1 + $0x440] ss:$8 sm:$0xf0] %vm3_vm0, %v3529_v26  }
 0x105   :  { %1904 = vst.msk [vmem:[%s4388_s1 + $0x1c3] ss:$8 sm:$0xf] %vm3_vm0, %v662_v41   ;;  %v752_v0 = vpop.permute.xlu2 %751  }
 0x106   :  { %1905 = vst.msk [vmem:[%s4388_s1 + $0x1c3] ss:$8 sm:$0xf0] %vm3_vm0, %v662_v41   ;;  %v2178_v41 = vld [vmem:[%s4387_s0 + $0x20] sm:$0xff]  }
 0x107   :  { %1901 = vst.msk [vmem:[%s4388_s1 + $0x183] ss:$8 sm:$0xf] %vm3_vm0, %v653_v42  }
 0x108   :  { %1902 = vst.msk [vmem:[%s4388_s1 + $0x183] ss:$8 sm:$0xf0] %vm3_vm0, %v653_v42  }
 0x109   :  { %1934 = vst.msk [vmem:[%s4388_s1 + $0x443] ss:$8 sm:$0xf] %vm3_vm0, %v752_v0  }
 0x10a   :  { %1064 = vrot.lane.b32.xlu1 %v2279_v2, %s2249_s27  ;;  %1055 = vrot.lane.b32.xlu0 %v2286_v3, %s2249_s27  ;;  %1935 = vst.msk [vmem:[%s4388_s1 + $0x443] ss:$8 sm:$0xf0] %vm3_vm0, %v752_v0  }
 0x10b   :  { %1073 = vrot.lane.b32.xlu2 %v2296_v5, %s2249_s27  ;;  %1682 = vst.msk [vmem:[%s4388_s1 + $0x100] ss:$8 sm:$0xf] %vm3_vm0, %v2178_v41  }
 0x10c   :  { %v689_v43 = vpop.permute.xlu1 %688   ;;  %v680_v44 = vpop.permute.xlu0 %679   ;;  %1683 = vst.msk [vmem:[%s4388_s1 + $0x100] ss:$8 sm:$0xf0] %vm3_vm0, %v2178_v41  }
 0x10d   :  { %1913 = vst.msk [vmem:[%s4388_s1 + $0x283] ss:$8 sm:$0xf] %vm3_vm0, %v689_v43   ;;  %v779_v5 = vpop.permute.xlu2 %778  }
 0x10e   :  { %1914 = vst.msk [vmem:[%s4388_s1 + $0x283] ss:$8 sm:$0xf0] %vm3_vm0, %v689_v43  }
 0x10f   :  { %1910 = vst.msk [vmem:[%s4388_s1 + $0x243] ss:$8 sm:$0xf] %vm3_vm0, %v680_v44  }
 0x110   :  { %1911 = vst.msk [vmem:[%s4388_s1 + $0x243] ss:$8 sm:$0xf0] %vm3_vm0, %v680_v44   ;;  %v2184_v44 = vld [vmem:[%s4387_s0 + $0x30] sm:$0xff]  }
 0x111   :  { %1943 = vst.msk [vmem:[%s4388_s1 + $0x503] ss:$8 sm:$0xf] %vm3_vm0, %v779_v5  }
 0x112   :  { %1091 = vrot.lane.b32.xlu1 %v2307_v6, %s2249_s27  ;;  %1082 = vrot.lane.b32.xlu0 %v2312_v7, %s2249_s27  ;;  %1944 = vst.msk [vmem:[%s4388_s1 + $0x503] ss:$8 sm:$0xf0] %vm3_vm0, %v779_v5  }
 0x113   :  { %1100 = vrot.lane.b32.xlu2 %v2317_v8, %s2249_s27  ;;  %1688 = vst.msk [vmem:[%s4388_s1 + $0x180] ss:$8 sm:$0xf] %vm3_vm0, %v2184_v44  }
 0x114   :  { %v716_v45 = vpop.permute.xlu1 %715   ;;  %v707_v46 = vpop.permute.xlu0 %706   ;;  %1689 = vst.msk [vmem:[%s4388_s1 + $0x180] ss:$8 sm:$0xf0] %vm3_vm0, %v2184_v44  }
 0x115   :  { %1922 = vst.msk [vmem:[%s4388_s1 + $0x343] ss:$8 sm:$0xf] %vm3_vm0, %v716_v45   ;;  %v806_v8 = vpop.permute.xlu2 %805  }
 0x116   :  { %1923 = vst.msk [vmem:[%s4388_s1 + $0x343] ss:$8 sm:$0xf0] %vm3_vm0, %v716_v45  }
 0x117   :  { %1919 = vst.msk [vmem:[%s4388_s1 + $0x303] ss:$8 sm:$0xf] %vm3_vm0, %v707_v46  }
 0x118   :  { %1920 = vst.msk [vmem:[%s4388_s1 + $0x303] ss:$8 sm:$0xf0] %vm3_vm0, %v707_v46  }
 0x119   :  { %1952 = vst.msk [vmem:[%s4388_s1 + $0x5c3] ss:$8 sm:$0xf] %vm3_vm0, %v806_v8  }
 0x11a   :  { %1118 = vrot.lane.b32.xlu1 %v2328_v9, %s2249_s27  ;;  %1109 = vrot.lane.b32.xlu0 %v2333_v10, %s2249_s27  ;;  %1953 = vst.msk [vmem:[%s4388_s1 + $0x5c3] ss:$8 sm:$0xf0] %vm3_vm0, %v806_v8   ;;  %v2187_v8 = vld [vmem:[%s4387_s0 + $0x38] sm:$0xff]  }
 0x11b   :  { %1127 = vrot.lane.b32.xlu2 %v2338_v11, %s2249_s27  ;;  %1691 = vst.msk [vmem:[%s4388_s1 + $0x1c0] ss:$8 sm:$0xf] %vm3_vm0, %v2187_v8  }
 0x11c   :  { %v743_v47 = vpop.permute.xlu1 %742   ;;  %v734_v48 = vpop.permute.xlu0 %733   ;;  %1692 = vst.msk [vmem:[%s4388_s1 + $0x1c0] ss:$8 sm:$0xf0] %vm3_vm0, %v2187_v8  }
 0x11d   :  { %1931 = vst.msk [vmem:[%s4388_s1 + $0x403] ss:$8 sm:$0xf] %vm3_vm0, %v743_v47   ;;  %v832_v11 = vpop.permute.xlu2 %831  }
 0x11e   :  { %1932 = vst.msk [vmem:[%s4388_s1 + $0x403] ss:$8 sm:$0xf0] %vm3_vm0, %v743_v47  }
 0x11f   :  { %1928 = vst.msk [vmem:[%s4388_s1 + $0x3c3] ss:$8 sm:$0xf] %vm3_vm0, %v734_v48  }
 0x120   :  { %1929 = vst.msk [vmem:[%s4388_s1 + $0x3c3] ss:$8 sm:$0xf0] %vm3_vm0, %v734_v48  }
 0x121   :  { %1960 = vst.msk [vmem:[%s4388_s1 + $0x84] ss:$8 sm:$0xf] %vm3_vm0, %v832_v11  }
 0x122   :  { %1145 = vrot.lane.b32.xlu1 %v2349_v12, %s2249_s27  ;;  %1136 = vrot.lane.b32.xlu0 %v2354_v13, %s2249_s27  ;;  %1961 = vst.msk [vmem:[%s4388_s1 + $0x84] ss:$8 sm:$0xf0] %vm3_vm0, %v832_v11  }
 0x123   :  { %1154 = vrot.lane.b32.xlu2 %v2359_v14, %s2249_s27  ;;  %1724 = vst.msk [vmem:[%s4388_s1 + $0x480] ss:$8 sm:$0xf] %vm3_vm0, %v3572_v32  }
 0x124   :  { %v770_v12 = vpop.permute.xlu1 %769   ;;  %v761_v13 = vpop.permute.xlu0 %760   ;;  %1725 = vst.msk [vmem:[%s4388_s1 + $0x480] ss:$8 sm:$0xf0] %vm3_vm0, %v3572_v32  }
 0x125   :  { %1940 = vst.msk [vmem:[%s4388_s1 + $0x4c3] ss:$8 sm:$0xf] %vm3_vm0, %v770_v12   ;;  %v859_v14 = vpop.permute.xlu2 %858  }
 0x126   :  { %1941 = vst.msk [vmem:[%s4388_s1 + $0x4c3] ss:$8 sm:$0xf0] %vm3_vm0, %v770_v12   ;;  %v2193_v12 = vld [vmem:[%s4387_s0 + $0x48] sm:$0xff]  }
 0x127   :  { %1937 = vst.msk [vmem:[%s4388_s1 + $0x483] ss:$8 sm:$0xf] %vm3_vm0, %v761_v13  }
 0x128   :  { %1938 = vst.msk [vmem:[%s4388_s1 + $0x483] ss:$8 sm:$0xf0] %vm3_vm0, %v761_v13  }
 0x129   :  { %1969 = vst.msk [vmem:[%s4388_s1 + $0x144] ss:$8 sm:$0xf] %vm3_vm0, %v859_v14  }
 0x12a   :  { %1172 = vrot.lane.b32.xlu1 %v2370_v15, %s2249_s27  ;;  %1163 = vrot.lane.b32.xlu0 %v2375_v16, %s2249_s27  ;;  %1970 = vst.msk [vmem:[%s4388_s1 + $0x144] ss:$8 sm:$0xf0] %vm3_vm0, %v859_v14  }
 0x12b   :  { %1181 = vrot.lane.b32.xlu2 %v2380_v17, %s2249_s27  ;;  %1697 = vst.msk [vmem:[%s4388_s1 + $0x240] ss:$8 sm:$0xf] %vm3_vm0, %v2193_v12  }
 0x12c   :  { %v797_v15 = vpop.permute.xlu1 %796   ;;  %v788_v16 = vpop.permute.xlu0 %787   ;;  %1698 = vst.msk [vmem:[%s4388_s1 + $0x240] ss:$8 sm:$0xf0] %vm3_vm0, %v2193_v12  }
 0x12d   :  { %1949 = vst.msk [vmem:[%s4388_s1 + $0x583] ss:$8 sm:$0xf] %vm3_vm0, %v797_v15   ;;  %v886_v17 = vpop.permute.xlu2 %885  }
 0x12e   :  { %1950 = vst.msk [vmem:[%s4388_s1 + $0x583] ss:$8 sm:$0xf0] %vm3_vm0, %v797_v15  }
 0x12f   :  { %1946 = vst.msk [vmem:[%s4388_s1 + $0x543] ss:$8 sm:$0xf] %vm3_vm0, %v788_v16  }
 0x130   :  { %1947 = vst.msk [vmem:[%s4388_s1 + $0x543] ss:$8 sm:$0xf0] %vm3_vm0, %v788_v16   ;;  %v2196_v16 = vld [vmem:[%s4387_s0 + $0x50] sm:$0xff]  }
 0x131   :  { %1978 = vst.msk [vmem:[%s4388_s1 + $0x204] ss:$8 sm:$0xf] %vm3_vm0, %v886_v17  }
 0x132   :  { %1199 = vrot.lane.b32.xlu1 %v2391_v18, %s2249_s27  ;;  %1190 = vrot.lane.b32.xlu0 %v2396_v19, %s2249_s27  ;;  %1979 = vst.msk [vmem:[%s4388_s1 + $0x204] ss:$8 sm:$0xf0] %vm3_vm0, %v886_v17  }
 0x133   :  { %1208 = vrot.lane.b32.xlu2 %v2401_v20, %s2249_s27  ;;  %1700 = vst.msk [vmem:[%s4388_s1 + $0x280] ss:$8 sm:$0xf] %vm3_vm0, %v2196_v16  }
 0x134   :  { %v823_v18 = vpop.permute.xlu1 %822   ;;  %v814_v19 = vpop.permute.xlu0 %813   ;;  %1701 = vst.msk [vmem:[%s4388_s1 + $0x280] ss:$8 sm:$0xf0] %vm3_vm0, %v2196_v16  }
 0x135   :  { %1957 = vst.msk [vmem:[%s4388_s1 + $0x44] ss:$8 sm:$0xf] %vm3_vm0, %v823_v18   ;;  %v913_v20 = vpop.permute.xlu2 %912  }
 0x136   :  { %1958 = vst.msk [vmem:[%s4388_s1 + $0x44] ss:$8 sm:$0xf0] %vm3_vm0, %v823_v18  }
 0x137   :  { %1954 = vst.msk [vmem:[%s4388_s1 + $0x4] ss:$8 sm:$0xf] %vm3_vm0, %v814_v19  }
 0x138   :  { %1955 = vst.msk [vmem:[%s4388_s1 + $0x4] ss:$8 sm:$0xf0] %vm3_vm0, %v814_v19  }
 0x139   :  { %1987 = vst.msk [vmem:[%s4388_s1 + $0x2c4] ss:$8 sm:$0xf] %vm3_vm0, %v913_v20  }
 0x13a   :  { %1226 = vrot.lane.b32.xlu1 %v2412_v21, %s2249_s27  ;;  %1217 = vrot.lane.b32.xlu0 %v2417_v22, %s2249_s27  ;;  %1988 = vst.msk [vmem:[%s4388_s1 + $0x2c4] ss:$8 sm:$0xf0] %vm3_vm0, %v913_v20   ;;  %v3247_v21 = vld [vmem:[%s4387_s0 + $0x10] sm:$0xff]  }
 0x13b   :  { %1676 = vst.msk [vmem:[%s4388_s1 + $0x80] ss:$8 sm:$0xf] %vm3_vm0, %v3247_v21   ;;  %1235 = vrot.lane.b32.xlu2 %v2422_v23, %s2249_s27 }
 0x13c   :  { %v850_v22 = vpop.permute.xlu1 %849   ;;  %v841_v49 = vpop.permute.xlu0 %840   ;;  %1677 = vst.msk [vmem:[%s4388_s1 + $0x80] ss:$8 sm:$0xf0] %vm3_vm0, %v3247_v21  }
 0x13d   :  { %1966 = vst.msk [vmem:[%s4388_s1 + $0x104] ss:$8 sm:$0xf] %vm3_vm0, %v850_v22   ;;  %v940_v23 = vpop.permute.xlu2 %939  }
 0x13e   :  { %1967 = vst.msk [vmem:[%s4388_s1 + $0x104] ss:$8 sm:$0xf0] %vm3_vm0, %v850_v22  }
 0x13f   :  { %1963 = vst.msk [vmem:[%s4388_s1 + $0xc4] ss:$8 sm:$0xf] %vm3_vm0, %v841_v49  }
 0x140   :  { %1964 = vst.msk [vmem:[%s4388_s1 + $0xc4] ss:$8 sm:$0xf0] %vm3_vm0, %v841_v49  }
 0x141   :  { %1996 = vst.msk [vmem:[%s4388_s1 + $0x384] ss:$8 sm:$0xf] %vm3_vm0, %v940_v23  }
 0x142   :  { %1252 = vrot.lane.b32.xlu1 %v2291_v4, %s2250_s18  ;;  %1243 = vrot.lane.b32.xlu0 %v2270_v1, %s2250_s18  ;;  %1997 = vst.msk [vmem:[%s4388_s1 + $0x384] ss:$8 sm:$0xf0] %vm3_vm0, %v940_v23   ;;  %v3292_v1 = vld [vmem:[%s4387_s0 + $0x28] sm:$0xff]  }
 0x143   :  { %1685 = vst.msk [vmem:[%s4388_s1 + $0x140] ss:$8 sm:$0xf] %vm3_vm0, %v3292_v1   ;;  %1261 = vrot.lane.b32.xlu2 %v3247_v21, %s2250_s18 }
 0x144   :  { %v877_v4 = vpop.permute.xlu1 %876   ;;  %v868_v50 = vpop.permute.xlu0 %867   ;;  %1686 = vst.msk [vmem:[%s4388_s1 + $0x140] ss:$8 sm:$0xf0] %vm3_vm0, %v3292_v1  }
 0x145   :  { %1975 = vst.msk [vmem:[%s4388_s1 + $0x1c4] ss:$8 sm:$0xf] %vm3_vm0, %v877_v4   ;;  %v967_v51 = vpop.permute.xlu2 %966  }
 0x146   :  { %1976 = vst.msk [vmem:[%s4388_s1 + $0x1c4] ss:$8 sm:$0xf0] %vm3_vm0, %v877_v4  }
 0x147   :  { %1972 = vst.msk [vmem:[%s4388_s1 + $0x184] ss:$8 sm:$0xf] %vm3_vm0, %v868_v50  }
 0x148   :  { %1973 = vst.msk [vmem:[%s4388_s1 + $0x184] ss:$8 sm:$0xf0] %vm3_vm0, %v868_v50  }
 0x149   :  { %2005 = vst.msk [vmem:[%s4388_s1 + $0x444] ss:$8 sm:$0xf] %vm3_vm0, %v967_v51  }
 0x14a   :  { %1279 = vrot.lane.b32.xlu1 %v2279_v2, %s2250_s18  ;;  %1270 = vrot.lane.b32.xlu0 %v2286_v3, %s2250_s18  ;;  %2006 = vst.msk [vmem:[%s4388_s1 + $0x444] ss:$8 sm:$0xf0] %vm3_vm0, %v967_v51   ;;  %v3337_v2 = vld [vmem:[%s4387_s0 + $0x40] sm:$0xff]  }
 0x14b   :  { %1694 = vst.msk [vmem:[%s4388_s1 + $0x200] ss:$8 sm:$0xf] %vm3_vm0, %v3337_v2   ;;  %1288 = vrot.lane.b32.xlu2 %v3292_v1, %s2250_s18 }
 0x14c   :  { %v904_v3 = vpop.permute.xlu1 %903   ;;  %v895_v52 = vpop.permute.xlu0 %894   ;;  %1695 = vst.msk [vmem:[%s4388_s1 + $0x200] ss:$8 sm:$0xf0] %vm3_vm0, %v3337_v2  }
 0x14d   :  { %1984 = vst.msk [vmem:[%s4388_s1 + $0x284] ss:$8 sm:$0xf] %vm3_vm0, %v904_v3   ;;  %v994_v53 = vpop.permute.xlu2 %993  }
 0x14e   :  { %1985 = vst.msk [vmem:[%s4388_s1 + $0x284] ss:$8 sm:$0xf0] %vm3_vm0, %v904_v3  }
 0x14f   :  { %1981 = vst.msk [vmem:[%s4388_s1 + $0x244] ss:$8 sm:$0xf] %vm3_vm0, %v895_v52  }
 0x150   :  { %1982 = vst.msk [vmem:[%s4388_s1 + $0x244] ss:$8 sm:$0xf0] %vm3_vm0, %v895_v52  }
 0x151   :  { %2014 = vst.msk [vmem:[%s4388_s1 + $0x504] ss:$8 sm:$0xf] %vm3_vm0, %v994_v53  }
 0x152   :  { %1306 = vrot.lane.b32.xlu1 %v2307_v6, %s2250_s18  ;;  %1297 = vrot.lane.b32.xlu0 %v2312_v7, %s2250_s18  ;;  %2015 = vst.msk [vmem:[%s4388_s1 + $0x504] ss:$8 sm:$0xf0] %vm3_vm0, %v994_v53   ;;  %v3382_v6 = vld [vmem:[%s4387_s0 + $0x58] sm:$0xff]  }
 0x153   :  { %1703 = vst.msk [vmem:[%s4388_s1 + $0x2c0] ss:$8 sm:$0xf] %vm3_vm0, %v3382_v6   ;;  %1315 = vrot.lane.b32.xlu2 %v3337_v2, %s2250_s18 }
 0x154   :  { %v931_v7 = vpop.permute.xlu1 %930   ;;  %v922_v54 = vpop.permute.xlu0 %921   ;;  %1704 = vst.msk [vmem:[%s4388_s1 + $0x2c0] ss:$8 sm:$0xf0] %vm3_vm0, %v3382_v6  }
 0x155   :  { %1993 = vst.msk [vmem:[%s4388_s1 + $0x344] ss:$8 sm:$0xf] %vm3_vm0, %v931_v7   ;;  %v1021_v55 = vpop.permute.xlu2 %1020  }
 0x156   :  { %1994 = vst.msk [vmem:[%s4388_s1 + $0x344] ss:$8 sm:$0xf0] %vm3_vm0, %v931_v7  }
 0x157   :  { %1990 = vst.msk [vmem:[%s4388_s1 + $0x304] ss:$8 sm:$0xf] %vm3_vm0, %v922_v54  }
 0x158   :  { %1991 = vst.msk [vmem:[%s4388_s1 + $0x304] ss:$8 sm:$0xf0] %vm3_vm0, %v922_v54  }
 0x159   :  { %2023 = vst.msk [vmem:[%s4388_s1 + $0x5c4] ss:$8 sm:$0xf] %vm3_vm0, %v1021_v55  }
 0x15a   :  { %1333 = vrot.lane.b32.xlu1 %v2328_v9, %s2250_s18  ;;  %1324 = vrot.lane.b32.xlu0 %v2333_v10, %s2250_s18  ;;  %v3423_v9 = vld [vmem:[%s4387_s0 + $0x60] sm:$0xff]   ;;  %2024 = vst.msk [vmem:[%s4388_s1 + $0x5c4] ss:$8 sm:$0xf0] %vm3_vm0, %v1021_v55  }
 0x15b   :  { %1706 = vst.msk [vmem:[%s4388_s1 + $0x300] ss:$8 sm:$0xf] %vm3_vm0, %v3423_v9   ;;  %1342 = vrot.lane.b32.xlu2 %v3382_v6, %s2250_s18 }
 0x15c   :  { %v958_v10 = vpop.permute.xlu1 %957   ;;  %v949_v56 = vpop.permute.xlu0 %948   ;;  %1707 = vst.msk [vmem:[%s4388_s1 + $0x300] ss:$8 sm:$0xf0] %vm3_vm0, %v3423_v9  }
 0x15d   :  { %2002 = vst.msk [vmem:[%s4388_s1 + $0x404] ss:$8 sm:$0xf] %vm3_vm0, %v958_v10   ;;  %v1047_v57 = vpop.permute.xlu2 %1046  }
 0x15e   :  { %2003 = vst.msk [vmem:[%s4388_s1 + $0x404] ss:$8 sm:$0xf0] %vm3_vm0, %v958_v10  }
 0x15f   :  { %1999 = vst.msk [vmem:[%s4388_s1 + $0x3c4] ss:$8 sm:$0xf] %vm3_vm0, %v949_v56  }
 0x160   :  { %2000 = vst.msk [vmem:[%s4388_s1 + $0x3c4] ss:$8 sm:$0xf0] %vm3_vm0, %v949_v56  }
 0x161   :  { %2031 = vst.msk [vmem:[%s4388_s1 + $0x85] ss:$8 sm:$0xf] %vm3_vm0, %v1047_v57  }
 0x162   :  { %1360 = vrot.lane.b32.xlu1 %v3456_v58, %s2250_s18  ;;  %1351 = vrot.lane.b32.xlu0 %v3423_v9, %s2250_s18  ;;  %2032 = vst.msk [vmem:[%s4388_s1 + $0x85] ss:$8 sm:$0xf0] %vm3_vm0, %v1047_v57  }
 0x163   :  { %1369 = vrot.lane.b32.xlu2 %v3469_v59, %s2250_s18  ;;  %1727 = vst.msk [vmem:[%s4388_s1 + $0x4c0] ss:$8 sm:$0xf] %vm3_vm0, %v3567_v31  }
 0x164   :  { %v985_v61 = vpop.permute.xlu1 %984   ;;  %v976_v62 = vpop.permute.xlu0 %975   ;;  %1728 = vst.msk [vmem:[%s4388_s1 + $0x4c0] ss:$8 sm:$0xf0] %vm3_vm0, %v3567_v31  }
 0x165   :  { %2011 = vst.msk [vmem:[%s4388_s1 + $0x4c4] ss:$8 sm:$0xf] %vm3_vm0, %v985_v61   ;;  %v1074_v63 = vpop.permute.xlu2 %1073  }
 0x166   :  { %2012 = vst.msk [vmem:[%s4388_s1 + $0x4c4] ss:$8 sm:$0xf0] %vm3_vm0, %v985_v61  }
 0x167   :  { %2008 = vst.msk [vmem:[%s4388_s1 + $0x484] ss:$8 sm:$0xf] %vm3_vm0, %v976_v62  }
 0x168   :  { %2009 = vst.msk [vmem:[%s4388_s1 + $0x484] ss:$8 sm:$0xf0] %vm3_vm0, %v976_v62  }
 0x169   :  { %2040 = vst.msk [vmem:[%s4388_s1 + $0x145] ss:$8 sm:$0xf] %vm3_vm0, %v1074_v63  }
 0x16a   :  { %1387 = vrot.lane.b32.xlu1 %v3511_v24, %s2250_s18  ;;  %1378 = vrot.lane.b32.xlu0 %v3516_v25, %s2250_s18  ;;  %2041 = vst.msk [vmem:[%s4388_s1 + $0x145] ss:$8 sm:$0xf0] %vm3_vm0, %v1074_v63  }
 0x16b   :  { %1396 = vrot.lane.b32.xlu2 %v3529_v26, %s2250_s18  ;;  %1730 = vst.msk [vmem:[%s4388_s1 + $0x500] ss:$8 sm:$0xf] %vm3_vm0, %v3585_v33  }
 0x16c   :  { %v1012_v28 = vpop.permute.xlu1 %1011   ;;  %v1003_v29 = vpop.permute.xlu0 %1002   ;;  %1731 = vst.msk [vmem:[%s4388_s1 + $0x500] ss:$8 sm:$0xf0] %vm3_vm0, %v3585_v33  }
 0x16d   :  { %2020 = vst.msk [vmem:[%s4388_s1 + $0x584] ss:$8 sm:$0xf] %vm3_vm0, %v1012_v28   ;;  %v1101_v30 = vpop.permute.xlu2 %1100  }
 0x16e   :  { %2021 = vst.msk [vmem:[%s4388_s1 + $0x584] ss:$8 sm:$0xf0] %vm3_vm0, %v1012_v28  }
 0x16f   :  { %2017 = vst.msk [vmem:[%s4388_s1 + $0x544] ss:$8 sm:$0xf] %vm3_vm0, %v1003_v29  }
 0x170   :  { %2018 = vst.msk [vmem:[%s4388_s1 + $0x544] ss:$8 sm:$0xf0] %vm3_vm0, %v1003_v29  }
 0x171   :  { %2049 = vst.msk [vmem:[%s4388_s1 + $0x205] ss:$8 sm:$0xf] %vm3_vm0, %v1101_v30  }
 0x172   :  { %1414 = vrot.lane.b32.xlu1 %v3567_v31, %s2250_s18  ;;  %1405 = vrot.lane.b32.xlu0 %v3572_v32, %s2250_s18  ;;  %2050 = vst.msk [vmem:[%s4388_s1 + $0x205] ss:$8 sm:$0xf0] %vm3_vm0, %v1101_v30  }
 0x173   :  { %1423 = vrot.lane.b32.xlu2 %v3585_v33, %s2250_s18  ;;  %1733 = vst.msk [vmem:[%s4388_s1 + $0x540] ss:$8 sm:$0xf] %vm3_vm0, %v3628_v39  }
 0x174   :  { %v1038_v35 = vpop.permute.xlu1 %1037   ;;  %v1029_v36 = vpop.permute.xlu0 %1028   ;;  %1734 = vst.msk [vmem:[%s4388_s1 + $0x540] ss:$8 sm:$0xf0] %vm3_vm0, %v3628_v39  }
 0x175   :  { %2028 = vst.msk [vmem:[%s4388_s1 + $0x45] ss:$8 sm:$0xf] %vm3_vm0, %v1038_v35   ;;  %v1128_v37 = vpop.permute.xlu2 %1127  }
 0x176   :  { %2029 = vst.msk [vmem:[%s4388_s1 + $0x45] ss:$8 sm:$0xf0] %vm3_vm0, %v1038_v35  }
 0x177   :  { %2025 = vst.msk [vmem:[%s4388_s1 + $0x5] ss:$8 sm:$0xf] %vm3_vm0, %v1029_v36  }
 0x178   :  { %2026 = vst.msk [vmem:[%s4388_s1 + $0x5] ss:$8 sm:$0xf0] %vm3_vm0, %v1029_v36  }
 0x179   :  { %2058 = vst.msk [vmem:[%s4388_s1 + $0x2c5] ss:$8 sm:$0xf] %vm3_vm0, %v1128_v37  }
 0x17a   :  { %1441 = vrot.lane.b32.xlu1 %v3623_v38, %s2250_s18  ;;  %1432 = vrot.lane.b32.xlu0 %v3628_v39, %s2250_s18  ;;  %2059 = vst.msk [vmem:[%s4388_s1 + $0x2c5] ss:$8 sm:$0xf0] %vm3_vm0, %v1128_v37  }
 0x17b   :  { %1450 = vrot.lane.b32.xlu2 %v3641_v40, %s2250_s18  ;;  %1736 = vst.msk [vmem:[%s4388_s1 + $0x580] ss:$8 sm:$0xf] %vm3_vm0, %v3623_v38  }
 0x17c   :  { %v1065_v42 = vpop.permute.xlu1 %1064   ;;  %v1056_v0 = vpop.permute.xlu0 %1055   ;;  %1737 = vst.msk [vmem:[%s4388_s1 + $0x580] ss:$8 sm:$0xf0] %vm3_vm0, %v3623_v38  }
 0x17d   :  { %2037 = vst.msk [vmem:[%s4388_s1 + $0x105] ss:$8 sm:$0xf] %vm3_vm0, %v1065_v42   ;;  %v1155_v43 = vpop.permute.xlu2 %1154  }
 0x17e   :  { %2038 = vst.msk [vmem:[%s4388_s1 + $0x105] ss:$8 sm:$0xf0] %vm3_vm0, %v1065_v42  }
 0x17f   :  { %2034 = vst.msk [vmem:[%s4388_s1 + $0xc5] ss:$8 sm:$0xf] %vm3_vm0, %v1056_v0  }
 0x180   :  { %2035 = vst.msk [vmem:[%s4388_s1 + $0xc5] ss:$8 sm:$0xf0] %vm3_vm0, %v1056_v0  }
 0x181   :  { %2067 = vst.msk [vmem:[%s4388_s1 + $0x385] ss:$8 sm:$0xf] %vm3_vm0, %v1155_v43  }
 0x182   :  { %1467 = vrot.lane.b32.xlu1 %v2169_v27, %s2251_s14  ;;  %1458 = vrot.lane.b32.xlu0 %v3482_v60, %s2251_s14  ;;  %2068 = vst.msk [vmem:[%s4388_s1 + $0x385] ss:$8 sm:$0xf0] %vm3_vm0, %v1155_v43  }
 0x183   :  { %1476 = vrot.lane.b32.xlu2 %v3247_v21, %s2251_s14  ;;  %1739 = vst.msk [vmem:[%s4388_s1 + $0x5c0] ss:$8 sm:$0xf] %vm3_vm0, %v3641_v40  }
 0x184   :  { %v1092_v5 = vpop.permute.xlu1 %1091   ;;  %v1083_v45 = vpop.permute.xlu0 %1082   ;;  %1740 = vst.msk [vmem:[%s4388_s1 + $0x5c0] ss:$8 sm:$0xf0] %vm3_vm0, %v3641_v40  }
 0x185   :  { %2046 = vst.msk [vmem:[%s4388_s1 + $0x1c5] ss:$8 sm:$0xf] %vm3_vm0, %v1092_v5   ;;  %v1182_v46 = vpop.permute.xlu2 %1181  }
 0x186   :  { %2047 = vst.msk [vmem:[%s4388_s1 + $0x1c5] ss:$8 sm:$0xf0] %vm3_vm0, %v1092_v5  }
 0x187   :  { %2043 = vst.msk [vmem:[%s4388_s1 + $0x185] ss:$8 sm:$0xf] %vm3_vm0, %v1083_v45  }
 0x188   :  { %2044 = vst.msk [vmem:[%s4388_s1 + $0x185] ss:$8 sm:$0xf0] %vm3_vm0, %v1083_v45  }
 0x189   :  { %2076 = vst.msk [vmem:[%s4388_s1 + $0x445] ss:$8 sm:$0xf] %vm3_vm0, %v1182_v46  }
 0x18a   :  { %1494 = vrot.lane.b32.xlu1 %v2178_v41, %s2251_s14  ;;  %1485 = vrot.lane.b32.xlu0 %v2175_v34, %s2251_s14  ;;  %2077 = vst.msk [vmem:[%s4388_s1 + $0x445] ss:$8 sm:$0xf0] %vm3_vm0, %v1182_v46  }
 0x18b   :  { %1503 = vrot.lane.b32.xlu2 %v3292_v1, %s2251_s14 }
 0x18c   :  { %v1119_v47 = vpop.permute.xlu1 %1118   ;;  %v1110_v48 = vpop.permute.xlu0 %1109  }
 0x18d   :  { %2055 = vst.msk [vmem:[%s4388_s1 + $0x285] ss:$8 sm:$0xf] %vm3_vm0, %v1119_v47   ;;  %v1209_v11 = vpop.permute.xlu2 %1208  }
 0x18e   :  { %2056 = vst.msk [vmem:[%s4388_s1 + $0x285] ss:$8 sm:$0xf0] %vm3_vm0, %v1119_v47  }
 0x18f   :  { %2052 = vst.msk [vmem:[%s4388_s1 + $0x245] ss:$8 sm:$0xf] %vm3_vm0, %v1110_v48  }
 0x190   :  { %2053 = vst.msk [vmem:[%s4388_s1 + $0x245] ss:$8 sm:$0xf0] %vm3_vm0, %v1110_v48  }
 0x191   :  { %2085 = vst.msk [vmem:[%s4388_s1 + $0x505] ss:$8 sm:$0xf] %vm3_vm0, %v1209_v11  }
 0x192   :  { %1521 = vrot.lane.b32.xlu1 %v2187_v8, %s2251_s14  ;;  %1512 = vrot.lane.b32.xlu0 %v2184_v44, %s2251_s14  ;;  %2086 = vst.msk [vmem:[%s4388_s1 + $0x505] ss:$8 sm:$0xf0] %vm3_vm0, %v1209_v11  }
 0x193   :  { %1530 = vrot.lane.b32.xlu2 %v3337_v2, %s2251_s14 }
 0x194   :  { %v1146_v13 = vpop.permute.xlu1 %1145   ;;  %v1137_v14 = vpop.permute.xlu0 %1136  }
 0x195   :  { %2064 = vst.msk [vmem:[%s4388_s1 + $0x345] ss:$8 sm:$0xf] %vm3_vm0, %v1146_v13   ;;  %v1236_v15 = vpop.permute.xlu2 %1235  }
 0x196   :  { %2065 = vst.msk [vmem:[%s4388_s1 + $0x345] ss:$8 sm:$0xf0] %vm3_vm0, %v1146_v13  }
 0x197   :  { %2061 = vst.msk [vmem:[%s4388_s1 + $0x305] ss:$8 sm:$0xf] %vm3_vm0, %v1137_v14  }
 0x198   :  { %2062 = vst.msk [vmem:[%s4388_s1 + $0x305] ss:$8 sm:$0xf0] %vm3_vm0, %v1137_v14  }
 0x199   :  { %2094 = vst.msk [vmem:[%s4388_s1 + $0x5c5] ss:$8 sm:$0xf] %vm3_vm0, %v1236_v15  }
 0x19a   :  { %1548 = vrot.lane.b32.xlu1 %v2196_v16, %s2251_s14  ;;  %1539 = vrot.lane.b32.xlu0 %v2193_v12, %s2251_s14  ;;  %2095 = vst.msk [vmem:[%s4388_s1 + $0x5c5] ss:$8 sm:$0xf0] %vm3_vm0, %v1236_v15  }
 0x19b   :  { %1557 = vrot.lane.b32.xlu2 %v3382_v6, %s2251_s14 }
 0x19c   :  { %v1173_v17 = vpop.permute.xlu1 %1172   ;;  %v1164_v18 = vpop.permute.xlu0 %1163  }
 0x19d   :  { %2073 = vst.msk [vmem:[%s4388_s1 + $0x405] ss:$8 sm:$0xf] %vm3_vm0, %v1173_v17   ;;  %v1262_v19 = vpop.permute.xlu2 %1261  }
 0x19e   :  { %2074 = vst.msk [vmem:[%s4388_s1 + $0x405] ss:$8 sm:$0xf0] %vm3_vm0, %v1173_v17  }
 0x19f   :  { %2070 = vst.msk [vmem:[%s4388_s1 + $0x3c5] ss:$8 sm:$0xf] %vm3_vm0, %v1164_v18  }
 0x1a0   :  { %2071 = vst.msk [vmem:[%s4388_s1 + $0x3c5] ss:$8 sm:$0xf0] %vm3_vm0, %v1164_v18  }
 0x1a1   :  { %2102 = vst.msk [vmem:[%s4388_s1 + $0x86] ss:$8 sm:$0xf] %vm3_vm0, %v1262_v19  }
 0x1a2   :  { %1575 = vrot.lane.b32.xlu1 %v3456_v58, %s2251_s14  ;;  %1566 = vrot.lane.b32.xlu0 %v3423_v9, %s2251_s14  ;;  %2103 = vst.msk [vmem:[%s4388_s1 + $0x86] ss:$8 sm:$0xf0] %vm3_vm0, %v1262_v19  }
 0x1a3   :  { %1584 = vrot.lane.b32.xlu2 %v3469_v59, %s2251_s14 }
 0x1a4   :  { %v1200_v20 = vpop.permute.xlu1 %1199   ;;  %v1191_v21 = vpop.permute.xlu0 %1190  }
 0x1a5   :  { %2082 = vst.msk [vmem:[%s4388_s1 + $0x4c5] ss:$8 sm:$0xf] %vm3_vm0, %v1200_v20   ;;  %v1289_v22 = vpop.permute.xlu2 %1288  }
 0x1a6   :  { %2083 = vst.msk [vmem:[%s4388_s1 + $0x4c5] ss:$8 sm:$0xf0] %vm3_vm0, %v1200_v20  }
 0x1a7   :  { %2079 = vst.msk [vmem:[%s4388_s1 + $0x485] ss:$8 sm:$0xf] %vm3_vm0, %v1191_v21  }
 0x1a8   :  { %2080 = vst.msk [vmem:[%s4388_s1 + $0x485] ss:$8 sm:$0xf0] %vm3_vm0, %v1191_v21  }
 0x1a9   :  { %2111 = vst.msk [vmem:[%s4388_s1 + $0x146] ss:$8 sm:$0xf] %vm3_vm0, %v1289_v22  }
 0x1aa   :  { %1602 = vrot.lane.b32.xlu1 %v3511_v24, %s2251_s14  ;;  %1593 = vrot.lane.b32.xlu0 %v3516_v25, %s2251_s14  ;;  %2112 = vst.msk [vmem:[%s4388_s1 + $0x146] ss:$8 sm:$0xf0] %vm3_vm0, %v1289_v22  }
 0x1ab   :  { %1611 = vrot.lane.b32.xlu2 %v3529_v26, %s2251_s14 }
 0x1ac   :  { %v1227_v49 = vpop.permute.xlu1 %1226   ;;  %v1218_v23 = vpop.permute.xlu0 %1217  }
 0x1ad   :  { %2091 = vst.msk [vmem:[%s4388_s1 + $0x585] ss:$8 sm:$0xf] %vm3_vm0, %v1227_v49   ;;  %v1316_v1 = vpop.permute.xlu2 %1315  }
 0x1ae   :  { %2092 = vst.msk [vmem:[%s4388_s1 + $0x585] ss:$8 sm:$0xf0] %vm3_vm0, %v1227_v49  }
 0x1af   :  { %2088 = vst.msk [vmem:[%s4388_s1 + $0x545] ss:$8 sm:$0xf] %vm3_vm0, %v1218_v23  }
 0x1b0   :  { %2089 = vst.msk [vmem:[%s4388_s1 + $0x545] ss:$8 sm:$0xf0] %vm3_vm0, %v1218_v23  }
 0x1b1   :  { %2120 = vst.msk [vmem:[%s4388_s1 + $0x206] ss:$8 sm:$0xf] %vm3_vm0, %v1316_v1  }
 0x1b2   :  { %1629 = vrot.lane.b32.xlu1 %v3567_v31, %s2251_s14  ;;  %1620 = vrot.lane.b32.xlu0 %v3572_v32, %s2251_s14  ;;  %2121 = vst.msk [vmem:[%s4388_s1 + $0x206] ss:$8 sm:$0xf0] %vm3_vm0, %v1316_v1  }
 0x1b3   :  { %1638 = vrot.lane.b32.xlu2 %v3585_v33, %s2251_s14 }
 0x1b4   :  { %v1253_v4 = vpop.permute.xlu1 %1252   ;;  %v1244_v50 = vpop.permute.xlu0 %1243  }
 0x1b5   :  { %2099 = vst.msk [vmem:[%s4388_s1 + $0x46] ss:$8 sm:$0xf] %vm3_vm0, %v1253_v4   ;;  %v1343_v51 = vpop.permute.xlu2 %1342  }
 0x1b6   :  { %2100 = vst.msk [vmem:[%s4388_s1 + $0x46] ss:$8 sm:$0xf0] %vm3_vm0, %v1253_v4  }
 0x1b7   :  { %2096 = vst.msk [vmem:[%s4388_s1 + $0x6] ss:$8 sm:$0xf] %vm3_vm0, %v1244_v50  }
 0x1b8   :  { %2097 = vst.msk [vmem:[%s4388_s1 + $0x6] ss:$8 sm:$0xf0] %vm3_vm0, %v1244_v50  }
 0x1b9   :  { %2129 = vst.msk [vmem:[%s4388_s1 + $0x2c6] ss:$8 sm:$0xf] %vm3_vm0, %v1343_v51  }
 0x1ba   :  { %1656 = vrot.lane.b32.xlu1 %v3623_v38, %s2251_s14  ;;  %1647 = vrot.lane.b32.xlu0 %v3628_v39, %s2251_s14  ;;  %2130 = vst.msk [vmem:[%s4388_s1 + $0x2c6] ss:$8 sm:$0xf0] %vm3_vm0, %v1343_v51  }
 0x1bb   :  { %1665 = vrot.lane.b32.xlu2 %v3641_v40, %s2251_s14 }
 0x1bc   :  { %v1280_v2 = vpop.permute.xlu1 %1279   ;;  %v1271_v3 = vpop.permute.xlu0 %1270  }
 0x1bd   :  { %2108 = vst.msk [vmem:[%s4388_s1 + $0x106] ss:$8 sm:$0xf] %vm3_vm0, %v1280_v2   ;;  %v1370_v52 = vpop.permute.xlu2 %1369  }
 0x1be   :  { %2109 = vst.msk [vmem:[%s4388_s1 + $0x106] ss:$8 sm:$0xf0] %vm3_vm0, %v1280_v2  }
 0x1bf   :  { %2105 = vst.msk [vmem:[%s4388_s1 + $0xc6] ss:$8 sm:$0xf] %vm3_vm0, %v1271_v3  }
 0x1c0   :  { %2106 = vst.msk [vmem:[%s4388_s1 + $0xc6] ss:$8 sm:$0xf0] %vm3_vm0, %v1271_v3  }
 0x1c1   :  { %2138 = vst.msk [vmem:[%s4388_s1 + $0x386] ss:$8 sm:$0xf] %vm3_vm0, %v1370_v52  }
 0x1c2   :  { %2139 = vst.msk [vmem:[%s4388_s1 + $0x386] ss:$8 sm:$0xf0] %vm3_vm0, %v1370_v52  }
 0x1c4   :  { %v1307_v53 = vpop.permute.xlu1 %1306   ;;  %v1298_v6 = vpop.permute.xlu0 %1297  }
 0x1c5   :  { %2117 = vst.msk [vmem:[%s4388_s1 + $0x1c6] ss:$8 sm:$0xf] %vm3_vm0, %v1307_v53   ;;  %v1397_v7 = vpop.permute.xlu2 %1396  }
 0x1c6   :  { %2118 = vst.msk [vmem:[%s4388_s1 + $0x1c6] ss:$8 sm:$0xf0] %vm3_vm0, %v1307_v53  }
 0x1c7   :  { %2114 = vst.msk [vmem:[%s4388_s1 + $0x186] ss:$8 sm:$0xf] %vm3_vm0, %v1298_v6  }
 0x1c8   :  { %2115 = vst.msk [vmem:[%s4388_s1 + $0x186] ss:$8 sm:$0xf0] %vm3_vm0, %v1298_v6  }
 0x1c9   :  { %2147 = vst.msk [vmem:[%s4388_s1 + $0x446] ss:$8 sm:$0xf] %vm3_vm0, %v1397_v7  }
 0x1ca   :  { %2148 = vst.msk [vmem:[%s4388_s1 + $0x446] ss:$8 sm:$0xf0] %vm3_vm0, %v1397_v7  }
 0x1cc   :  { %v1334_v54 = vpop.permute.xlu1 %1333   ;;  %v1325_v55 = vpop.permute.xlu0 %1324  }
 0x1cd   :  { %2126 = vst.msk [vmem:[%s4388_s1 + $0x286] ss:$8 sm:$0xf] %vm3_vm0, %v1334_v54   ;;  %v1424_v9 = vpop.permute.xlu2 %1423  }
 0x1ce   :  { %2127 = vst.msk [vmem:[%s4388_s1 + $0x286] ss:$8 sm:$0xf0] %vm3_vm0, %v1334_v54  }
 0x1cf   :  { %2123 = vst.msk [vmem:[%s4388_s1 + $0x246] ss:$8 sm:$0xf] %vm3_vm0, %v1325_v55  }
 0x1d0   :  { %2124 = vst.msk [vmem:[%s4388_s1 + $0x246] ss:$8 sm:$0xf0] %vm3_vm0, %v1325_v55  }
 0x1d1   :  { %2156 = vst.msk [vmem:[%s4388_s1 + $0x506] ss:$8 sm:$0xf] %vm3_vm0, %v1424_v9  }
 0x1d2   :  { %2157 = vst.msk [vmem:[%s4388_s1 + $0x506] ss:$8 sm:$0xf0] %vm3_vm0, %v1424_v9  }
 0x1d4   :  { %v1361_v10 = vpop.permute.xlu1 %1360   ;;  %v1352_v56 = vpop.permute.xlu0 %1351  }
 0x1d5   :  { %2135 = vst.msk [vmem:[%s4388_s1 + $0x346] ss:$8 sm:$0xf] %vm3_vm0, %v1361_v10   ;;  %v1451_v57 = vpop.permute.xlu2 %1450  }
 0x1d6   :  { %2136 = vst.msk [vmem:[%s4388_s1 + $0x346] ss:$8 sm:$0xf0] %vm3_vm0, %v1361_v10  }
 0x1d7   :  { %2132 = vst.msk [vmem:[%s4388_s1 + $0x306] ss:$8 sm:$0xf] %vm3_vm0, %v1352_v56  }
 0x1d8   :  { %2133 = vst.msk [vmem:[%s4388_s1 + $0x306] ss:$8 sm:$0xf0] %vm3_vm0, %v1352_v56  }
 0x1d9   :  { %2165 = vst.msk [vmem:[%s4388_s1 + $0x5c6] ss:$8 sm:$0xf] %vm3_vm0, %v1451_v57  }
 0x1da   :  { %2166 = vst.msk [vmem:[%s4388_s1 + $0x5c6] ss:$8 sm:$0xf0] %vm3_vm0, %v1451_v57  }
 0x1dc   :  { %v1388_v58 = vpop.permute.xlu1 %1387   ;;  %v1379_v59 = vpop.permute.xlu0 %1378  }
 0x1dd   :  { %2144 = vst.msk [vmem:[%s4388_s1 + $0x406] ss:$8 sm:$0xf] %vm3_vm0, %v1388_v58   ;;  %v1477_v60 = vpop.permute.xlu2 %1476  }
 0x1de   :  { %2145 = vst.msk [vmem:[%s4388_s1 + $0x406] ss:$8 sm:$0xf0] %vm3_vm0, %v1388_v58  }
 0x1df   :  { %2141 = vst.msk [vmem:[%s4388_s1 + $0x3c6] ss:$8 sm:$0xf] %vm3_vm0, %v1379_v59  }
 0x1e0   :  { %2142 = vst.msk [vmem:[%s4388_s1 + $0x3c6] ss:$8 sm:$0xf0] %vm3_vm0, %v1379_v59  }
 0x1e1   :  { %2173 = vst.msk [vmem:[%s4388_s1 + $0x87] ss:$8 sm:$0xf] %vm3_vm0, %v1477_v60  }
 0x1e2   :  { %2174 = vst.msk [vmem:[%s4388_s1 + $0x87] ss:$8 sm:$0xf0] %vm3_vm0, %v1477_v60  }
 0x1e4   :  { %v1415_v61 = vpop.permute.xlu1 %1414   ;;  %v1406_v62 = vpop.permute.xlu0 %1405  }
 0x1e5   :  { %2153 = vst.msk [vmem:[%s4388_s1 + $0x4c6] ss:$8 sm:$0xf] %vm3_vm0, %v1415_v61   ;;  %v1504_v63 = vpop.permute.xlu2 %1503  }
 0x1e6   :  { %2154 = vst.msk [vmem:[%s4388_s1 + $0x4c6] ss:$8 sm:$0xf0] %vm3_vm0, %v1415_v61  }
 0x1e7   :  { %2150 = vst.msk [vmem:[%s4388_s1 + $0x486] ss:$8 sm:$0xf] %vm3_vm0, %v1406_v62  }
 0x1e8   :  { %2151 = vst.msk [vmem:[%s4388_s1 + $0x486] ss:$8 sm:$0xf0] %vm3_vm0, %v1406_v62  }
 0x1e9   :  { %2182 = vst.msk [vmem:[%s4388_s1 + $0x147] ss:$8 sm:$0xf] %vm3_vm0, %v1504_v63  }
 0x1ea   :  { %2183 = vst.msk [vmem:[%s4388_s1 + $0x147] ss:$8 sm:$0xf0] %vm3_vm0, %v1504_v63  }
 0x1ec   :  { %v1442_v24 = vpop.permute.xlu1 %1441   ;;  %v1433_v25 = vpop.permute.xlu0 %1432  }
 0x1ed   :  { %2162 = vst.msk [vmem:[%s4388_s1 + $0x586] ss:$8 sm:$0xf] %vm3_vm0, %v1442_v24   ;;  %v1531_v26 = vpop.permute.xlu2 %1530  }
 0x1ee   :  { %2163 = vst.msk [vmem:[%s4388_s1 + $0x586] ss:$8 sm:$0xf0] %vm3_vm0, %v1442_v24  }
 0x1ef   :  { %2159 = vst.msk [vmem:[%s4388_s1 + $0x546] ss:$8 sm:$0xf] %vm3_vm0, %v1433_v25  }
 0x1f0   :  { %2160 = vst.msk [vmem:[%s4388_s1 + $0x546] ss:$8 sm:$0xf0] %vm3_vm0, %v1433_v25  }
 0x1f1   :  { %2191 = vst.msk [vmem:[%s4388_s1 + $0x207] ss:$8 sm:$0xf] %vm3_vm0, %v1531_v26  }
 0x1f2   :  { %2192 = vst.msk [vmem:[%s4388_s1 + $0x207] ss:$8 sm:$0xf0] %vm3_vm0, %v1531_v26  }
 0x1f4   :  { %v1468_v27 = vpop.permute.xlu1 %1467   ;;  %v1459_v28 = vpop.permute.xlu0 %1458  }
 0x1f5   :  { %2170 = vst.msk [vmem:[%s4388_s1 + $0x47] ss:$8 sm:$0xf] %vm3_vm0, %v1468_v27   ;;  %v1558_v29 = vpop.permute.xlu2 %1557  }
 0x1f6   :  { %2171 = vst.msk [vmem:[%s4388_s1 + $0x47] ss:$8 sm:$0xf0] %vm3_vm0, %v1468_v27  }
 0x1f7   :  { %2167 = vst.msk [vmem:[%s4388_s1 + $0x7] ss:$8 sm:$0xf] %vm3_vm0, %v1459_v28  }
 0x1f8   :  { %2168 = vst.msk [vmem:[%s4388_s1 + $0x7] ss:$8 sm:$0xf0] %vm3_vm0, %v1459_v28  }
 0x1f9   :  { %2200 = vst.msk [vmem:[%s4388_s1 + $0x2c7] ss:$8 sm:$0xf] %vm3_vm0, %v1558_v29  }
 0x1fa   :  { %2201 = vst.msk [vmem:[%s4388_s1 + $0x2c7] ss:$8 sm:$0xf0] %vm3_vm0, %v1558_v29  }
 0x1fc   :  { %v1495_v30 = vpop.permute.xlu1 %1494   ;;  %v1486_v31 = vpop.permute.xlu0 %1485  }
 0x1fd   :  { %2179 = vst.msk [vmem:[%s4388_s1 + $0x107] ss:$8 sm:$0xf] %vm3_vm0, %v1495_v30   ;;  %v1585_v32 = vpop.permute.xlu2 %1584  }
 0x1fe   :  { %2180 = vst.msk [vmem:[%s4388_s1 + $0x107] ss:$8 sm:$0xf0] %vm3_vm0, %v1495_v30  }
 0x1ff   :  { %2176 = vst.msk [vmem:[%s4388_s1 + $0xc7] ss:$8 sm:$0xf] %vm3_vm0, %v1486_v31  }
 0x200   :  { %2177 = vst.msk [vmem:[%s4388_s1 + $0xc7] ss:$8 sm:$0xf0] %vm3_vm0, %v1486_v31  }
 0x201   :  { %2209 = vst.msk [vmem:[%s4388_s1 + $0x387] ss:$8 sm:$0xf] %vm3_vm0, %v1585_v32  }
 0x202   :  { %2210 = vst.msk [vmem:[%s4388_s1 + $0x387] ss:$8 sm:$0xf0] %vm3_vm0, %v1585_v32  }
 0x204   :  { %v1522_v33 = vpop.permute.xlu1 %1521   ;;  %v1513_v34 = vpop.permute.xlu0 %1512  }
 0x205   :  { %2188 = vst.msk [vmem:[%s4388_s1 + $0x1c7] ss:$8 sm:$0xf] %vm3_vm0, %v1522_v33   ;;  %v1612_v35 = vpop.permute.xlu2 %1611  }
 0x206   :  { %2189 = vst.msk [vmem:[%s4388_s1 + $0x1c7] ss:$8 sm:$0xf0] %vm3_vm0, %v1522_v33  }
 0x207   :  { %2185 = vst.msk [vmem:[%s4388_s1 + $0x187] ss:$8 sm:$0xf] %vm3_vm0, %v1513_v34  }
 0x208   :  { %2186 = vst.msk [vmem:[%s4388_s1 + $0x187] ss:$8 sm:$0xf0] %vm3_vm0, %v1513_v34  }
 0x209   :  { %2218 = vst.msk [vmem:[%s4388_s1 + $0x447] ss:$8 sm:$0xf] %vm3_vm0, %v1612_v35  }
 0x20a   :  { %2219 = vst.msk [vmem:[%s4388_s1 + $0x447] ss:$8 sm:$0xf0] %vm3_vm0, %v1612_v35  }
 0x20c   :  { %v1549_v36 = vpop.permute.xlu1 %1548   ;;  %v1540_v37 = vpop.permute.xlu0 %1539  }
 0x20d   :  { %2197 = vst.msk [vmem:[%s4388_s1 + $0x287] ss:$8 sm:$0xf] %vm3_vm0, %v1549_v36   ;;  %v1639_v38 = vpop.permute.xlu2 %1638  }
 0x20e   :  { %2198 = vst.msk [vmem:[%s4388_s1 + $0x287] ss:$8 sm:$0xf0] %vm3_vm0, %v1549_v36  }
 0x20f   :  { %2194 = vst.msk [vmem:[%s4388_s1 + $0x247] ss:$8 sm:$0xf] %vm3_vm0, %v1540_v37  }
 0x210   :  { %2195 = vst.msk [vmem:[%s4388_s1 + $0x247] ss:$8 sm:$0xf0] %vm3_vm0, %v1540_v37  }
 0x211   :  { %2227 = vst.msk [vmem:[%s4388_s1 + $0x507] ss:$8 sm:$0xf] %vm3_vm0, %v1639_v38  }
 0x212   :  { %2228 = vst.msk [vmem:[%s4388_s1 + $0x507] ss:$8 sm:$0xf0] %vm3_vm0, %v1639_v38  }
 0x214   :  { %v1576_v39 = vpop.permute.xlu1 %1575   ;;  %v1567_v40 = vpop.permute.xlu0 %1566  }
 0x215   :  { %2206 = vst.msk [vmem:[%s4388_s1 + $0x347] ss:$8 sm:$0xf] %vm3_vm0, %v1576_v39   ;;  %v1666_v41 = vpop.permute.xlu2 %1665  }
 0x216   :  { %2207 = vst.msk [vmem:[%s4388_s1 + $0x347] ss:$8 sm:$0xf0] %vm3_vm0, %v1576_v39  }
 0x217   :  { %2203 = vst.msk [vmem:[%s4388_s1 + $0x307] ss:$8 sm:$0xf] %vm3_vm0, %v1567_v40  }
 0x218   :  { %2204 = vst.msk [vmem:[%s4388_s1 + $0x307] ss:$8 sm:$0xf0] %vm3_vm0, %v1567_v40  }
 0x219   :  { %2236 = vst.msk [vmem:[%s4388_s1 + $0x5c7] ss:$8 sm:$0xf] %vm3_vm0, %v1666_v41  }
 0x21a   :  { %2237 = vst.msk [vmem:[%s4388_s1 + $0x5c7] ss:$8 sm:$0xf0] %vm3_vm0, %v1666_v41  }
 0x21c   :  { %v1603_v42 = vpop.permute.xlu1 %1602   ;;  %v1594_v0 = vpop.permute.xlu0 %1593  }
 0x21d   :  { %2215 = vst.msk [vmem:[%s4388_s1 + $0x407] ss:$8 sm:$0xf] %vm3_vm0, %v1603_v42  }
 0x21e   :  { %2216 = vst.msk [vmem:[%s4388_s1 + $0x407] ss:$8 sm:$0xf0] %vm3_vm0, %v1603_v42  }
 0x21f   :  { %2212 = vst.msk [vmem:[%s4388_s1 + $0x3c7] ss:$8 sm:$0xf] %vm3_vm0, %v1594_v0  }
 0x220   :  { %2213 = vst.msk [vmem:[%s4388_s1 + $0x3c7] ss:$8 sm:$0xf0] %vm3_vm0, %v1594_v0  }
 0x224   :  { %v1630_v43 = vpop.permute.xlu1 %1629   ;;  %v1621_v44 = vpop.permute.xlu0 %1620  }
 0x225   :  { %2224 = vst.msk [vmem:[%s4388_s1 + $0x4c7] ss:$8 sm:$0xf] %vm3_vm0, %v1630_v43  }
 0x226   :  { %2225 = vst.msk [vmem:[%s4388_s1 + $0x4c7] ss:$8 sm:$0xf0] %vm3_vm0, %v1630_v43  }
 0x227   :  { %2221 = vst.msk [vmem:[%s4388_s1 + $0x487] ss:$8 sm:$0xf] %vm3_vm0, %v1621_v44  }
 0x228   :  { %2222 = vst.msk [vmem:[%s4388_s1 + $0x487] ss:$8 sm:$0xf0] %vm3_vm0, %v1621_v44  }
 0x22c   :  { %v1657_v5 = vpop.permute.xlu1 %1656   ;;  %v1648_v45 = vpop.permute.xlu0 %1647  }
 0x22d   :  { %2233 = vst.msk [vmem:[%s4388_s1 + $0x587] ss:$8 sm:$0xf] %vm3_vm0, %v1657_v5  }
 0x22e   :  { %2234 = vst.msk [vmem:[%s4388_s1 + $0x587] ss:$8 sm:$0xf0] %vm3_vm0, %v1657_v5  }
 0x22f   :  { %2230 = vst.msk [vmem:[%s4388_s1 + $0x547] ss:$8 sm:$0xf] %vm3_vm0, %v1648_v45  }
 0x230   :  { %2231 = vst.msk [vmem:[%s4388_s1 + $0x547] ss:$8 sm:$0xf0] %vm3_vm0, %v1648_v45  }

// kernel: squeeze.12
= control target key start
LH: loop header
LB: loop body
LE: loop exit
PB: predicated region body
PF: predicated region fallthrough
CT: control target
= control target key end

     0   :  { %s2250_s12 = smov 112   ;;  %vm3_vm0 = vcmask 130048   ;;  %s2252_s27 = smov 80   ;;  %s3382_s0 = inlined_call_operand.vmem [shape: f32[1,3,64,64], index: 0, kind: input, shape index: {}]   ;;  %s3383_s1 = inlined_call_operand.vmem [shape: f32[3,4,16,4,16], index: 1, kind: output, shape index: {}]  }
   0x1   :  { %v2266_v0 = vld [vmem:[%s3382_s0 + $0x20] sm:$0xff]   ;;  %v2271_v1 = vld [vmem:[%s3382_s0 + $0x10] sm:$0xff]   ;;  %v2287_v3 = vld [vmem:[%s3382_s0 + $0x28] sm:$0xff]  }
   0x2   :  { %v2276_v2 = vld [vmem:[%s3382_s0] sm:$0xff]   ;;  %204 = vrot.lane.b32.xlu2 %v2266_v0, %s2250_s12  ;;  %186 = vrot.lane.b32.xlu1 %v2271_v1, %s2250_s12  ;;  %v2292_v4 = vld [vmem:[%s3382_s0 + $0x18] sm:$0xff]   ;;  %38 = vst.msk [vmem:[#allocation0 + $0x140] ss:$8 sm:$0xf] %vm3_vm0, %v2287_v3  }
   0x3   :  { %168 = vrot.lane.b32.xlu0 %v2276_v2, %s2250_s12  ;;  %v2297_v5 = vld [vmem:[%s3382_s0 + $0x8] sm:$0xff]   ;;  %v2308_v6 = vld [vmem:[%s3382_s0 + $0x40] sm:$0xff]   ;;  %v2313_v7 = vld [vmem:[%s3382_s0 + $0x38] sm:$0xff]   ;;  %40 = vst.msk [vmem:[#allocation0 + $0x140] ss:$8 sm:$0xf0] %vm3_vm0, %v2287_v3  }
   0x4   :  { %v2318_v8 = vld [vmem:[%s3382_s0 + $0x30] sm:$0xff]   ;;  %v2329_v9 = vld [vmem:[%s3382_s0 + $0x58] sm:$0xff]   ;;  %v2339_v11 = vld [vmem:[%s3382_s0 + $0x48] sm:$0xff]   ;;  %59 = vst.msk [vmem:[#allocation0 + $0x200] ss:$8 sm:$0xf] %vm3_vm0, %v2308_v6  }
   0x5   :  { %v2334_v10 = vld [vmem:[%s3382_s0 + $0x50] sm:$0xff]   ;;  %v2355_v13 = vld [vmem:[%s3382_s0 + $0x68] sm:$0xff]   ;;  %v2360_v14 = vld [vmem:[%s3382_s0 + $0x60] sm:$0xff]   ;;  %61 = vst.msk [vmem:[#allocation0 + $0x200] ss:$8 sm:$0xf0] %vm3_vm0, %v2308_v6  }
   0x6   :  { %v2350_v12 = vld [vmem:[%s3382_s0 + $0x70] sm:$0xff]   ;;  %v2371_v15 = vld [vmem:[%s3382_s0 + $0x88] sm:$0xff]   ;;  %v2376_v16 = vld [vmem:[%s3382_s0 + $0x80] sm:$0xff]   ;;  %45 = vst.msk [vmem:[#allocation0 + $0x180] ss:$8 sm:$0xf] %vm3_vm0, %v2318_v8  }
   0x7   :  { %v2381_v17 = vld [vmem:[%s3382_s0 + $0x78] sm:$0xff]   ;;  %v2392_v18 = vld [vmem:[%s3382_s0 + $0xa0] sm:$0xff]   ;;  %v2402_v20 = vld [vmem:[%s3382_s0 + $0x90] sm:$0xff]   ;;  %47 = vst.msk [vmem:[#allocation0 + $0x180] ss:$8 sm:$0xf0] %vm3_vm0, %v2318_v8  }
   0x8   :  { %v2397_v19 = vld [vmem:[%s3382_s0 + $0x98] sm:$0xff]   ;;  %v2418_v22 = vld [vmem:[%s3382_s0 + $0xb0] sm:$0xff]   ;;  %v2423_v23 = vld [vmem:[%s3382_s0 + $0xa8] sm:$0xff]   ;;  %17 = vst.msk [vmem:[#allocation0 + $0x80] ss:$8 sm:$0xf] %vm3_vm0, %v2271_v1  }
   0x9   :  { %v2413_v21 = vld [vmem:[%s3382_s0 + $0xb8] sm:$0xff]   ;;  %19 = vst.msk [vmem:[#allocation0 + $0x80] ss:$8 sm:$0xf0] %vm3_vm0, %v2271_v1  }
   0xa   :  { %213 = vrot.lane.b32.xlu2 %v2287_v3, %s2250_s12  ;;  %195 = vrot.lane.b32.xlu1 %v2292_v4, %s2250_s12  ;;  %80 = vst.msk [vmem:[#allocation0 + $0x2c0] ss:$8 sm:$0xf] %vm3_vm0, %v2329_v9  }
   0xb   :  { %177 = vrot.lane.b32.xlu0 %v2297_v5, %s2250_s12  ;;  %82 = vst.msk [vmem:[#allocation0 + $0x2c0] ss:$8 sm:$0xf0] %vm3_vm0, %v2329_v9  }
   0xc   :  { %10 = vst.msk [vmem:[#allocation0 + $0x40] ss:$8 sm:$0xf] %vm3_vm0, %v2297_v5  }
   0xd   :  { %12 = vst.msk [vmem:[#allocation0 + $0x40] ss:$8 sm:$0xf0] %vm3_vm0, %v2297_v5  }
   0xe   :  { %4 = vst.msk [vmem:[#allocation0] ss:$8 sm:$0xf] %vm3_vm0, %v2276_v2  }
   0xf   :  { %5 = vst.msk [vmem:[#allocation0] ss:$8 sm:$0xf0] %vm3_vm0, %v2276_v2  }
  0x10   :  { %101 = vst.msk [vmem:[#allocation0 + $0x380] ss:$8 sm:$0xf] %vm3_vm0, %v2350_v12  }
  0x11   :  { %103 = vst.msk [vmem:[#allocation0 + $0x380] ss:$8 sm:$0xf0] %vm3_vm0, %v2350_v12  }
  0x12   :  { %240 = vrot.lane.b32.xlu2 %v2308_v6, %s2250_s12  ;;  %231 = vrot.lane.b32.xlu1 %v2313_v7, %s2250_s12  ;;  %31 = vst.msk [vmem:[#allocation0 + $0x100] ss:$8 sm:$0xf] %vm3_vm0, %v2266_v0  }
  0x13   :  { %222 = vrot.lane.b32.xlu0 %v2318_v8, %s2250_s12  ;;  %33 = vst.msk [vmem:[#allocation0 + $0x100] ss:$8 sm:$0xf0] %vm3_vm0, %v2266_v0  }
  0x14   :  { %24 = vst.msk [vmem:[#allocation0 + $0xc0] ss:$8 sm:$0xf] %vm3_vm0, %v2292_v4  }
  0x15   :  { %26 = vst.msk [vmem:[#allocation0 + $0xc0] ss:$8 sm:$0xf0] %vm3_vm0, %v2292_v4  }
  0x16   :  { %122 = vst.msk [vmem:[#allocation0 + $0x440] ss:$8 sm:$0xf] %vm3_vm0, %v2371_v15  }
  0x17   :  { %124 = vst.msk [vmem:[#allocation0 + $0x440] ss:$8 sm:$0xf0] %vm3_vm0, %v2371_v15  }
  0x18   :  { %52 = vst.msk [vmem:[#allocation0 + $0x1c0] ss:$8 sm:$0xf] %vm3_vm0, %v2313_v7  }
  0x19   :  { %54 = vst.msk [vmem:[#allocation0 + $0x1c0] ss:$8 sm:$0xf0] %vm3_vm0, %v2313_v7  }
  0x1a   :  { %267 = vrot.lane.b32.xlu2 %v2329_v9, %s2250_s12  ;;  %258 = vrot.lane.b32.xlu1 %v2334_v10, %s2250_s12  ;;  %143 = vst.msk [vmem:[#allocation0 + $0x500] ss:$8 sm:$0xf] %vm3_vm0, %v2392_v18  }
  0x1b   :  { %249 = vrot.lane.b32.xlu0 %v2339_v11, %s2250_s12  ;;  %145 = vst.msk [vmem:[#allocation0 + $0x500] ss:$8 sm:$0xf0] %vm3_vm0, %v2392_v18  }
  0x22   :  { %294 = vrot.lane.b32.xlu2 %v2350_v12, %s2250_s12  ;;  %285 = vrot.lane.b32.xlu1 %v2355_v13, %s2250_s12 }
  0x23   :  { %276 = vrot.lane.b32.xlu0 %v2360_v14, %s2250_s12 }
  0x2a   :  { %321 = vrot.lane.b32.xlu2 %v2371_v15, %s2250_s12  ;;  %312 = vrot.lane.b32.xlu1 %v2376_v16, %s2250_s12 }
  0x2b   :  { %303 = vrot.lane.b32.xlu0 %v2381_v17, %s2250_s12 }
  0x32   :  { %348 = vrot.lane.b32.xlu2 %v2392_v18, %s2250_s12  ;;  %339 = vrot.lane.b32.xlu1 %v2397_v19, %s2250_s12 }
  0x33   :  { %330 = vrot.lane.b32.xlu0 %v2402_v20, %s2250_s12 }
  0x3a   :  { %375 = vrot.lane.b32.xlu2 %v2413_v21, %s2250_s12  ;;  %366 = vrot.lane.b32.xlu1 %v2418_v22, %s2250_s12 }
  0x3b   :  { %357 = vrot.lane.b32.xlu0 %v2423_v23, %s2250_s12  ;;  %s2251_s12 = smov 96  }
  0x42   :  { %401 = vrot.lane.b32.xlu2 %v2271_v1, %s2251_s12  ;;  %392 = vrot.lane.b32.xlu1 %v2297_v5, %s2251_s12 }
  0x43   :  { %383 = vrot.lane.b32.xlu0 %v2276_v2, %s2251_s12 }
  0x4a   :  { %428 = vrot.lane.b32.xlu2 %v2287_v3, %s2251_s12  ;;  %419 = vrot.lane.b32.xlu1 %v2266_v0, %s2251_s12 }
  0x4b   :  { %410 = vrot.lane.b32.xlu0 %v2292_v4, %s2251_s12 }
  0x52   :  { %455 = vrot.lane.b32.xlu2 %v2308_v6, %s2251_s12  ;;  %446 = vrot.lane.b32.xlu1 %v2313_v7, %s2251_s12 }
  0x53   :  { %437 = vrot.lane.b32.xlu0 %v2318_v8, %s2251_s12 }
  0x5a   :  { %482 = vrot.lane.b32.xlu2 %v2329_v9, %s2251_s12  ;;  %473 = vrot.lane.b32.xlu1 %v2334_v10, %s2251_s12 }
  0x5b   :  { %464 = vrot.lane.b32.xlu0 %v2339_v11, %s2251_s12 }
  0x5c   :  { %v205_v24 = vpop.permute.xlu2 %204  }
  0x5d   :  { %208 = vst.msk [vmem:[#allocation0 + $0x101] ss:$8 sm:$0xf] %vm3_vm0, %v205_v24  }
  0x5e   :  { %210 = vst.msk [vmem:[#allocation0 + $0x101] ss:$8 sm:$0xf0] %vm3_vm0, %v205_v24  }
  0x62   :  { %509 = vrot.lane.b32.xlu2 %v2350_v12, %s2251_s12  ;;  %500 = vrot.lane.b32.xlu1 %v2355_v13, %s2251_s12 }
  0x63   :  { %491 = vrot.lane.b32.xlu0 %v2360_v14, %s2251_s12 }
  0x64   :  { %v214_v25 = vpop.permute.xlu2 %213  }
  0x65   :  { %217 = vst.msk [vmem:[#allocation0 + $0x141] ss:$8 sm:$0xf] %vm3_vm0, %v214_v25  }
  0x66   :  { %219 = vst.msk [vmem:[#allocation0 + $0x141] ss:$8 sm:$0xf0] %vm3_vm0, %v214_v25  }
  0x6a   :  { %536 = vrot.lane.b32.xlu2 %v2371_v15, %s2251_s12  ;;  %527 = vrot.lane.b32.xlu1 %v2376_v16, %s2251_s12 }
  0x6b   :  { %518 = vrot.lane.b32.xlu0 %v2381_v17, %s2251_s12 }
  0x6c   :  { %v241_v26 = vpop.permute.xlu2 %240  }
  0x6d   :  { %244 = vst.msk [vmem:[#allocation0 + $0x201] ss:$8 sm:$0xf] %vm3_vm0, %v241_v26  }
  0x6e   :  { %246 = vst.msk [vmem:[#allocation0 + $0x201] ss:$8 sm:$0xf0] %vm3_vm0, %v241_v26  }
  0x72   :  { %563 = vrot.lane.b32.xlu2 %v2392_v18, %s2251_s12  ;;  %554 = vrot.lane.b32.xlu1 %v2397_v19, %s2251_s12 }
  0x73   :  { %545 = vrot.lane.b32.xlu0 %v2402_v20, %s2251_s12 }
  0x74   :  { %v268_v27 = vpop.permute.xlu2 %267   ;;  %v187_v28 = vpop.permute.xlu1 %186  }
  0x75   :  { %271 = vst.msk [vmem:[#allocation0 + $0x2c1] ss:$8 sm:$0xf] %vm3_vm0, %v268_v27   ;;  %v169_v29 = vpop.permute.xlu0 %168  }
  0x76   :  { %273 = vst.msk [vmem:[#allocation0 + $0x2c1] ss:$8 sm:$0xf0] %vm3_vm0, %v268_v27  }
  0x77   :  { %190 = vst.msk [vmem:[#allocation0 + $0x81] ss:$8 sm:$0xf] %vm3_vm0, %v187_v28  }
  0x78   :  { %192 = vst.msk [vmem:[#allocation0 + $0x81] ss:$8 sm:$0xf0] %vm3_vm0, %v187_v28  }
  0x79   :  { %172 = vst.msk [vmem:[#allocation0 + $0x1] ss:$8 sm:$0xf] %vm3_vm0, %v169_v29  }
  0x7a   :  { %174 = vst.msk [vmem:[#allocation0 + $0x1] ss:$8 sm:$0xf0] %vm3_vm0, %v169_v29   ;;  %590 = vrot.lane.b32.xlu2 %v2413_v21, %s2251_s12  ;;  %581 = vrot.lane.b32.xlu1 %v2418_v22, %s2251_s12 }
  0x7b   :  { %572 = vrot.lane.b32.xlu0 %v2423_v23, %s2251_s12 }
  0x7c   :  { %v295_v30 = vpop.permute.xlu2 %294   ;;  %v196_v31 = vpop.permute.xlu1 %195  }
  0x7d   :  { %298 = vst.msk [vmem:[#allocation0 + $0x381] ss:$8 sm:$0xf] %vm3_vm0, %v295_v30   ;;  %v178_v32 = vpop.permute.xlu0 %177  }
  0x7e   :  { %300 = vst.msk [vmem:[#allocation0 + $0x381] ss:$8 sm:$0xf0] %vm3_vm0, %v295_v30  }
  0x7f   :  { %199 = vst.msk [vmem:[#allocation0 + $0xc1] ss:$8 sm:$0xf] %vm3_vm0, %v196_v31  }
  0x80   :  { %201 = vst.msk [vmem:[#allocation0 + $0xc1] ss:$8 sm:$0xf0] %vm3_vm0, %v196_v31  }
  0x81   :  { %181 = vst.msk [vmem:[#allocation0 + $0x41] ss:$8 sm:$0xf] %vm3_vm0, %v178_v32  }
  0x82   :  { %183 = vst.msk [vmem:[#allocation0 + $0x41] ss:$8 sm:$0xf0] %vm3_vm0, %v178_v32   ;;  %616 = vrot.lane.b32.xlu2 %v2271_v1, %s2252_s27  ;;  %607 = vrot.lane.b32.xlu1 %v2297_v5, %s2252_s27 }
  0x83   :  { %598 = vrot.lane.b32.xlu0 %v2276_v2, %s2252_s27 }
  0x84   :  { %v322_v33 = vpop.permute.xlu2 %321   ;;  %v232_v34 = vpop.permute.xlu1 %231  }
  0x85   :  { %325 = vst.msk [vmem:[#allocation0 + $0x441] ss:$8 sm:$0xf] %vm3_vm0, %v322_v33   ;;  %v223_v35 = vpop.permute.xlu0 %222  }
  0x86   :  { %327 = vst.msk [vmem:[#allocation0 + $0x441] ss:$8 sm:$0xf0] %vm3_vm0, %v322_v33  }
  0x87   :  { %235 = vst.msk [vmem:[#allocation0 + $0x1c1] ss:$8 sm:$0xf] %vm3_vm0, %v232_v34  }
  0x88   :  { %237 = vst.msk [vmem:[#allocation0 + $0x1c1] ss:$8 sm:$0xf0] %vm3_vm0, %v232_v34  }
  0x89   :  { %226 = vst.msk [vmem:[#allocation0 + $0x181] ss:$8 sm:$0xf] %vm3_vm0, %v223_v35  }
  0x8a   :  { %228 = vst.msk [vmem:[#allocation0 + $0x181] ss:$8 sm:$0xf0] %vm3_vm0, %v223_v35   ;;  %643 = vrot.lane.b32.xlu2 %v2287_v3, %s2252_s27  ;;  %634 = vrot.lane.b32.xlu1 %v2266_v0, %s2252_s27 }
  0x8b   :  { %625 = vrot.lane.b32.xlu0 %v2292_v4, %s2252_s27 }
  0x8c   :  { %v349_v36 = vpop.permute.xlu2 %348   ;;  %v259_v37 = vpop.permute.xlu1 %258  }
  0x8d   :  { %352 = vst.msk [vmem:[#allocation0 + $0x501] ss:$8 sm:$0xf] %vm3_vm0, %v349_v36   ;;  %v250_v38 = vpop.permute.xlu0 %249  }
  0x8e   :  { %354 = vst.msk [vmem:[#allocation0 + $0x501] ss:$8 sm:$0xf0] %vm3_vm0, %v349_v36  }
  0x8f   :  { %262 = vst.msk [vmem:[#allocation0 + $0x281] ss:$8 sm:$0xf] %vm3_vm0, %v259_v37  }
  0x90   :  { %264 = vst.msk [vmem:[#allocation0 + $0x281] ss:$8 sm:$0xf0] %vm3_vm0, %v259_v37  }
  0x91   :  { %253 = vst.msk [vmem:[#allocation0 + $0x241] ss:$8 sm:$0xf] %vm3_vm0, %v250_v38  }
  0x92   :  { %255 = vst.msk [vmem:[#allocation0 + $0x241] ss:$8 sm:$0xf0] %vm3_vm0, %v250_v38   ;;  %670 = vrot.lane.b32.xlu2 %v2308_v6, %s2252_s27  ;;  %661 = vrot.lane.b32.xlu1 %v2313_v7, %s2252_s27 }
  0x93   :  { %652 = vrot.lane.b32.xlu0 %v2318_v8, %s2252_s27 }
  0x94   :  { %v376_v39 = vpop.permute.xlu2 %375   ;;  %v286_v40 = vpop.permute.xlu1 %285  }
  0x95   :  { %379 = vst.msk [vmem:[#allocation0 + $0x5c1] ss:$8 sm:$0xf] %vm3_vm0, %v376_v39   ;;  %v277_v41 = vpop.permute.xlu0 %276  }
  0x96   :  { %381 = vst.msk [vmem:[#allocation0 + $0x5c1] ss:$8 sm:$0xf0] %vm3_vm0, %v376_v39  }
  0x97   :  { %289 = vst.msk [vmem:[#allocation0 + $0x341] ss:$8 sm:$0xf] %vm3_vm0, %v286_v40  }
  0x98   :  { %291 = vst.msk [vmem:[#allocation0 + $0x341] ss:$8 sm:$0xf0] %vm3_vm0, %v286_v40  }
  0x99   :  { %280 = vst.msk [vmem:[#allocation0 + $0x301] ss:$8 sm:$0xf] %vm3_vm0, %v277_v41  }
  0x9a   :  { %282 = vst.msk [vmem:[#allocation0 + $0x301] ss:$8 sm:$0xf0] %vm3_vm0, %v277_v41   ;;  %697 = vrot.lane.b32.xlu2 %v2329_v9, %s2252_s27  ;;  %688 = vrot.lane.b32.xlu1 %v2334_v10, %s2252_s27 }
  0x9b   :  { %679 = vrot.lane.b32.xlu0 %v2339_v11, %s2252_s27 }
  0x9c   :  { %v402_v42 = vpop.permute.xlu2 %401   ;;  %v313_v43 = vpop.permute.xlu1 %312  }
  0x9d   :  { %405 = vst.msk [vmem:[#allocation0 + $0x82] ss:$8 sm:$0xf] %vm3_vm0, %v402_v42   ;;  %v304_v44 = vpop.permute.xlu0 %303  }
  0x9e   :  { %407 = vst.msk [vmem:[#allocation0 + $0x82] ss:$8 sm:$0xf0] %vm3_vm0, %v402_v42  }
  0x9f   :  { %316 = vst.msk [vmem:[#allocation0 + $0x401] ss:$8 sm:$0xf] %vm3_vm0, %v313_v43  }
  0xa0   :  { %318 = vst.msk [vmem:[#allocation0 + $0x401] ss:$8 sm:$0xf0] %vm3_vm0, %v313_v43  }
  0xa1   :  { %307 = vst.msk [vmem:[#allocation0 + $0x3c1] ss:$8 sm:$0xf] %vm3_vm0, %v304_v44  }
  0xa2   :  { %309 = vst.msk [vmem:[#allocation0 + $0x3c1] ss:$8 sm:$0xf0] %vm3_vm0, %v304_v44   ;;  %724 = vrot.lane.b32.xlu2 %v2350_v12, %s2252_s27  ;;  %715 = vrot.lane.b32.xlu1 %v2355_v13, %s2252_s27 }
  0xa3   :  { %706 = vrot.lane.b32.xlu0 %v2360_v14, %s2252_s27 }
  0xa4   :  { %v429_v45 = vpop.permute.xlu2 %428   ;;  %v340_v46 = vpop.permute.xlu1 %339  }
  0xa5   :  { %432 = vst.msk [vmem:[#allocation0 + $0x142] ss:$8 sm:$0xf] %vm3_vm0, %v429_v45   ;;  %v331_v47 = vpop.permute.xlu0 %330  }
  0xa6   :  { %434 = vst.msk [vmem:[#allocation0 + $0x142] ss:$8 sm:$0xf0] %vm3_vm0, %v429_v45  }
  0xa7   :  { %343 = vst.msk [vmem:[#allocation0 + $0x4c1] ss:$8 sm:$0xf] %vm3_vm0, %v340_v46  }
  0xa8   :  { %345 = vst.msk [vmem:[#allocation0 + $0x4c1] ss:$8 sm:$0xf0] %vm3_vm0, %v340_v46  }
  0xa9   :  { %334 = vst.msk [vmem:[#allocation0 + $0x481] ss:$8 sm:$0xf] %vm3_vm0, %v331_v47  }
  0xaa   :  { %336 = vst.msk [vmem:[#allocation0 + $0x481] ss:$8 sm:$0xf0] %vm3_vm0, %v331_v47   ;;  %751 = vrot.lane.b32.xlu2 %v2371_v15, %s2252_s27  ;;  %742 = vrot.lane.b32.xlu1 %v2376_v16, %s2252_s27 }
  0xab   :  { %733 = vrot.lane.b32.xlu0 %v2381_v17, %s2252_s27 }
  0xac   :  { %v456_v48 = vpop.permute.xlu2 %455   ;;  %v367_v49 = vpop.permute.xlu1 %366  }
  0xad   :  { %459 = vst.msk [vmem:[#allocation0 + $0x202] ss:$8 sm:$0xf] %vm3_vm0, %v456_v48   ;;  %v358_v50 = vpop.permute.xlu0 %357  }
  0xae   :  { %461 = vst.msk [vmem:[#allocation0 + $0x202] ss:$8 sm:$0xf0] %vm3_vm0, %v456_v48  }
  0xaf   :  { %370 = vst.msk [vmem:[#allocation0 + $0x581] ss:$8 sm:$0xf] %vm3_vm0, %v367_v49  }
  0xb0   :  { %372 = vst.msk [vmem:[#allocation0 + $0x581] ss:$8 sm:$0xf0] %vm3_vm0, %v367_v49  }
  0xb1   :  { %361 = vst.msk [vmem:[#allocation0 + $0x541] ss:$8 sm:$0xf] %vm3_vm0, %v358_v50  }
  0xb2   :  { %363 = vst.msk [vmem:[#allocation0 + $0x541] ss:$8 sm:$0xf0] %vm3_vm0, %v358_v50   ;;  %778 = vrot.lane.b32.xlu2 %v2392_v18, %s2252_s27  ;;  %769 = vrot.lane.b32.xlu1 %v2397_v19, %s2252_s27 }
  0xb3   :  { %760 = vrot.lane.b32.xlu0 %v2402_v20, %s2252_s27 }
  0xb4   :  { %v483_v51 = vpop.permute.xlu2 %482   ;;  %v393_v52 = vpop.permute.xlu1 %392  }
  0xb5   :  { %486 = vst.msk [vmem:[#allocation0 + $0x2c2] ss:$8 sm:$0xf] %vm3_vm0, %v483_v51   ;;  %v384_v53 = vpop.permute.xlu0 %383  }
  0xb6   :  { %488 = vst.msk [vmem:[#allocation0 + $0x2c2] ss:$8 sm:$0xf0] %vm3_vm0, %v483_v51  }
  0xb7   :  { %396 = vst.msk [vmem:[#allocation0 + $0x42] ss:$8 sm:$0xf] %vm3_vm0, %v393_v52  }
  0xb8   :  { %398 = vst.msk [vmem:[#allocation0 + $0x42] ss:$8 sm:$0xf0] %vm3_vm0, %v393_v52  }
  0xb9   :  { %387 = vst.msk [vmem:[#allocation0 + $0x2] ss:$8 sm:$0xf] %vm3_vm0, %v384_v53  }
  0xba   :  { %389 = vst.msk [vmem:[#allocation0 + $0x2] ss:$8 sm:$0xf0] %vm3_vm0, %v384_v53   ;;  %805 = vrot.lane.b32.xlu2 %v2413_v21, %s2252_s27  ;;  %796 = vrot.lane.b32.xlu1 %v2418_v22, %s2252_s27 }
  0xbb   :  { %787 = vrot.lane.b32.xlu0 %v2423_v23, %s2252_s27 }
  0xbc   :  { %v510_v54 = vpop.permute.xlu2 %509   ;;  %v420_v55 = vpop.permute.xlu1 %419  }
  0xbd   :  { %513 = vst.msk [vmem:[#allocation0 + $0x382] ss:$8 sm:$0xf] %vm3_vm0, %v510_v54   ;;  %v411_v56 = vpop.permute.xlu0 %410  }
  0xbe   :  { %515 = vst.msk [vmem:[#allocation0 + $0x382] ss:$8 sm:$0xf0] %vm3_vm0, %v510_v54  }
  0xbf   :  { %423 = vst.msk [vmem:[#allocation0 + $0x102] ss:$8 sm:$0xf] %vm3_vm0, %v420_v55  }
  0xc0   :  { %425 = vst.msk [vmem:[#allocation0 + $0x102] ss:$8 sm:$0xf0] %vm3_vm0, %v420_v55  }
  0xc1   :  { %414 = vst.msk [vmem:[#allocation0 + $0xc2] ss:$8 sm:$0xf] %vm3_vm0, %v411_v56  }
  0xc2   :  { %416 = vst.msk [vmem:[#allocation0 + $0xc2] ss:$8 sm:$0xf0] %vm3_vm0, %v411_v56  }
  0xc4   :  { %v537_v57 = vpop.permute.xlu2 %536   ;;  %v447_v58 = vpop.permute.xlu1 %446  }
  0xc5   :  { %540 = vst.msk [vmem:[#allocation0 + $0x442] ss:$8 sm:$0xf] %vm3_vm0, %v537_v57   ;;  %v438_v59 = vpop.permute.xlu0 %437  }
  0xc6   :  { %542 = vst.msk [vmem:[#allocation0 + $0x442] ss:$8 sm:$0xf0] %vm3_vm0, %v537_v57  }
  0xc7   :  { %450 = vst.msk [vmem:[#allocation0 + $0x1c2] ss:$8 sm:$0xf] %vm3_vm0, %v447_v58  }
  0xc8   :  { %452 = vst.msk [vmem:[#allocation0 + $0x1c2] ss:$8 sm:$0xf0] %vm3_vm0, %v447_v58  }
  0xc9   :  { %441 = vst.msk [vmem:[#allocation0 + $0x182] ss:$8 sm:$0xf] %vm3_vm0, %v438_v59  }
  0xca   :  { %443 = vst.msk [vmem:[#allocation0 + $0x182] ss:$8 sm:$0xf0] %vm3_vm0, %v438_v59  }
  0xcc   :  { %v564_v60 = vpop.permute.xlu2 %563   ;;  %v474_v61 = vpop.permute.xlu1 %473  }
  0xcd   :  { %567 = vst.msk [vmem:[#allocation0 + $0x502] ss:$8 sm:$0xf] %vm3_vm0, %v564_v60   ;;  %v465_v62 = vpop.permute.xlu0 %464  }
  0xce   :  { %569 = vst.msk [vmem:[#allocation0 + $0x502] ss:$8 sm:$0xf0] %vm3_vm0, %v564_v60  }
  0xcf   :  { %477 = vst.msk [vmem:[#allocation0 + $0x282] ss:$8 sm:$0xf] %vm3_vm0, %v474_v61  }
  0xd0   :  { %479 = vst.msk [vmem:[#allocation0 + $0x282] ss:$8 sm:$0xf0] %vm3_vm0, %v474_v61  }
  0xd1   :  { %468 = vst.msk [vmem:[#allocation0 + $0x242] ss:$8 sm:$0xf] %vm3_vm0, %v465_v62  }
  0xd2   :  { %470 = vst.msk [vmem:[#allocation0 + $0x242] ss:$8 sm:$0xf0] %vm3_vm0, %v465_v62  }
  0xd4   :  { %v591_v63 = vpop.permute.xlu2 %590   ;;  %v501_v0 = vpop.permute.xlu1 %500  }
  0xd5   :  { %594 = vst.msk [vmem:[#allocation0 + $0x5c2] ss:$8 sm:$0xf] %vm3_vm0, %v591_v63   ;;  %v492_v1 = vpop.permute.xlu0 %491  }
  0xd6   :  { %596 = vst.msk [vmem:[#allocation0 + $0x5c2] ss:$8 sm:$0xf0] %vm3_vm0, %v591_v63  }
  0xd7   :  { %504 = vst.msk [vmem:[#allocation0 + $0x342] ss:$8 sm:$0xf] %vm3_vm0, %v501_v0  }
  0xd8   :  { %506 = vst.msk [vmem:[#allocation0 + $0x342] ss:$8 sm:$0xf0] %vm3_vm0, %v501_v0  }
  0xd9   :  { %495 = vst.msk [vmem:[#allocation0 + $0x302] ss:$8 sm:$0xf] %vm3_vm0, %v492_v1  }
  0xda   :  { %497 = vst.msk [vmem:[#allocation0 + $0x302] ss:$8 sm:$0xf0] %vm3_vm0, %v492_v1  }
  0xdc   :  { %v617_v2 = vpop.permute.xlu2 %616   ;;  %v528_v3 = vpop.permute.xlu1 %527  }
  0xdd   :  { %620 = vst.msk [vmem:[#allocation0 + $0x83] ss:$8 sm:$0xf] %vm3_vm0, %v617_v2   ;;  %v519_v4 = vpop.permute.xlu0 %518  }
  0xde   :  { %622 = vst.msk [vmem:[#allocation0 + $0x83] ss:$8 sm:$0xf0] %vm3_vm0, %v617_v2  }
  0xdf   :  { %531 = vst.msk [vmem:[#allocation0 + $0x402] ss:$8 sm:$0xf] %vm3_vm0, %v528_v3  }
  0xe0   :  { %533 = vst.msk [vmem:[#allocation0 + $0x402] ss:$8 sm:$0xf0] %vm3_vm0, %v528_v3  }
  0xe1   :  { %522 = vst.msk [vmem:[#allocation0 + $0x3c2] ss:$8 sm:$0xf] %vm3_vm0, %v519_v4  }
  0xe2   :  { %524 = vst.msk [vmem:[#allocation0 + $0x3c2] ss:$8 sm:$0xf0] %vm3_vm0, %v519_v4  }
  0xe4   :  { %v909_v5 = vld [vmem:[#allocation0 + $0x80] sm:$0xf]  ;;  %v915_v6 = vld [vmem:[#allocation0 + $0x88] sm:$0xf]  ;;  %v644_v7 = vpop.permute.xlu2 %643   ;;  %v555_v8 = vpop.permute.xlu1 %554   ;;  %v921_v9 = vld [vmem:[#allocation0 + $0x90] sm:$0xf] }
  0xe5   :  { %v546_v10 = vpop.permute.xlu0 %545   ;;  %v927_v11 = vld [vmem:[#allocation0 + $0x98] sm:$0xf]  ;;  %2071 = vst [vmem:[%s3383_s1 + $0x40] sm:$0xf] %v909_v5  ;;  %v933_v12 = vld [vmem:[#allocation0 + $0xa0] sm:$0xf] }
  0xe6   :  { %2072 = vst [vmem:[%s3383_s1 + $0x44] sm:$0xf] %v915_v6  ;;  %v939_v13 = vld [vmem:[#allocation0 + $0xa8] sm:$0xf]  ;;  %v945_v14 = vld [vmem:[#allocation0 + $0xb0] sm:$0xf] }
  0xe7   :  { %2073 = vst [vmem:[%s3383_s1 + $0x48] sm:$0xf] %v921_v9  ;;  %v951_v15 = vld [vmem:[#allocation0 + $0xb8] sm:$0xf] }
  0xe8   :  { %2074 = vst [vmem:[%s3383_s1 + $0x4c] sm:$0xf] %v927_v11 }
  0xe9   :  { %2075 = vst [vmem:[%s3383_s1 + $0x50] sm:$0xf] %v933_v12 }
  0xea   :  { %2076 = vst [vmem:[%s3383_s1 + $0x54] sm:$0xf] %v939_v13 }
  0xeb   :  { %2077 = vst [vmem:[%s3383_s1 + $0x58] sm:$0xf] %v945_v14 }
  0xec   :  { %v671_v16 = vpop.permute.xlu2 %670   ;;  %v582_v17 = vpop.permute.xlu1 %581   ;;  %2078 = vst [vmem:[%s3383_s1 + $0x5c] sm:$0xf] %v951_v15 }
  0xed   :  { %v573_v18 = vpop.permute.xlu0 %572   ;;  %647 = vst.msk [vmem:[#allocation0 + $0x143] ss:$8 sm:$0xf] %vm3_vm0, %v644_v7  }
  0xee   :  { %649 = vst.msk [vmem:[#allocation0 + $0x143] ss:$8 sm:$0xf0] %vm3_vm0, %v644_v7  }
  0xef   :  { %558 = vst.msk [vmem:[#allocation0 + $0x4c2] ss:$8 sm:$0xf] %vm3_vm0, %v555_v8  }
  0xf0   :  { %560 = vst.msk [vmem:[#allocation0 + $0x4c2] ss:$8 sm:$0xf0] %vm3_vm0, %v555_v8  }
  0xf1   :  { %549 = vst.msk [vmem:[#allocation0 + $0x482] ss:$8 sm:$0xf] %vm3_vm0, %v546_v10  }
  0xf2   :  { %551 = vst.msk [vmem:[#allocation0 + $0x482] ss:$8 sm:$0xf0] %vm3_vm0, %v546_v10  }
  0xf3   :  { %674 = vst.msk [vmem:[#allocation0 + $0x203] ss:$8 sm:$0xf] %vm3_vm0, %v671_v16  }
  0xf4   :  { %v698_v19 = vpop.permute.xlu2 %697   ;;  %v608_v20 = vpop.permute.xlu1 %607   ;;  %v1053_v21 = vld [vmem:[#allocation0 + $0x140] sm:$0xf]  ;;  %v1059_v22 = vld [vmem:[#allocation0 + $0x148] sm:$0xf]  ;;  %v1065_v23 = vld [vmem:[#allocation0 + $0x150] sm:$0xf] }
  0xf5   :  { %v1071_v24 = vld [vmem:[#allocation0 + $0x158] sm:$0xf]  ;;  %2095 = vst [vmem:[%s3383_s1 + $0xa0] sm:$0xf] %v1053_v21  ;;  %v599_v25 = vpop.permute.xlu0 %598   ;;  %v1077_v26 = vld [vmem:[#allocation0 + $0x160] sm:$0xf] }
  0xf6   :  { %2096 = vst [vmem:[%s3383_s1 + $0xa4] sm:$0xf] %v1059_v22  ;;  %v1083_v27 = vld [vmem:[#allocation0 + $0x168] sm:$0xf]  ;;  %v1089_v28 = vld [vmem:[#allocation0 + $0x170] sm:$0xf] }
  0xf7   :  { %2097 = vst [vmem:[%s3383_s1 + $0xa8] sm:$0xf] %v1065_v23  ;;  %v1095_v29 = vld [vmem:[#allocation0 + $0x178] sm:$0xf] }
  0xf8   :  { %2098 = vst [vmem:[%s3383_s1 + $0xac] sm:$0xf] %v1071_v24 }
  0xf9   :  { %2099 = vst [vmem:[%s3383_s1 + $0xb0] sm:$0xf] %v1077_v26 }
  0xfa   :  { %2100 = vst [vmem:[%s3383_s1 + $0xb4] sm:$0xf] %v1083_v27  ;;  %v1197_v30 = vld [vmem:[#allocation0 + $0x200] sm:$0xf]  ;;  %v1203_v31 = vld [vmem:[#allocation0 + $0x208] sm:$0xf] }
  0xfb   :  { %2101 = vst [vmem:[%s3383_s1 + $0xb8] sm:$0xf] %v1089_v28  ;;  %v1209_v32 = vld [vmem:[#allocation0 + $0x210] sm:$0xf]  ;;  %v1215_v33 = vld [vmem:[#allocation0 + $0x218] sm:$0xf] }
  0xfc   :  { %2102 = vst [vmem:[%s3383_s1 + $0xbc] sm:$0xf] %v1095_v29  ;;  %v725_v38 = vpop.permute.xlu2 %724   ;;  %v2763_v43 = vpop.permute.xlu1 %634  }
  0xfd   :  { %676 = vst.msk [vmem:[#allocation0 + $0x203] ss:$8 sm:$0xf0] %vm3_vm0, %v671_v16   ;;  %v626_v52 = vpop.permute.xlu0 %625  }
  0xfe   :  { %585 = vst.msk [vmem:[#allocation0 + $0x582] ss:$8 sm:$0xf] %vm3_vm0, %v582_v17  }
  0xff   :  { %587 = vst.msk [vmem:[#allocation0 + $0x582] ss:$8 sm:$0xf0] %vm3_vm0, %v582_v17  }
 0x100   :  { %2119 = vst [vmem:[%s3383_s1 + $0x100] sm:$0xf] %v1197_v30 }
 0x101   :  { %2120 = vst [vmem:[%s3383_s1 + $0x104] sm:$0xf] %v1203_v31 }
 0x102   :  { %2121 = vst [vmem:[%s3383_s1 + $0x108] sm:$0xf] %v1209_v32 }
 0x103   :  { %2122 = vst [vmem:[%s3383_s1 + $0x10c] sm:$0xf] %v1215_v33 }
 0x104   :  { %v1221_v34 = vld [vmem:[#allocation0 + $0x220] sm:$0xf]  ;;  %v1227_v35 = vld [vmem:[#allocation0 + $0x228] sm:$0xf]  ;;  %v1233_v36 = vld [vmem:[#allocation0 + $0x230] sm:$0xf]  ;;  %v752_v3 = vpop.permute.xlu2 %751   ;;  %v2835_v4 = vpop.permute.xlu1 %661  }
 0x105   :  { %v1239_v37 = vld [vmem:[#allocation0 + $0x238] sm:$0xf]  ;;  %2123 = vst [vmem:[%s3383_s1 + $0x110] sm:$0xf] %v1221_v34  ;;  %v2866_v11 = vpop.permute.xlu0 %652  }
 0x106   :  { %2124 = vst [vmem:[%s3383_s1 + $0x114] sm:$0xf] %v1227_v35 }
 0x107   :  { %2125 = vst [vmem:[%s3383_s1 + $0x118] sm:$0xf] %v1233_v36 }
 0x108   :  { %2126 = vst [vmem:[%s3383_s1 + $0x11c] sm:$0xf] %v1239_v37 }
 0x109   :  { %576 = vst.msk [vmem:[#allocation0 + $0x542] ss:$8 sm:$0xf] %vm3_vm0, %v573_v18  }
 0x10a   :  { %578 = vst.msk [vmem:[#allocation0 + $0x542] ss:$8 sm:$0xf0] %vm3_vm0, %v573_v18  }
 0x10b   :  { %701 = vst.msk [vmem:[#allocation0 + $0x2c3] ss:$8 sm:$0xf] %vm3_vm0, %v698_v19  }
 0x10c   :  { %703 = vst.msk [vmem:[#allocation0 + $0x2c3] ss:$8 sm:$0xf0] %vm3_vm0, %v698_v19   ;;  %v779_v22 = vpop.permute.xlu2 %778  }
 0x10d   :  { %611 = vst.msk [vmem:[#allocation0 + $0x43] ss:$8 sm:$0xf] %vm3_vm0, %v608_v20  }
 0x10e   :  { %613 = vst.msk [vmem:[#allocation0 + $0x43] ss:$8 sm:$0xf0] %vm3_vm0, %v608_v20  }
 0x10f   :  { %602 = vst.msk [vmem:[#allocation0 + $0x3] ss:$8 sm:$0xf] %vm3_vm0, %v599_v25  }
 0x110   :  { %604 = vst.msk [vmem:[#allocation0 + $0x3] ss:$8 sm:$0xf0] %vm3_vm0, %v599_v25  }
 0x111   :  { %728 = vst.msk [vmem:[#allocation0 + $0x383] ss:$8 sm:$0xf] %vm3_vm0, %v725_v38  }
 0x112   :  { %v1341_v39 = vld [vmem:[#allocation0 + $0x2c0] sm:$0xf]  ;;  %v1347_v40 = vld [vmem:[#allocation0 + $0x2c8] sm:$0xf]  ;;  %v1353_v41 = vld [vmem:[#allocation0 + $0x2d0] sm:$0xf] }
 0x113   :  { %v1359_v42 = vld [vmem:[#allocation0 + $0x2d8] sm:$0xf]  ;;  %2143 = vst [vmem:[%s3383_s1 + $0x160] sm:$0xf] %v1341_v39  ;;  %v1365_v44 = vld [vmem:[#allocation0 + $0x2e0] sm:$0xf]  ;;  %v689_v39 = vpop.permute.xlu1 %688  }
 0x114   :  { %2144 = vst [vmem:[%s3383_s1 + $0x164] sm:$0xf] %v1347_v40  ;;  %v1371_v45 = vld [vmem:[#allocation0 + $0x2e8] sm:$0xf]  ;;  %v1377_v46 = vld [vmem:[#allocation0 + $0x2f0] sm:$0xf] }
 0x115   :  { %2145 = vst [vmem:[%s3383_s1 + $0x168] sm:$0xf] %v1353_v41  ;;  %v1383_v47 = vld [vmem:[#allocation0 + $0x2f8] sm:$0xf]  ;;  %v861_v53 = vld [vmem:[#allocation0 + $0x40] sm:$0xf] }
 0x116   :  { %2146 = vst [vmem:[%s3383_s1 + $0x16c] sm:$0xf] %v1359_v42  ;;  %v867_v54 = vld [vmem:[#allocation0 + $0x48] sm:$0xf]  ;;  %v873_v55 = vld [vmem:[#allocation0 + $0x50] sm:$0xf] }
 0x117   :  { %2147 = vst [vmem:[%s3383_s1 + $0x170] sm:$0xf] %v1365_v44  ;;  %v837_v48 = vld [vmem:[#allocation0 + $0x20] sm:$0xf]  ;;  %v843_v49 = vld [vmem:[#allocation0 + $0x28] sm:$0xf] }
 0x118   :  { %2148 = vst [vmem:[%s3383_s1 + $0x174] sm:$0xf] %v1371_v45  ;;  %v849_v50 = vld [vmem:[#allocation0 + $0x30] sm:$0xf]  ;;  %v855_v51 = vld [vmem:[#allocation0 + $0x38] sm:$0xf] }
 0x119   :  { %2149 = vst [vmem:[%s3383_s1 + $0x178] sm:$0xf] %v1377_v46  ;;  %v879_v56 = vld [vmem:[#allocation0 + $0x58] sm:$0xf]  ;;  %v885_v57 = vld [vmem:[#allocation0 + $0x60] sm:$0xf]  ;;  %v680_v46 = vpop.permute.xlu0 %679  }
 0x11a   :  { %2150 = vst [vmem:[%s3383_s1 + $0x17c] sm:$0xf] %v1383_v47  ;;  %v891_v58 = vld [vmem:[#allocation0 + $0x68] sm:$0xf]  ;;  %v897_v59 = vld [vmem:[#allocation0 + $0x70] sm:$0xf] }
 0x11b   :  { %2059 = vst [vmem:[%s3383_s1 + $0x10] sm:$0xf] %v837_v48  ;;  %v903_v60 = vld [vmem:[#allocation0 + $0x78] sm:$0xf]  ;;  %v1485_v61 = vld [vmem:[#allocation0 + $0x380] sm:$0xf] }
 0x11c   :  { %2060 = vst [vmem:[%s3383_s1 + $0x14] sm:$0xf] %v843_v49  ;;  %v1491_v62 = vld [vmem:[#allocation0 + $0x388] sm:$0xf]  ;;  %v1497_v63 = vld [vmem:[#allocation0 + $0x390] sm:$0xf] }
 0x11d   :  { %2061 = vst [vmem:[%s3383_s1 + $0x18] sm:$0xf] %v849_v50  ;;  %v1503_v0 = vld [vmem:[#allocation0 + $0x398] sm:$0xf]  ;;  %v814_v1 = vld [vmem:[#allocation0] sm:$0xf] }
 0x11e   :  { %2062 = vst [vmem:[%s3383_s1 + $0x1c] sm:$0xf] %v855_v51  ;;  %v819_v2 = vld [vmem:[#allocation0 + $0x8] sm:$0xf]  ;;  %v825_v9 = vld [vmem:[#allocation0 + $0x10] sm:$0xf] }
 0x11f   :  { %2063 = vst [vmem:[%s3383_s1 + $0x20] sm:$0xf] %v861_v53  ;;  %v831_v10 = vld [vmem:[#allocation0 + $0x18] sm:$0xf] }
 0x120   :  { %2064 = vst [vmem:[%s3383_s1 + $0x24] sm:$0xf] %v867_v54 }
 0x121   :  { %2065 = vst [vmem:[%s3383_s1 + $0x28] sm:$0xf] %v873_v55 }
 0x122   :  { %2066 = vst [vmem:[%s3383_s1 + $0x2c] sm:$0xf] %v879_v56 }
 0x123   :  { %2067 = vst [vmem:[%s3383_s1 + $0x30] sm:$0xf] %v885_v57 }
 0x124   :  { %2068 = vst [vmem:[%s3383_s1 + $0x34] sm:$0xf] %v891_v58 }
 0x125   :  { %2069 = vst [vmem:[%s3383_s1 + $0x38] sm:$0xf] %v897_v59  ;;  %v806_v59 = vpop.permute.xlu2 %805  }
 0x126   :  { %2070 = vst [vmem:[%s3383_s1 + $0x3c] sm:$0xf] %v903_v60 }
 0x127   :  { %730 = vst.msk [vmem:[#allocation0 + $0x383] ss:$8 sm:$0xf0] %vm3_vm0, %v725_v38  }
 0x128   :  { %2167 = vst [vmem:[%s3383_s1 + $0x1c0] sm:$0xf] %v1485_v61 }
 0x129   :  { %2168 = vst [vmem:[%s3383_s1 + $0x1c4] sm:$0xf] %v1491_v62 }
 0x12a   :  { %2169 = vst [vmem:[%s3383_s1 + $0x1c8] sm:$0xf] %v1497_v63 }
 0x12b   :  { %2170 = vst [vmem:[%s3383_s1 + $0x1cc] sm:$0xf] %v1503_v0  ;;  %v1973_v0 = vld [vmem:[%s3382_s0 + $0x50] sm:$0xff]  }
 0x12c   :  { %817 = vst [vmem:[%s3383_s1] sm:$0xf] %v814_v1  ;;  %v1972_v1 = vld [vmem:[%s3382_s0 + $0x48] sm:$0xff]  }
 0x12d   :  { %2056 = vst [vmem:[%s3383_s1 + $0x4] sm:$0xf] %v819_v2  ;;  %v716_v2 = vpop.permute.xlu1 %715  }
 0x12e   :  { %v1509_v5 = vld [vmem:[#allocation0 + $0x3a0] sm:$0xf]  ;;  %v1515_v6 = vld [vmem:[#allocation0 + $0x3a8] sm:$0xf]  ;;  %v1521_v7 = vld [vmem:[#allocation0 + $0x3b0] sm:$0xf] }
 0x12f   :  { %2171 = vst [vmem:[%s3383_s1 + $0x1d0] sm:$0xf] %v1509_v5  ;;  %v1527_v8 = vld [vmem:[#allocation0 + $0x3b8] sm:$0xf] }
 0x130   :  { %2172 = vst [vmem:[%s3383_s1 + $0x1d4] sm:$0xf] %v1515_v6 }
 0x131   :  { %2173 = vst [vmem:[%s3383_s1 + $0x1d8] sm:$0xf] %v1521_v7  ;;  %v3043_v7 = vpop.permute.xlu0 %706  }
 0x132   :  { %2174 = vst [vmem:[%s3383_s1 + $0x1dc] sm:$0xf] %v1527_v8 }
 0x133   :  { %2057 = vst [vmem:[%s3383_s1 + $0x8] sm:$0xf] %v825_v9 }
 0x134   :  { %2058 = vst [vmem:[%s3383_s1 + $0xc] sm:$0xf] %v831_v10 }
 0x135   :  { %638 = vst.msk [vmem:[#allocation0 + $0x103] ss:$8 sm:$0xf] %vm3_vm0, %v2763_v43  }
 0x136   :  { %640 = vst.msk [vmem:[#allocation0 + $0x103] ss:$8 sm:$0xf0] %vm3_vm0, %v2763_v43  }
 0x137   :  { %629 = vst.msk [vmem:[#allocation0 + $0xc3] ss:$8 sm:$0xf] %vm3_vm0, %v626_v52  }
 0x138   :  { %631 = vst.msk [vmem:[#allocation0 + $0xc3] ss:$8 sm:$0xf0] %vm3_vm0, %v626_v52  }
 0x139   :  { %755 = vst.msk [vmem:[#allocation0 + $0x443] ss:$8 sm:$0xf] %vm3_vm0, %v752_v3  }
 0x13a   :  { %757 = vst.msk [vmem:[#allocation0 + $0x443] ss:$8 sm:$0xf0] %vm3_vm0, %v752_v3   ;;  %v1986_v3 = vld [vmem:[%s3382_s0 + $0xb8] sm:$0xff]  }
 0x13b   :  { %665 = vst.msk [vmem:[#allocation0 + $0x1c3] ss:$8 sm:$0xf] %vm3_vm0, %v2835_v4  }
 0x13c   :  { %v1005_v12 = vld [vmem:[#allocation0 + $0x100] sm:$0xf]  ;;  %v1011_v13 = vld [vmem:[#allocation0 + $0x108] sm:$0xf]  ;;  %v1017_v14 = vld [vmem:[#allocation0 + $0x110] sm:$0xf] }
 0x13d   :  { %2087 = vst [vmem:[%s3383_s1 + $0x80] sm:$0xf] %v1005_v12  ;;  %v1023_v15 = vld [vmem:[#allocation0 + $0x118] sm:$0xf]  ;;  %v1029_v16 = vld [vmem:[#allocation0 + $0x120] sm:$0xf] }
 0x13e   :  { %2088 = vst [vmem:[%s3383_s1 + $0x84] sm:$0xf] %v1011_v13  ;;  %v1035_v17 = vld [vmem:[#allocation0 + $0x128] sm:$0xf]  ;;  %v1041_v18 = vld [vmem:[#allocation0 + $0x130] sm:$0xf] }
 0x13f   :  { %2089 = vst [vmem:[%s3383_s1 + $0x88] sm:$0xf] %v1017_v14  ;;  %v1047_v19 = vld [vmem:[#allocation0 + $0x138] sm:$0xf]  ;;  %v957_v20 = vld [vmem:[#allocation0 + $0xc0] sm:$0xf] }
 0x140   :  { %2090 = vst [vmem:[%s3383_s1 + $0x8c] sm:$0xf] %v1023_v15  ;;  %v963_v21 = vld [vmem:[#allocation0 + $0xc8] sm:$0xf]  ;;  %v969_v23 = vld [vmem:[#allocation0 + $0xd0] sm:$0xf] }
 0x141   :  { %2091 = vst [vmem:[%s3383_s1 + $0x90] sm:$0xf] %v1029_v16  ;;  %v975_v24 = vld [vmem:[#allocation0 + $0xd8] sm:$0xf]  ;;  %v981_v25 = vld [vmem:[#allocation0 + $0xe0] sm:$0xf] }
 0x142   :  { %2092 = vst [vmem:[%s3383_s1 + $0x94] sm:$0xf] %v1035_v17  ;;  %v987_v26 = vld [vmem:[#allocation0 + $0xe8] sm:$0xf]  ;;  %v993_v27 = vld [vmem:[#allocation0 + $0xf0] sm:$0xf] }
 0x143   :  { %2093 = vst [vmem:[%s3383_s1 + $0x98] sm:$0xf] %v1041_v18  ;;  %v999_v28 = vld [vmem:[#allocation0 + $0xf8] sm:$0xf]  ;;  %v1629_v29 = vld [vmem:[#allocation0 + $0x440] sm:$0xf] }
 0x144   :  { %2094 = vst [vmem:[%s3383_s1 + $0x9c] sm:$0xf] %v1047_v19  ;;  %v1635_v30 = vld [vmem:[#allocation0 + $0x448] sm:$0xf]  ;;  %v1641_v31 = vld [vmem:[#allocation0 + $0x450] sm:$0xf] }
 0x145   :  { %2079 = vst [vmem:[%s3383_s1 + $0x60] sm:$0xf] %v957_v20  ;;  %v1647_v32 = vld [vmem:[#allocation0 + $0x458] sm:$0xf]  ;;  %v1653_v33 = vld [vmem:[#allocation0 + $0x460] sm:$0xf] }
 0x146   :  { %2080 = vst [vmem:[%s3383_s1 + $0x64] sm:$0xf] %v963_v21  ;;  %v1659_v34 = vld [vmem:[#allocation0 + $0x468] sm:$0xf]  ;;  %v1665_v35 = vld [vmem:[#allocation0 + $0x470] sm:$0xf] }
 0x147   :  { %2081 = vst [vmem:[%s3383_s1 + $0x68] sm:$0xf] %v969_v23  ;;  %v1671_v36 = vld [vmem:[#allocation0 + $0x478] sm:$0xf]  ;;  %v1149_v37 = vld [vmem:[#allocation0 + $0x1c0] sm:$0xf] }
 0x148   :  { %2082 = vst [vmem:[%s3383_s1 + $0x6c] sm:$0xf] %v975_v24  ;;  %v1155_v38 = vld [vmem:[#allocation0 + $0x1c8] sm:$0xf]  ;;  %v1161_v40 = vld [vmem:[#allocation0 + $0x1d0] sm:$0xf] }
 0x149   :  { %2083 = vst [vmem:[%s3383_s1 + $0x70] sm:$0xf] %v981_v25  ;;  %v1167_v41 = vld [vmem:[#allocation0 + $0x1d8] sm:$0xf]  ;;  %v1976_v21 = vld [vmem:[%s3382_s0 + $0x68] sm:$0xff]  }
 0x14a   :  { %2084 = vst [vmem:[%s3383_s1 + $0x74] sm:$0xf] %v987_v26  ;;  %v743_v26 = vpop.permute.xlu1 %742  }
 0x14b   :  { %2085 = vst [vmem:[%s3383_s1 + $0x78] sm:$0xf] %v993_v27  ;;  %v3107_v27 = vpop.permute.xlu0 %733  }
 0x14c   :  { %2086 = vst [vmem:[%s3383_s1 + $0x7c] sm:$0xf] %v999_v28 }
 0x14d   :  { %2191 = vst [vmem:[%s3383_s1 + $0x220] sm:$0xf] %v1629_v29 }
 0x14e   :  { %2192 = vst [vmem:[%s3383_s1 + $0x224] sm:$0xf] %v1635_v30 }
 0x14f   :  { %2193 = vst [vmem:[%s3383_s1 + $0x228] sm:$0xf] %v1641_v31 }
 0x150   :  { %2194 = vst [vmem:[%s3383_s1 + $0x22c] sm:$0xf] %v1647_v32 }
 0x151   :  { %2195 = vst [vmem:[%s3383_s1 + $0x230] sm:$0xf] %v1653_v33 }
 0x152   :  { %2196 = vst [vmem:[%s3383_s1 + $0x234] sm:$0xf] %v1659_v34 }
 0x153   :  { %2197 = vst [vmem:[%s3383_s1 + $0x238] sm:$0xf] %v1665_v35 }
 0x154   :  { %2198 = vst [vmem:[%s3383_s1 + $0x23c] sm:$0xf] %v1671_v36 }
 0x155   :  { %667 = vst.msk [vmem:[#allocation0 + $0x1c3] ss:$8 sm:$0xf0] %vm3_vm0, %v2835_v4  }
 0x156   :  { %2111 = vst [vmem:[%s3383_s1 + $0xe0] sm:$0xf] %v1149_v37 }
 0x157   :  { %2112 = vst [vmem:[%s3383_s1 + $0xe4] sm:$0xf] %v1155_v38 }
 0x158   :  { %2113 = vst [vmem:[%s3383_s1 + $0xe8] sm:$0xf] %v1161_v40 }
 0x159   :  { %2114 = vst [vmem:[%s3383_s1 + $0xec] sm:$0xf] %v1167_v41  ;;  %v1979_v41 = vld [vmem:[%s3382_s0 + $0x80] sm:$0xff]  }
 0x15a   :  { %656 = vst.msk [vmem:[#allocation0 + $0x183] ss:$8 sm:$0xf] %vm3_vm0, %v2866_v11  }
 0x15b   :  { %658 = vst.msk [vmem:[#allocation0 + $0x183] ss:$8 sm:$0xf0] %vm3_vm0, %v2866_v11  }
 0x15c   :  { %v1173_v42 = vld [vmem:[#allocation0 + $0x1e0] sm:$0xf]  ;;  %v1179_v43 = vld [vmem:[#allocation0 + $0x1e8] sm:$0xf]  ;;  %v1185_v44 = vld [vmem:[#allocation0 + $0x1f0] sm:$0xf] }
 0x15d   :  { %2115 = vst [vmem:[%s3383_s1 + $0xf0] sm:$0xf] %v1173_v42  ;;  %v1191_v45 = vld [vmem:[#allocation0 + $0x1f8] sm:$0xf] }
 0x15e   :  { %2116 = vst [vmem:[%s3383_s1 + $0xf4] sm:$0xf] %v1179_v43  ;;  %v1978_v42 = vld [vmem:[%s3382_s0 + $0x78] sm:$0xff]  }
 0x15f   :  { %2117 = vst [vmem:[%s3383_s1 + $0xf8] sm:$0xf] %v1185_v44 }
 0x160   :  { %2118 = vst [vmem:[%s3383_s1 + $0xfc] sm:$0xf] %v1191_v45 }
 0x161   :  { %v1101_v47 = vld [vmem:[#allocation0 + $0x180] sm:$0xf]  ;;  %v1107_v48 = vld [vmem:[#allocation0 + $0x188] sm:$0xf]  ;;  %v1113_v49 = vld [vmem:[#allocation0 + $0x190] sm:$0xf] }
 0x162   :  { %2103 = vst [vmem:[%s3383_s1 + $0xc0] sm:$0xf] %v1101_v47  ;;  %v1119_v50 = vld [vmem:[#allocation0 + $0x198] sm:$0xf]  ;;  %v1125_v51 = vld [vmem:[#allocation0 + $0x1a0] sm:$0xf]  ;;  %v3173_v47 = vpop.permute.xlu0 %760  }
 0x163   :  { %782 = vst.msk [vmem:[#allocation0 + $0x503] ss:$8 sm:$0xf] %vm3_vm0, %v779_v22   ;;  %v1131_v52 = vld [vmem:[#allocation0 + $0x1a8] sm:$0xf] }
 0x164   :  { %784 = vst.msk [vmem:[#allocation0 + $0x503] ss:$8 sm:$0xf0] %vm3_vm0, %v779_v22   ;;  %v1137_v62 = vld [vmem:[#allocation0 + $0x1b0] sm:$0xf]  ;;  %v1975_v22 = vld [vmem:[%s3382_s0 + $0x60] sm:$0xff]  }
 0x165   :  { %2104 = vst [vmem:[%s3383_s1 + $0xc4] sm:$0xf] %v1107_v48  ;;  %v1143_v63 = vld [vmem:[#allocation0 + $0x1b8] sm:$0xf] }
 0x166   :  { %2105 = vst [vmem:[%s3383_s1 + $0xc8] sm:$0xf] %v1113_v49 }
 0x167   :  { %2106 = vst [vmem:[%s3383_s1 + $0xcc] sm:$0xf] %v1119_v50 }
 0x168   :  { %2107 = vst [vmem:[%s3383_s1 + $0xd0] sm:$0xf] %v1125_v51 }
 0x169   :  { %2108 = vst [vmem:[%s3383_s1 + $0xd4] sm:$0xf] %v1131_v52 }
 0x16a   :  { %v1773_v53 = vld [vmem:[#allocation0 + $0x500] sm:$0xf]  ;;  %v1779_v54 = vld [vmem:[#allocation0 + $0x508] sm:$0xf]  ;;  %v1785_v55 = vld [vmem:[#allocation0 + $0x510] sm:$0xf] }
 0x16b   :  { %2215 = vst [vmem:[%s3383_s1 + $0x280] sm:$0xf] %v1773_v53  ;;  %v1791_v56 = vld [vmem:[#allocation0 + $0x518] sm:$0xf]  ;;  %v1797_v57 = vld [vmem:[#allocation0 + $0x520] sm:$0xf] }
 0x16c   :  { %2216 = vst [vmem:[%s3383_s1 + $0x284] sm:$0xf] %v1779_v54  ;;  %v1803_v58 = vld [vmem:[#allocation0 + $0x528] sm:$0xf]  ;;  %v1809_v60 = vld [vmem:[#allocation0 + $0x530] sm:$0xf] }
 0x16d   :  { %2217 = vst [vmem:[%s3383_s1 + $0x288] sm:$0xf] %v1785_v55  ;;  %v1815_v61 = vld [vmem:[#allocation0 + $0x538] sm:$0xf] }
 0x16e   :  { %2218 = vst [vmem:[%s3383_s1 + $0x28c] sm:$0xf] %v1791_v56 }
 0x16f   :  { %2219 = vst [vmem:[%s3383_s1 + $0x290] sm:$0xf] %v1797_v57 }
 0x170   :  { %2220 = vst [vmem:[%s3383_s1 + $0x294] sm:$0xf] %v1803_v58 }
 0x171   :  { %2221 = vst [vmem:[%s3383_s1 + $0x298] sm:$0xf] %v1809_v60 }
 0x172   :  { %2222 = vst [vmem:[%s3383_s1 + $0x29c] sm:$0xf] %v1815_v61  ;;  %v1982_v61 = vld [vmem:[%s3382_s0 + $0x98] sm:$0xff]  }
 0x173   :  { %2109 = vst [vmem:[%s3383_s1 + $0xd8] sm:$0xf] %v1137_v62  ;;  %v1981_v62 = vld [vmem:[%s3382_s0 + $0x90] sm:$0xff]  }
 0x174   :  { %2110 = vst [vmem:[%s3383_s1 + $0xdc] sm:$0xf] %v1143_v63 }
 0x175   :  { %73 = vst.msk [vmem:[#allocation0 + $0x280] ss:$8 sm:$0xf] %vm3_vm0, %v1973_v0  }
 0x176   :  { %75 = vst.msk [vmem:[#allocation0 + $0x280] ss:$8 sm:$0xf0] %vm3_vm0, %v1973_v0  }
 0x177   :  { %692 = vst.msk [vmem:[#allocation0 + $0x283] ss:$8 sm:$0xf] %vm3_vm0, %v689_v39  }
 0x178   :  { %694 = vst.msk [vmem:[#allocation0 + $0x283] ss:$8 sm:$0xf0] %vm3_vm0, %v689_v39  }
 0x179   :  { %66 = vst.msk [vmem:[#allocation0 + $0x240] ss:$8 sm:$0xf] %vm3_vm0, %v1972_v1  }
 0x17a   :  { %68 = vst.msk [vmem:[#allocation0 + $0x240] ss:$8 sm:$0xf0] %vm3_vm0, %v1972_v1  }
 0x17b   :  { %683 = vst.msk [vmem:[#allocation0 + $0x243] ss:$8 sm:$0xf] %vm3_vm0, %v680_v46  }
 0x17c   :  { %685 = vst.msk [vmem:[#allocation0 + $0x243] ss:$8 sm:$0xf0] %vm3_vm0, %v680_v46   ;;  %v770_v46 = vpop.permute.xlu1 %769  }
 0x17d   :  { %164 = vst.msk [vmem:[#allocation0 + $0x5c0] ss:$8 sm:$0xf] %vm3_vm0, %v1986_v3  }
 0x17e   :  { %v1293_v4 = vld [vmem:[#allocation0 + $0x280] sm:$0xf]  ;;  %v1299_v5 = vld [vmem:[#allocation0 + $0x288] sm:$0xf]  ;;  %v1305_v6 = vld [vmem:[#allocation0 + $0x290] sm:$0xf] }
 0x17f   :  { %2135 = vst [vmem:[%s3383_s1 + $0x140] sm:$0xf] %v1293_v4  ;;  %v1311_v8 = vld [vmem:[#allocation0 + $0x298] sm:$0xf]  ;;  %v1317_v9 = vld [vmem:[#allocation0 + $0x2a0] sm:$0xf] }
 0x180   :  { %2136 = vst [vmem:[%s3383_s1 + $0x144] sm:$0xf] %v1299_v5  ;;  %v1323_v10 = vld [vmem:[#allocation0 + $0x2a8] sm:$0xf]  ;;  %v1329_v11 = vld [vmem:[#allocation0 + $0x2b0] sm:$0xf] }
 0x181   :  { %2137 = vst [vmem:[%s3383_s1 + $0x148] sm:$0xf] %v1305_v6  ;;  %v1335_v12 = vld [vmem:[#allocation0 + $0x2b8] sm:$0xf] }
 0x182   :  { %2138 = vst [vmem:[%s3383_s1 + $0x14c] sm:$0xf] %v1311_v8  ;;  %v1245_v13 = vld [vmem:[#allocation0 + $0x240] sm:$0xf]  ;;  %v1251_v14 = vld [vmem:[#allocation0 + $0x248] sm:$0xf] }
 0x183   :  { %2139 = vst [vmem:[%s3383_s1 + $0x150] sm:$0xf] %v1317_v9  ;;  %v1257_v15 = vld [vmem:[#allocation0 + $0x250] sm:$0xf]  ;;  %v1263_v16 = vld [vmem:[#allocation0 + $0x258] sm:$0xf] }
 0x184   :  { %2140 = vst [vmem:[%s3383_s1 + $0x154] sm:$0xf] %v1323_v10  ;;  %v1269_v17 = vld [vmem:[#allocation0 + $0x260] sm:$0xf]  ;;  %v1275_v18 = vld [vmem:[#allocation0 + $0x268] sm:$0xf] }
 0x185   :  { %2141 = vst [vmem:[%s3383_s1 + $0x158] sm:$0xf] %v1329_v11  ;;  %v1281_v19 = vld [vmem:[#allocation0 + $0x270] sm:$0xf]  ;;  %v1287_v20 = vld [vmem:[#allocation0 + $0x278] sm:$0xf] }
 0x186   :  { %2142 = vst [vmem:[%s3383_s1 + $0x15c] sm:$0xf] %v1335_v12 }
 0x187   :  { %2127 = vst [vmem:[%s3383_s1 + $0x120] sm:$0xf] %v1245_v13 }
 0x188   :  { %2128 = vst [vmem:[%s3383_s1 + $0x124] sm:$0xf] %v1251_v14 }
 0x189   :  { %2129 = vst [vmem:[%s3383_s1 + $0x128] sm:$0xf] %v1257_v15 }
 0x18a   :  { %2130 = vst [vmem:[%s3383_s1 + $0x12c] sm:$0xf] %v1263_v16 }
 0x18b   :  { %2131 = vst [vmem:[%s3383_s1 + $0x130] sm:$0xf] %v1269_v17  ;;  %v1985_v17 = vld [vmem:[%s3382_s0 + $0xb0] sm:$0xff]  }
 0x18c   :  { %2132 = vst [vmem:[%s3383_s1 + $0x134] sm:$0xf] %v1275_v18  ;;  %v1984_v18 = vld [vmem:[%s3382_s0 + $0xa8] sm:$0xff]  }
 0x18d   :  { %2133 = vst [vmem:[%s3383_s1 + $0x138] sm:$0xf] %v1281_v19 }
 0x18e   :  { %2134 = vst [vmem:[%s3383_s1 + $0x13c] sm:$0xf] %v1287_v20 }
 0x18f   :  { %166 = vst.msk [vmem:[#allocation0 + $0x5c0] ss:$8 sm:$0xf0] %vm3_vm0, %v1986_v3   ;;  %v3239_v3 = vpop.permute.xlu0 %787  }
 0x190   :  { %809 = vst.msk [vmem:[#allocation0 + $0x5c3] ss:$8 sm:$0xf] %vm3_vm0, %v806_v59  }
 0x191   :  { %811 = vst.msk [vmem:[#allocation0 + $0x5c3] ss:$8 sm:$0xf0] %vm3_vm0, %v806_v59  }
 0x192   :  { %94 = vst.msk [vmem:[#allocation0 + $0x340] ss:$8 sm:$0xf] %vm3_vm0, %v1976_v21  }
 0x193   :  { %96 = vst.msk [vmem:[#allocation0 + $0x340] ss:$8 sm:$0xf0] %vm3_vm0, %v1976_v21  }
 0x194   :  { %719 = vst.msk [vmem:[#allocation0 + $0x343] ss:$8 sm:$0xf] %vm3_vm0, %v716_v2  }
 0x195   :  { %721 = vst.msk [vmem:[#allocation0 + $0x343] ss:$8 sm:$0xf0] %vm3_vm0, %v716_v2   ;;  %v797_v2 = vpop.permute.xlu1 %796  }
 0x196   :  { %87 = vst.msk [vmem:[#allocation0 + $0x300] ss:$8 sm:$0xf] %vm3_vm0, %v1975_v22  }
 0x197   :  { %v1917_v23 = vld [vmem:[#allocation0 + $0x5c0] sm:$0xf]  ;;  %v1923_v24 = vld [vmem:[#allocation0 + $0x5c8] sm:$0xf]  ;;  %v1929_v25 = vld [vmem:[#allocation0 + $0x5d0] sm:$0xf] }
 0x198   :  { %2239 = vst [vmem:[%s3383_s1 + $0x2e0] sm:$0xf] %v1917_v23  ;;  %v1935_v28 = vld [vmem:[#allocation0 + $0x5d8] sm:$0xf]  ;;  %v1941_v29 = vld [vmem:[#allocation0 + $0x5e0] sm:$0xf] }
 0x199   :  { %2240 = vst [vmem:[%s3383_s1 + $0x2e4] sm:$0xf] %v1923_v24  ;;  %v1947_v30 = vld [vmem:[#allocation0 + $0x5e8] sm:$0xf]  ;;  %v1953_v31 = vld [vmem:[#allocation0 + $0x5f0] sm:$0xf] }
 0x19a   :  { %2241 = vst [vmem:[%s3383_s1 + $0x2e8] sm:$0xf] %v1929_v25  ;;  %v1959_v32 = vld [vmem:[#allocation0 + $0x5f8] sm:$0xf] }
 0x19b   :  { %2242 = vst [vmem:[%s3383_s1 + $0x2ec] sm:$0xf] %v1935_v28  ;;  %v1437_v33 = vld [vmem:[#allocation0 + $0x340] sm:$0xf]  ;;  %v1443_v34 = vld [vmem:[#allocation0 + $0x348] sm:$0xf] }
 0x19c   :  { %2243 = vst [vmem:[%s3383_s1 + $0x2f0] sm:$0xf] %v1941_v29  ;;  %v1449_v35 = vld [vmem:[#allocation0 + $0x350] sm:$0xf]  ;;  %v1455_v36 = vld [vmem:[#allocation0 + $0x358] sm:$0xf] }
 0x19d   :  { %2244 = vst [vmem:[%s3383_s1 + $0x2f4] sm:$0xf] %v1947_v30  ;;  %v1461_v37 = vld [vmem:[#allocation0 + $0x360] sm:$0xf]  ;;  %v1467_v38 = vld [vmem:[#allocation0 + $0x368] sm:$0xf] }
 0x19e   :  { %2245 = vst [vmem:[%s3383_s1 + $0x2f8] sm:$0xf] %v1953_v31  ;;  %v1473_v39 = vld [vmem:[#allocation0 + $0x370] sm:$0xf]  ;;  %v1479_v40 = vld [vmem:[#allocation0 + $0x378] sm:$0xf] }
 0x19f   :  { %2246 = vst [vmem:[%s3383_s1 + $0x2fc] sm:$0xf] %v1959_v32 }
 0x1a0   :  { %2159 = vst [vmem:[%s3383_s1 + $0x1a0] sm:$0xf] %v1437_v33 }
 0x1a1   :  { %2160 = vst [vmem:[%s3383_s1 + $0x1a4] sm:$0xf] %v1443_v34 }
 0x1a2   :  { %2161 = vst [vmem:[%s3383_s1 + $0x1a8] sm:$0xf] %v1449_v35 }
 0x1a3   :  { %2162 = vst [vmem:[%s3383_s1 + $0x1ac] sm:$0xf] %v1455_v36 }
 0x1a4   :  { %2163 = vst [vmem:[%s3383_s1 + $0x1b0] sm:$0xf] %v1461_v37 }
 0x1a5   :  { %2164 = vst [vmem:[%s3383_s1 + $0x1b4] sm:$0xf] %v1467_v38 }
 0x1a6   :  { %2165 = vst [vmem:[%s3383_s1 + $0x1b8] sm:$0xf] %v1473_v39 }
 0x1a7   :  { %2166 = vst [vmem:[%s3383_s1 + $0x1bc] sm:$0xf] %v1479_v40 }
 0x1a8   :  { %89 = vst.msk [vmem:[#allocation0 + $0x300] ss:$8 sm:$0xf0] %vm3_vm0, %v1975_v22  }
 0x1a9   :  { %710 = vst.msk [vmem:[#allocation0 + $0x303] ss:$8 sm:$0xf] %vm3_vm0, %v3043_v7  }
 0x1aa   :  { %712 = vst.msk [vmem:[#allocation0 + $0x303] ss:$8 sm:$0xf0] %vm3_vm0, %v3043_v7  }
 0x1ab   :  { %115 = vst.msk [vmem:[#allocation0 + $0x400] ss:$8 sm:$0xf] %vm3_vm0, %v1979_v41  }
 0x1ac   :  { %117 = vst.msk [vmem:[#allocation0 + $0x400] ss:$8 sm:$0xf0] %vm3_vm0, %v1979_v41  }
 0x1ad   :  { %746 = vst.msk [vmem:[#allocation0 + $0x403] ss:$8 sm:$0xf] %vm3_vm0, %v743_v26  }
 0x1ae   :  { %748 = vst.msk [vmem:[#allocation0 + $0x403] ss:$8 sm:$0xf0] %vm3_vm0, %v743_v26  }
 0x1af   :  { %108 = vst.msk [vmem:[#allocation0 + $0x3c0] ss:$8 sm:$0xf] %vm3_vm0, %v1978_v42  }
 0x1b0   :  { %v1389_v43 = vld [vmem:[#allocation0 + $0x300] sm:$0xf]  ;;  %v1395_v44 = vld [vmem:[#allocation0 + $0x308] sm:$0xf]  ;;  %v1401_v45 = vld [vmem:[#allocation0 + $0x310] sm:$0xf] }
 0x1b1   :  { %2151 = vst [vmem:[%s3383_s1 + $0x180] sm:$0xf] %v1389_v43  ;;  %v1407_v48 = vld [vmem:[#allocation0 + $0x318] sm:$0xf]  ;;  %v1413_v49 = vld [vmem:[#allocation0 + $0x320] sm:$0xf] }
 0x1b2   :  { %2152 = vst [vmem:[%s3383_s1 + $0x184] sm:$0xf] %v1395_v44  ;;  %v1419_v50 = vld [vmem:[#allocation0 + $0x328] sm:$0xf]  ;;  %v1425_v51 = vld [vmem:[#allocation0 + $0x330] sm:$0xf] }
 0x1b3   :  { %2153 = vst [vmem:[%s3383_s1 + $0x188] sm:$0xf] %v1401_v45  ;;  %v1431_v52 = vld [vmem:[#allocation0 + $0x338] sm:$0xf] }
 0x1b4   :  { %2154 = vst [vmem:[%s3383_s1 + $0x18c] sm:$0xf] %v1407_v48  ;;  %v1581_v53 = vld [vmem:[#allocation0 + $0x400] sm:$0xf]  ;;  %v1587_v54 = vld [vmem:[#allocation0 + $0x408] sm:$0xf] }
 0x1b5   :  { %2155 = vst [vmem:[%s3383_s1 + $0x190] sm:$0xf] %v1413_v49  ;;  %v1593_v55 = vld [vmem:[#allocation0 + $0x410] sm:$0xf]  ;;  %v1599_v56 = vld [vmem:[#allocation0 + $0x418] sm:$0xf] }
 0x1b6   :  { %2156 = vst [vmem:[%s3383_s1 + $0x194] sm:$0xf] %v1419_v50  ;;  %v1605_v57 = vld [vmem:[#allocation0 + $0x420] sm:$0xf]  ;;  %v1611_v58 = vld [vmem:[#allocation0 + $0x428] sm:$0xf] }
 0x1b7   :  { %2157 = vst [vmem:[%s3383_s1 + $0x198] sm:$0xf] %v1425_v51  ;;  %v1617_v59 = vld [vmem:[#allocation0 + $0x430] sm:$0xf]  ;;  %v1623_v60 = vld [vmem:[#allocation0 + $0x438] sm:$0xf] }
 0x1b8   :  { %2158 = vst [vmem:[%s3383_s1 + $0x19c] sm:$0xf] %v1431_v52 }
 0x1b9   :  { %2183 = vst [vmem:[%s3383_s1 + $0x200] sm:$0xf] %v1581_v53 }
 0x1ba   :  { %2184 = vst [vmem:[%s3383_s1 + $0x204] sm:$0xf] %v1587_v54 }
 0x1bb   :  { %2185 = vst [vmem:[%s3383_s1 + $0x208] sm:$0xf] %v1593_v55 }
 0x1bc   :  { %2186 = vst [vmem:[%s3383_s1 + $0x20c] sm:$0xf] %v1599_v56 }
 0x1bd   :  { %2187 = vst [vmem:[%s3383_s1 + $0x210] sm:$0xf] %v1605_v57 }
 0x1be   :  { %2188 = vst [vmem:[%s3383_s1 + $0x214] sm:$0xf] %v1611_v58 }
 0x1bf   :  { %2189 = vst [vmem:[%s3383_s1 + $0x218] sm:$0xf] %v1617_v59 }
 0x1c0   :  { %2190 = vst [vmem:[%s3383_s1 + $0x21c] sm:$0xf] %v1623_v60 }
 0x1c1   :  { %110 = vst.msk [vmem:[#allocation0 + $0x3c0] ss:$8 sm:$0xf0] %vm3_vm0, %v1978_v42  }
 0x1c2   :  { %737 = vst.msk [vmem:[#allocation0 + $0x3c3] ss:$8 sm:$0xf] %vm3_vm0, %v3107_v27  }
 0x1c3   :  { %739 = vst.msk [vmem:[#allocation0 + $0x3c3] ss:$8 sm:$0xf0] %vm3_vm0, %v3107_v27  }
 0x1c4   :  { %136 = vst.msk [vmem:[#allocation0 + $0x4c0] ss:$8 sm:$0xf] %vm3_vm0, %v1982_v61  }
 0x1c5   :  { %138 = vst.msk [vmem:[#allocation0 + $0x4c0] ss:$8 sm:$0xf0] %vm3_vm0, %v1982_v61  }
 0x1c6   :  { %773 = vst.msk [vmem:[#allocation0 + $0x4c3] ss:$8 sm:$0xf] %vm3_vm0, %v770_v46  }
 0x1c7   :  { %775 = vst.msk [vmem:[#allocation0 + $0x4c3] ss:$8 sm:$0xf0] %vm3_vm0, %v770_v46  }
 0x1c8   :  { %129 = vst.msk [vmem:[#allocation0 + $0x480] ss:$8 sm:$0xf] %vm3_vm0, %v1981_v62  }
 0x1c9   :  { %v1533_v63 = vld [vmem:[#allocation0 + $0x3c0] sm:$0xf]  ;;  %v1539_v0 = vld [vmem:[#allocation0 + $0x3c8] sm:$0xf]  ;;  %v1545_v1 = vld [vmem:[#allocation0 + $0x3d0] sm:$0xf] }
 0x1ca   :  { %2175 = vst [vmem:[%s3383_s1 + $0x1e0] sm:$0xf] %v1533_v63  ;;  %v1551_v4 = vld [vmem:[#allocation0 + $0x3d8] sm:$0xf]  ;;  %v1557_v5 = vld [vmem:[#allocation0 + $0x3e0] sm:$0xf] }
 0x1cb   :  { %2176 = vst [vmem:[%s3383_s1 + $0x1e4] sm:$0xf] %v1539_v0  ;;  %v1563_v6 = vld [vmem:[#allocation0 + $0x3e8] sm:$0xf]  ;;  %v1569_v7 = vld [vmem:[#allocation0 + $0x3f0] sm:$0xf] }
 0x1cc   :  { %2177 = vst [vmem:[%s3383_s1 + $0x1e8] sm:$0xf] %v1545_v1  ;;  %v1575_v8 = vld [vmem:[#allocation0 + $0x3f8] sm:$0xf] }
 0x1cd   :  { %2178 = vst [vmem:[%s3383_s1 + $0x1ec] sm:$0xf] %v1551_v4  ;;  %v1725_v9 = vld [vmem:[#allocation0 + $0x4c0] sm:$0xf]  ;;  %v1731_v10 = vld [vmem:[#allocation0 + $0x4c8] sm:$0xf] }
 0x1ce   :  { %2179 = vst [vmem:[%s3383_s1 + $0x1f0] sm:$0xf] %v1557_v5  ;;  %v1737_v11 = vld [vmem:[#allocation0 + $0x4d0] sm:$0xf]  ;;  %v1743_v12 = vld [vmem:[#allocation0 + $0x4d8] sm:$0xf] }
 0x1cf   :  { %2180 = vst [vmem:[%s3383_s1 + $0x1f4] sm:$0xf] %v1563_v6  ;;  %v1749_v13 = vld [vmem:[#allocation0 + $0x4e0] sm:$0xf]  ;;  %v1755_v14 = vld [vmem:[#allocation0 + $0x4e8] sm:$0xf] }
 0x1d0   :  { %2181 = vst [vmem:[%s3383_s1 + $0x1f8] sm:$0xf] %v1569_v7  ;;  %v1761_v15 = vld [vmem:[#allocation0 + $0x4f0] sm:$0xf]  ;;  %v1767_v16 = vld [vmem:[#allocation0 + $0x4f8] sm:$0xf] }
 0x1d1   :  { %2182 = vst [vmem:[%s3383_s1 + $0x1fc] sm:$0xf] %v1575_v8 }
 0x1d2   :  { %2207 = vst [vmem:[%s3383_s1 + $0x260] sm:$0xf] %v1725_v9 }
 0x1d3   :  { %2208 = vst [vmem:[%s3383_s1 + $0x264] sm:$0xf] %v1731_v10 }
 0x1d4   :  { %2209 = vst [vmem:[%s3383_s1 + $0x268] sm:$0xf] %v1737_v11 }
 0x1d5   :  { %2210 = vst [vmem:[%s3383_s1 + $0x26c] sm:$0xf] %v1743_v12 }
 0x1d6   :  { %2211 = vst [vmem:[%s3383_s1 + $0x270] sm:$0xf] %v1749_v13 }
 0x1d7   :  { %2212 = vst [vmem:[%s3383_s1 + $0x274] sm:$0xf] %v1755_v14 }
 0x1d8   :  { %2213 = vst [vmem:[%s3383_s1 + $0x278] sm:$0xf] %v1761_v15 }
 0x1d9   :  { %2214 = vst [vmem:[%s3383_s1 + $0x27c] sm:$0xf] %v1767_v16 }
 0x1da   :  { %131 = vst.msk [vmem:[#allocation0 + $0x480] ss:$8 sm:$0xf0] %vm3_vm0, %v1981_v62  }
 0x1db   :  { %764 = vst.msk [vmem:[#allocation0 + $0x483] ss:$8 sm:$0xf] %vm3_vm0, %v3173_v47  }
 0x1dc   :  { %766 = vst.msk [vmem:[#allocation0 + $0x483] ss:$8 sm:$0xf0] %vm3_vm0, %v3173_v47  }
 0x1dd   :  { %157 = vst.msk [vmem:[#allocation0 + $0x580] ss:$8 sm:$0xf] %vm3_vm0, %v1985_v17  }
 0x1de   :  { %159 = vst.msk [vmem:[#allocation0 + $0x580] ss:$8 sm:$0xf0] %vm3_vm0, %v1985_v17  }
 0x1df   :  { %800 = vst.msk [vmem:[#allocation0 + $0x583] ss:$8 sm:$0xf] %vm3_vm0, %v797_v2  }
 0x1e0   :  { %802 = vst.msk [vmem:[#allocation0 + $0x583] ss:$8 sm:$0xf0] %vm3_vm0, %v797_v2  }
 0x1e1   :  { %150 = vst.msk [vmem:[#allocation0 + $0x540] ss:$8 sm:$0xf] %vm3_vm0, %v1984_v18  }
 0x1e2   :  { %v1677_v19 = vld [vmem:[#allocation0 + $0x480] sm:$0xf]  ;;  %v1683_v20 = vld [vmem:[#allocation0 + $0x488] sm:$0xf]  ;;  %v1689_v21 = vld [vmem:[#allocation0 + $0x490] sm:$0xf] }
 0x1e3   :  { %2199 = vst [vmem:[%s3383_s1 + $0x240] sm:$0xf] %v1677_v19  ;;  %v1695_v22 = vld [vmem:[#allocation0 + $0x498] sm:$0xf]  ;;  %v1701_v23 = vld [vmem:[#allocation0 + $0x4a0] sm:$0xf] }
 0x1e4   :  { %2200 = vst [vmem:[%s3383_s1 + $0x244] sm:$0xf] %v1683_v20  ;;  %v1707_v24 = vld [vmem:[#allocation0 + $0x4a8] sm:$0xf]  ;;  %v1713_v25 = vld [vmem:[#allocation0 + $0x4b0] sm:$0xf] }
 0x1e5   :  { %2201 = vst [vmem:[%s3383_s1 + $0x248] sm:$0xf] %v1689_v21  ;;  %v1719_v26 = vld [vmem:[#allocation0 + $0x4b8] sm:$0xf] }
 0x1e6   :  { %2202 = vst [vmem:[%s3383_s1 + $0x24c] sm:$0xf] %v1695_v22  ;;  %v1869_v27 = vld [vmem:[#allocation0 + $0x580] sm:$0xf]  ;;  %v1875_v28 = vld [vmem:[#allocation0 + $0x588] sm:$0xf] }
 0x1e7   :  { %2203 = vst [vmem:[%s3383_s1 + $0x250] sm:$0xf] %v1701_v23  ;;  %v1881_v29 = vld [vmem:[#allocation0 + $0x590] sm:$0xf]  ;;  %v1887_v30 = vld [vmem:[#allocation0 + $0x598] sm:$0xf] }
 0x1e8   :  { %2204 = vst [vmem:[%s3383_s1 + $0x254] sm:$0xf] %v1707_v24  ;;  %v1893_v31 = vld [vmem:[#allocation0 + $0x5a0] sm:$0xf]  ;;  %v1899_v32 = vld [vmem:[#allocation0 + $0x5a8] sm:$0xf] }
 0x1e9   :  { %2205 = vst [vmem:[%s3383_s1 + $0x258] sm:$0xf] %v1713_v25  ;;  %v1905_v33 = vld [vmem:[#allocation0 + $0x5b0] sm:$0xf]  ;;  %v1911_v34 = vld [vmem:[#allocation0 + $0x5b8] sm:$0xf] }
 0x1ea   :  { %2206 = vst [vmem:[%s3383_s1 + $0x25c] sm:$0xf] %v1719_v26 }
 0x1eb   :  { %2231 = vst [vmem:[%s3383_s1 + $0x2c0] sm:$0xf] %v1869_v27 }
 0x1ec   :  { %2232 = vst [vmem:[%s3383_s1 + $0x2c4] sm:$0xf] %v1875_v28 }
 0x1ed   :  { %2233 = vst [vmem:[%s3383_s1 + $0x2c8] sm:$0xf] %v1881_v29 }
 0x1ee   :  { %2234 = vst [vmem:[%s3383_s1 + $0x2cc] sm:$0xf] %v1887_v30 }
 0x1ef   :  { %2235 = vst [vmem:[%s3383_s1 + $0x2d0] sm:$0xf] %v1893_v31 }
 0x1f0   :  { %2236 = vst [vmem:[%s3383_s1 + $0x2d4] sm:$0xf] %v1899_v32 }
 0x1f1   :  { %2237 = vst [vmem:[%s3383_s1 + $0x2d8] sm:$0xf] %v1905_v33 }
 0x1f2   :  { %2238 = vst [vmem:[%s3383_s1 + $0x2dc] sm:$0xf] %v1911_v34 }
 0x1f3   :  { %152 = vst.msk [vmem:[#allocation0 + $0x540] ss:$8 sm:$0xf0] %vm3_vm0, %v1984_v18  }
 0x1f4   :  { %791 = vst.msk [vmem:[#allocation0 + $0x543] ss:$8 sm:$0xf] %vm3_vm0, %v3239_v3  }
 0x1f5   :  { %793 = vst.msk [vmem:[#allocation0 + $0x543] ss:$8 sm:$0xf0] %vm3_vm0, %v3239_v3  }
 0x1fb   :  { %v1821_v35 = vld [vmem:[#allocation0 + $0x540] sm:$0xf]  ;;  %v1827_v36 = vld [vmem:[#allocation0 + $0x548] sm:$0xf]  ;;  %v1833_v37 = vld [vmem:[#allocation0 + $0x550] sm:$0xf] }
 0x1fc   :  { %2223 = vst [vmem:[%s3383_s1 + $0x2a0] sm:$0xf] %v1821_v35  ;;  %v1839_v38 = vld [vmem:[#allocation0 + $0x558] sm:$0xf]  ;;  %v1845_v39 = vld [vmem:[#allocation0 + $0x560] sm:$0xf] }
 0x1fd   :  { %2224 = vst [vmem:[%s3383_s1 + $0x2a4] sm:$0xf] %v1827_v36  ;;  %v1851_v40 = vld [vmem:[#allocation0 + $0x568] sm:$0xf]  ;;  %v1857_v41 = vld [vmem:[#allocation0 + $0x570] sm:$0xf] }
 0x1fe   :  { %2225 = vst [vmem:[%s3383_s1 + $0x2a8] sm:$0xf] %v1833_v37  ;;  %v1863_v42 = vld [vmem:[#allocation0 + $0x578] sm:$0xf] }
 0x1ff   :  { %2226 = vst [vmem:[%s3383_s1 + $0x2ac] sm:$0xf] %v1839_v38 }
 0x200   :  { %2227 = vst [vmem:[%s3383_s1 + $0x2b0] sm:$0xf] %v1845_v39 }
 0x201   :  { %2228 = vst [vmem:[%s3383_s1 + $0x2b4] sm:$0xf] %v1851_v40 }
 0x202   :  { %2229 = vst [vmem:[%s3383_s1 + $0x2b8] sm:$0xf] %v1857_v41 }
 0x203   :  { %2230 = vst [vmem:[%s3383_s1 + $0x2bc] sm:$0xf] %v1863_v42 }

// kernel: squeeze.13
= control target key start
LH: loop header
LB: loop body
LE: loop exit
PB: predicated region body
PF: predicated region fallthrough
CT: control target
= control target key end

     0   :  { %s1772_s10 = smov 96   ;;  %vm3_vm0 = vcmask 261120   ;;  %s2607_s0 = inlined_call_operand.vmem [shape: f32[1,3,64,64], index: 0, kind: input, shape index: {}]   ;;  %s2608_s1 = inlined_call_operand.vmem [shape: f32[3,2,32,2,32], index: 1, kind: output, shape index: {}]  }
   0x1   :  { %v1558_v0 = vld [vmem:[%s2607_s0 + $0x10] sm:$0xff]   ;;  %v167_v1 = vld [vmem:[%s2607_s0] sm:$0xff]   ;;  %v1559_v3 = vld [vmem:[%s2607_s0 + $0x18] sm:$0xff]  }
   0x2   :  { %186 = vrot.lane.b32.xlu1 %v1558_v0, %s1772_s10  ;;  %168 = vrot.lane.b32.xlu0 %v167_v1, %s1772_s10  ;;  %v1560_v2 = vld [vmem:[%s2607_s0 + $0x20] sm:$0xff]   ;;  %v1557_v4 = vld [vmem:[%s2607_s0 + $0x8] sm:$0xff]   ;;  %17 = vst.msk [vmem:[#allocation0 + $0x80] ss:$8 sm:$0xf] %vm3_vm0, %v1558_v0  }
   0x3   :  { %204 = vrot.lane.b32.xlu2 %v1560_v2, %s1772_s10  ;;  %v1561_v5 = vld [vmem:[%s2607_s0 + $0x28] sm:$0xff]   ;;  %v1563_v6 = vld [vmem:[%s2607_s0 + $0x38] sm:$0xff]   ;;  %v1562_v7 = vld [vmem:[%s2607_s0 + $0x30] sm:$0xff]   ;;  %31 = vst.msk [vmem:[#allocation0 + $0x100] ss:$8 sm:$0xf] %vm3_vm0, %v1560_v2  }
   0x4   :  { %v1564_v8 = vld [vmem:[%s2607_s0 + $0x40] sm:$0xff]   ;;  %v1566_v9 = vld [vmem:[%s2607_s0 + $0x50] sm:$0xff]   ;;  %v1565_v10 = vld [vmem:[%s2607_s0 + $0x48] sm:$0xff]   ;;  %33 = vst.msk [vmem:[#allocation0 + $0x100] ss:$8 sm:$0xf0] %vm3_vm0, %v1560_v2  }
   0x5   :  { %v1567_v11 = vld [vmem:[%s2607_s0 + $0x58] sm:$0xff]   ;;  %v1569_v12 = vld [vmem:[%s2607_s0 + $0x68] sm:$0xff]   ;;  %v1568_v13 = vld [vmem:[%s2607_s0 + $0x60] sm:$0xff]   ;;  %19 = vst.msk [vmem:[#allocation0 + $0x80] ss:$8 sm:$0xf0] %vm3_vm0, %v1558_v0  }
   0x6   :  { %v1570_v14 = vld [vmem:[%s2607_s0 + $0x70] sm:$0xff]   ;;  %v1572_v15 = vld [vmem:[%s2607_s0 + $0x80] sm:$0xff]   ;;  %v1571_v16 = vld [vmem:[%s2607_s0 + $0x78] sm:$0xff]   ;;  %4 = vst.msk [vmem:[#allocation0] ss:$8 sm:$0xf] %vm3_vm0, %v167_v1  }
   0x7   :  { %v1573_v17 = vld [vmem:[%s2607_s0 + $0x88] sm:$0xff]   ;;  %v1858_v18 = vld [vmem:[%s2607_s0 + $0x98] sm:$0xff]   ;;  %v1863_v19 = vld [vmem:[%s2607_s0 + $0x90] sm:$0xff]   ;;  %5 = vst.msk [vmem:[#allocation0] ss:$8 sm:$0xf0] %vm3_vm0, %v167_v1  }
   0x8   :  { %v1868_v20 = vld [vmem:[%s2607_s0 + $0xa0] sm:$0xff]   ;;  %v1879_v21 = vld [vmem:[%s2607_s0 + $0xb0] sm:$0xff]   ;;  %v1577_v22 = vld [vmem:[%s2607_s0 + $0xa8] sm:$0xff]   ;;  %38 = vst.msk [vmem:[#allocation0 + $0x140] ss:$8 sm:$0xf] %vm3_vm0, %v1561_v5  }
   0x9   :  { %v1887_v23 = vld [vmem:[%s2607_s0 + $0xb8] sm:$0xff]   ;;  %40 = vst.msk [vmem:[#allocation0 + $0x140] ss:$8 sm:$0xf0] %vm3_vm0, %v1561_v5  }
   0xa   :  { %195 = vrot.lane.b32.xlu1 %v1559_v3, %s1772_s10  ;;  %177 = vrot.lane.b32.xlu0 %v1557_v4, %s1772_s10  ;;  %24 = vst.msk [vmem:[#allocation0 + $0xc0] ss:$8 sm:$0xf] %vm3_vm0, %v1559_v3  }
   0xb   :  { %213 = vrot.lane.b32.xlu2 %v1561_v5, %s1772_s10  ;;  %26 = vst.msk [vmem:[#allocation0 + $0xc0] ss:$8 sm:$0xf0] %vm3_vm0, %v1559_v3  }
   0xc   :  { %10 = vst.msk [vmem:[#allocation0 + $0x40] ss:$8 sm:$0xf] %vm3_vm0, %v1557_v4  }
   0xd   :  { %12 = vst.msk [vmem:[#allocation0 + $0x40] ss:$8 sm:$0xf0] %vm3_vm0, %v1557_v4  }
   0xe   :  { %59 = vst.msk [vmem:[#allocation0 + $0x200] ss:$8 sm:$0xf] %vm3_vm0, %v1564_v8  }
   0xf   :  { %61 = vst.msk [vmem:[#allocation0 + $0x200] ss:$8 sm:$0xf0] %vm3_vm0, %v1564_v8  }
  0x10   :  { %52 = vst.msk [vmem:[#allocation0 + $0x1c0] ss:$8 sm:$0xf] %vm3_vm0, %v1563_v6  }
  0x11   :  { %54 = vst.msk [vmem:[#allocation0 + $0x1c0] ss:$8 sm:$0xf0] %vm3_vm0, %v1563_v6  }
  0x12   :  { %231 = vrot.lane.b32.xlu1 %v1563_v6, %s1772_s10  ;;  %222 = vrot.lane.b32.xlu0 %v1562_v7, %s1772_s10  ;;  %45 = vst.msk [vmem:[#allocation0 + $0x180] ss:$8 sm:$0xf] %vm3_vm0, %v1562_v7  }
  0x13   :  { %240 = vrot.lane.b32.xlu2 %v1564_v8, %s1772_s10  ;;  %47 = vst.msk [vmem:[#allocation0 + $0x180] ss:$8 sm:$0xf0] %vm3_vm0, %v1562_v7  }
  0x14   :  { %80 = vst.msk [vmem:[#allocation0 + $0x2c0] ss:$8 sm:$0xf] %vm3_vm0, %v1567_v11  }
  0x15   :  { %82 = vst.msk [vmem:[#allocation0 + $0x2c0] ss:$8 sm:$0xf0] %vm3_vm0, %v1567_v11  }
  0x16   :  { %73 = vst.msk [vmem:[#allocation0 + $0x280] ss:$8 sm:$0xf] %vm3_vm0, %v1566_v9  }
  0x17   :  { %75 = vst.msk [vmem:[#allocation0 + $0x280] ss:$8 sm:$0xf0] %vm3_vm0, %v1566_v9  }
  0x18   :  { %66 = vst.msk [vmem:[#allocation0 + $0x240] ss:$8 sm:$0xf] %vm3_vm0, %v1565_v10  }
  0x19   :  { %68 = vst.msk [vmem:[#allocation0 + $0x240] ss:$8 sm:$0xf0] %vm3_vm0, %v1565_v10  }
  0x1a   :  { %258 = vrot.lane.b32.xlu1 %v1566_v9, %s1772_s10  ;;  %249 = vrot.lane.b32.xlu0 %v1565_v10, %s1772_s10  ;;  %101 = vst.msk [vmem:[#allocation0 + $0x380] ss:$8 sm:$0xf] %vm3_vm0, %v1570_v14  }
  0x1b   :  { %267 = vrot.lane.b32.xlu2 %v1567_v11, %s1772_s10  ;;  %103 = vst.msk [vmem:[#allocation0 + $0x380] ss:$8 sm:$0xf0] %vm3_vm0, %v1570_v14  }
  0x1c   :  { %94 = vst.msk [vmem:[#allocation0 + $0x340] ss:$8 sm:$0xf] %vm3_vm0, %v1569_v12  }
  0x1d   :  { %96 = vst.msk [vmem:[#allocation0 + $0x340] ss:$8 sm:$0xf0] %vm3_vm0, %v1569_v12  }
  0x1e   :  { %87 = vst.msk [vmem:[#allocation0 + $0x300] ss:$8 sm:$0xf] %vm3_vm0, %v1568_v13  }
  0x1f   :  { %89 = vst.msk [vmem:[#allocation0 + $0x300] ss:$8 sm:$0xf0] %vm3_vm0, %v1568_v13  }
  0x20   :  { %122 = vst.msk [vmem:[#allocation0 + $0x440] ss:$8 sm:$0xf] %vm3_vm0, %v1573_v17  }
  0x21   :  { %124 = vst.msk [vmem:[#allocation0 + $0x440] ss:$8 sm:$0xf0] %vm3_vm0, %v1573_v17  }
  0x22   :  { %285 = vrot.lane.b32.xlu1 %v1569_v12, %s1772_s10  ;;  %276 = vrot.lane.b32.xlu0 %v1568_v13, %s1772_s10  ;;  %115 = vst.msk [vmem:[#allocation0 + $0x400] ss:$8 sm:$0xf] %vm3_vm0, %v1572_v15  }
  0x23   :  { %294 = vrot.lane.b32.xlu2 %v1570_v14, %s1772_s10  ;;  %117 = vst.msk [vmem:[#allocation0 + $0x400] ss:$8 sm:$0xf0] %vm3_vm0, %v1572_v15  }
  0x24   :  { %108 = vst.msk [vmem:[#allocation0 + $0x3c0] ss:$8 sm:$0xf] %vm3_vm0, %v1571_v16  }
  0x25   :  { %110 = vst.msk [vmem:[#allocation0 + $0x3c0] ss:$8 sm:$0xf0] %vm3_vm0, %v1571_v16  }
  0x26   :  { %143 = vst.msk [vmem:[#allocation0 + $0x500] ss:$8 sm:$0xf] %vm3_vm0, %v1868_v20  }
  0x27   :  { %145 = vst.msk [vmem:[#allocation0 + $0x500] ss:$8 sm:$0xf0] %vm3_vm0, %v1868_v20  }
  0x28   :  { %136 = vst.msk [vmem:[#allocation0 + $0x4c0] ss:$8 sm:$0xf] %vm3_vm0, %v1858_v18  }
  0x29   :  { %138 = vst.msk [vmem:[#allocation0 + $0x4c0] ss:$8 sm:$0xf0] %vm3_vm0, %v1858_v18  }
  0x2a   :  { %312 = vrot.lane.b32.xlu1 %v1572_v15, %s1772_s10  ;;  %303 = vrot.lane.b32.xlu0 %v1571_v16, %s1772_s10  ;;  %129 = vst.msk [vmem:[#allocation0 + $0x480] ss:$8 sm:$0xf] %vm3_vm0, %v1863_v19  }
  0x2b   :  { %321 = vrot.lane.b32.xlu2 %v1573_v17, %s1772_s10  ;;  %131 = vst.msk [vmem:[#allocation0 + $0x480] ss:$8 sm:$0xf0] %vm3_vm0, %v1863_v19  }
  0x2c   :  { %164 = vst.msk [vmem:[#allocation0 + $0x5c0] ss:$8 sm:$0xf] %vm3_vm0, %v1887_v23  }
  0x2d   :  { %166 = vst.msk [vmem:[#allocation0 + $0x5c0] ss:$8 sm:$0xf0] %vm3_vm0, %v1887_v23  }
  0x2e   :  { %157 = vst.msk [vmem:[#allocation0 + $0x580] ss:$8 sm:$0xf] %vm3_vm0, %v1879_v21  }
  0x2f   :  { %159 = vst.msk [vmem:[#allocation0 + $0x580] ss:$8 sm:$0xf0] %vm3_vm0, %v1879_v21  }
  0x32   :  { %339 = vrot.lane.b32.xlu1 %v1858_v18, %s1772_s10  ;;  %330 = vrot.lane.b32.xlu0 %v1863_v19, %s1772_s10 }
  0x33   :  { %348 = vrot.lane.b32.xlu2 %v1868_v20, %s1772_s10 }
  0x3a   :  { %366 = vrot.lane.b32.xlu1 %v1879_v21, %s1772_s10  ;;  %357 = vrot.lane.b32.xlu0 %v1577_v22, %s1772_s10  ;;  %v1554_v21 = vld [vmem:[%s2607_s0 + $0xa8] sm:$0xff]  }
  0x3b   :  { %375 = vrot.lane.b32.xlu2 %v1887_v23, %s1772_s10  ;;  %150 = vst.msk [vmem:[#allocation0 + $0x540] ss:$8 sm:$0xf] %vm3_vm0, %v1554_v21  }
  0x3c   :  { %152 = vst.msk [vmem:[#allocation0 + $0x540] ss:$8 sm:$0xf0] %vm3_vm0, %v1554_v21  }
  0x5d   :  { %v205_v24 = vpop.permute.xlu2 %204  }
  0x5e   :  { %208 = vst.msk [vmem:[#allocation0 + $0x101] ss:$8 sm:$0xf] %vm3_vm0, %v205_v24  }
  0x5f   :  { %210 = vst.msk [vmem:[#allocation0 + $0x101] ss:$8 sm:$0xf0] %vm3_vm0, %v205_v24  }
  0x65   :  { %v575_v25 = vld [vmem:[#allocation0 + $0x100] sm:$0x3]  ;;  %v581_v26 = vld [vmem:[#allocation0 + $0x108] sm:$0x3]  ;;  %v587_v27 = vld [vmem:[#allocation0 + $0x110] sm:$0x3]  ;;  %v214_v33 = vpop.permute.xlu2 %213  }
  0x66   :  { %1611 = vst [vmem:[%s2608_s1 + $0x40] sm:$0x3] %v575_v25  ;;  %v593_v28 = vld [vmem:[#allocation0 + $0x118] sm:$0x3]  ;;  %v599_v29 = vld [vmem:[#allocation0 + $0x120] sm:$0x3] }
  0x67   :  { %1612 = vst [vmem:[%s2608_s1 + $0x42] sm:$0x3] %v581_v26  ;;  %v605_v30 = vld [vmem:[#allocation0 + $0x128] sm:$0x3]  ;;  %v611_v31 = vld [vmem:[#allocation0 + $0x130] sm:$0x3] }
  0x68   :  { %1613 = vst [vmem:[%s2608_s1 + $0x44] sm:$0x3] %v587_v27  ;;  %v617_v32 = vld [vmem:[#allocation0 + $0x138] sm:$0x3] }
  0x69   :  { %1614 = vst [vmem:[%s2608_s1 + $0x46] sm:$0x3] %v593_v28 }
  0x6a   :  { %1615 = vst [vmem:[%s2608_s1 + $0x48] sm:$0x3] %v599_v29 }
  0x6b   :  { %1616 = vst [vmem:[%s2608_s1 + $0x4a] sm:$0x3] %v605_v30 }
  0x6c   :  { %1617 = vst [vmem:[%s2608_s1 + $0x4c] sm:$0x3] %v611_v31 }
  0x6d   :  { %1618 = vst [vmem:[%s2608_s1 + $0x4e] sm:$0x3] %v617_v32  ;;  %v241_v56 = vpop.permute.xlu2 %240  }
  0x6e   :  { %217 = vst.msk [vmem:[#allocation0 + $0x141] ss:$8 sm:$0xf] %vm3_vm0, %v214_v33  }
  0x6f   :  { %219 = vst.msk [vmem:[#allocation0 + $0x141] ss:$8 sm:$0xf0] %vm3_vm0, %v214_v33  }
  0x70   :  { %244 = vst.msk [vmem:[#allocation0 + $0x201] ss:$8 sm:$0xf] %vm3_vm0, %v241_v56  }
  0x71   :  { %246 = vst.msk [vmem:[#allocation0 + $0x201] ss:$8 sm:$0xf0] %vm3_vm0, %v241_v56  }
  0x74   :  { %v187_v34 = vpop.permute.xlu1 %186   ;;  %v169_v35 = vpop.permute.xlu0 %168  }
  0x75   :  { %190 = vst.msk [vmem:[#allocation0 + $0x81] ss:$8 sm:$0xf] %vm3_vm0, %v187_v34   ;;  %v623_v36 = vld [vmem:[#allocation0 + $0x140] sm:$0x3]  ;;  %v268_v16 = vpop.permute.xlu2 %267  }
  0x76   :  { %192 = vst.msk [vmem:[#allocation0 + $0x81] ss:$8 sm:$0xf0] %vm3_vm0, %v187_v34   ;;  %v629_v37 = vld [vmem:[#allocation0 + $0x148] sm:$0x3] }
  0x77   :  { %172 = vst.msk [vmem:[#allocation0 + $0x1] ss:$8 sm:$0xf] %vm3_vm0, %v169_v35   ;;  %v635_v38 = vld [vmem:[#allocation0 + $0x150] sm:$0x3] }
  0x78   :  { %174 = vst.msk [vmem:[#allocation0 + $0x1] ss:$8 sm:$0xf0] %vm3_vm0, %v169_v35   ;;  %v641_v59 = vld [vmem:[#allocation0 + $0x158] sm:$0x3] }
  0x79   :  { %1619 = vst [vmem:[%s2608_s1 + $0x50] sm:$0x3] %v623_v36  ;;  %v647_v60 = vld [vmem:[#allocation0 + $0x160] sm:$0x3]  ;;  %v653_v61 = vld [vmem:[#allocation0 + $0x168] sm:$0x3] }
  0x7a   :  { %1620 = vst [vmem:[%s2608_s1 + $0x52] sm:$0x3] %v629_v37  ;;  %v659_v62 = vld [vmem:[#allocation0 + $0x170] sm:$0x3]  ;;  %v665_v63 = vld [vmem:[#allocation0 + $0x178] sm:$0x3] }
  0x7b   :  { %1621 = vst [vmem:[%s2608_s1 + $0x54] sm:$0x3] %v635_v38  ;;  %v767_v18 = vld [vmem:[#allocation0 + $0x200] sm:$0x3]  ;;  %v773_v20 = vld [vmem:[#allocation0 + $0x208] sm:$0x3] }
  0x7c   :  { %v479_v39 = vld [vmem:[#allocation0 + $0x80] sm:$0x3]  ;;  %v485_v40 = vld [vmem:[#allocation0 + $0x88] sm:$0x3]  ;;  %v491_v41 = vld [vmem:[#allocation0 + $0x90] sm:$0x3]  ;;  %v196_v42 = vpop.permute.xlu1 %195   ;;  %v178_v43 = vpop.permute.xlu0 %177  }
  0x7d   :  { %1595 = vst [vmem:[%s2608_s1 + $0x20] sm:$0x3] %v479_v39  ;;  %v497_v44 = vld [vmem:[#allocation0 + $0x98] sm:$0x3]  ;;  %v503_v45 = vld [vmem:[#allocation0 + $0xa0] sm:$0x3] }
  0x7e   :  { %1596 = vst [vmem:[%s2608_s1 + $0x22] sm:$0x3] %v485_v40  ;;  %v509_v46 = vld [vmem:[#allocation0 + $0xa8] sm:$0x3]  ;;  %v515_v47 = vld [vmem:[#allocation0 + $0xb0] sm:$0x3] }
  0x7f   :  { %1597 = vst [vmem:[%s2608_s1 + $0x24] sm:$0x3] %v491_v41  ;;  %v521_v48 = vld [vmem:[#allocation0 + $0xb8] sm:$0x3]  ;;  %v384_v49 = vld [vmem:[#allocation0] sm:$0x3] }
  0x80   :  { %1598 = vst [vmem:[%s2608_s1 + $0x26] sm:$0x3] %v497_v44  ;;  %v389_v50 = vld [vmem:[#allocation0 + $0x8] sm:$0x3]  ;;  %v395_v51 = vld [vmem:[#allocation0 + $0x10] sm:$0x3] }
  0x81   :  { %1599 = vst [vmem:[%s2608_s1 + $0x28] sm:$0x3] %v503_v45  ;;  %v401_v52 = vld [vmem:[#allocation0 + $0x18] sm:$0x3]  ;;  %v407_v53 = vld [vmem:[#allocation0 + $0x20] sm:$0x3] }
  0x82   :  { %1600 = vst [vmem:[%s2608_s1 + $0x2a] sm:$0x3] %v509_v46  ;;  %v413_v54 = vld [vmem:[#allocation0 + $0x28] sm:$0x3]  ;;  %v419_v55 = vld [vmem:[#allocation0 + $0x30] sm:$0x3] }
  0x83   :  { %1601 = vst [vmem:[%s2608_s1 + $0x2c] sm:$0x3] %v515_v47  ;;  %v425_v58 = vld [vmem:[#allocation0 + $0x38] sm:$0x3]  ;;  %v779_v22 = vld [vmem:[#allocation0 + $0x210] sm:$0x3]  ;;  %v295_v47 = vpop.permute.xlu2 %294  }
  0x84   :  { %1602 = vst [vmem:[%s2608_s1 + $0x2e] sm:$0x3] %v521_v48  ;;  %v2017_v57 = vpop.permute.xlu1 %231   ;;  %v2049_v0 = vpop.permute.xlu0 %222   ;;  %v785_v24 = vld [vmem:[#allocation0 + $0x218] sm:$0x3]  ;;  %v791_v25 = vld [vmem:[#allocation0 + $0x220] sm:$0x3] }
  0x85   :  { %387 = vst [vmem:[%s2608_s1] sm:$0x3] %v384_v49  ;;  %v797_v26 = vld [vmem:[#allocation0 + $0x228] sm:$0x3]  ;;  %v803_v27 = vld [vmem:[#allocation0 + $0x230] sm:$0x3] }
  0x86   :  { %1580 = vst [vmem:[%s2608_s1 + $0x2] sm:$0x3] %v389_v50  ;;  %v809_v29 = vld [vmem:[#allocation0 + $0x238] sm:$0x3] }
  0x87   :  { %1581 = vst [vmem:[%s2608_s1 + $0x4] sm:$0x3] %v395_v51 }
  0x88   :  { %1582 = vst [vmem:[%s2608_s1 + $0x6] sm:$0x3] %v401_v52 }
  0x89   :  { %1583 = vst [vmem:[%s2608_s1 + $0x8] sm:$0x3] %v407_v53 }
  0x8a   :  { %1584 = vst [vmem:[%s2608_s1 + $0xa] sm:$0x3] %v413_v54 }
  0x8b   :  { %1585 = vst [vmem:[%s2608_s1 + $0xc] sm:$0x3] %v419_v55 }
  0x8c   :  { %1586 = vst [vmem:[%s2608_s1 + $0xe] sm:$0x3] %v425_v58  ;;  %v259_v28 = vpop.permute.xlu1 %258   ;;  %v250_v34 = vpop.permute.xlu0 %249  }
  0x8d   :  { %1622 = vst [vmem:[%s2608_s1 + $0x56] sm:$0x3] %v641_v59 }
  0x8e   :  { %1623 = vst [vmem:[%s2608_s1 + $0x58] sm:$0x3] %v647_v60 }
  0x8f   :  { %1624 = vst [vmem:[%s2608_s1 + $0x5a] sm:$0x3] %v653_v61 }
  0x90   :  { %1625 = vst [vmem:[%s2608_s1 + $0x5c] sm:$0x3] %v659_v62 }
  0x91   :  { %1626 = vst [vmem:[%s2608_s1 + $0x5e] sm:$0x3] %v665_v63 }
  0x92   :  { %199 = vst.msk [vmem:[#allocation0 + $0xc1] ss:$8 sm:$0xf] %vm3_vm0, %v196_v42  }
  0x93   :  { %201 = vst.msk [vmem:[#allocation0 + $0xc1] ss:$8 sm:$0xf0] %vm3_vm0, %v196_v42  }
  0x94   :  { %181 = vst.msk [vmem:[#allocation0 + $0x41] ss:$8 sm:$0xf] %vm3_vm0, %v178_v43   ;;  %v2185_v48 = vpop.permute.xlu1 %285   ;;  %v2203_v56 = vpop.permute.xlu0 %276  }
  0x95   :  { %183 = vst.msk [vmem:[#allocation0 + $0x41] ss:$8 sm:$0xf0] %vm3_vm0, %v178_v43  }
  0x96   :  { %235 = vst.msk [vmem:[#allocation0 + $0x1c1] ss:$8 sm:$0xf] %vm3_vm0, %v2017_v57  }
  0x97   :  { %1643 = vst [vmem:[%s2608_s1 + $0x80] sm:$0x3] %v767_v18 }
  0x98   :  { %1644 = vst [vmem:[%s2608_s1 + $0x82] sm:$0x3] %v773_v20 }
  0x99   :  { %v527_v1 = vld [vmem:[#allocation0 + $0xc0] sm:$0x3]  ;;  %v533_v2 = vld [vmem:[#allocation0 + $0xc8] sm:$0x3]  ;;  %v539_v3 = vld [vmem:[#allocation0 + $0xd0] sm:$0x3] }
  0x9a   :  { %1603 = vst [vmem:[%s2608_s1 + $0x30] sm:$0x3] %v527_v1  ;;  %v545_v4 = vld [vmem:[#allocation0 + $0xd8] sm:$0x3]  ;;  %v551_v5 = vld [vmem:[#allocation0 + $0xe0] sm:$0x3] }
  0x9b   :  { %1604 = vst [vmem:[%s2608_s1 + $0x32] sm:$0x3] %v533_v2  ;;  %v557_v6 = vld [vmem:[#allocation0 + $0xe8] sm:$0x3]  ;;  %v563_v7 = vld [vmem:[#allocation0 + $0xf0] sm:$0x3] }
  0x9c   :  { %1605 = vst [vmem:[%s2608_s1 + $0x34] sm:$0x3] %v539_v3  ;;  %v569_v8 = vld [vmem:[#allocation0 + $0xf8] sm:$0x3]  ;;  %v431_v9 = vld [vmem:[#allocation0 + $0x40] sm:$0x3] }
  0x9d   :  { %1606 = vst [vmem:[%s2608_s1 + $0x36] sm:$0x3] %v545_v4  ;;  %v437_v10 = vld [vmem:[#allocation0 + $0x48] sm:$0x3]  ;;  %v443_v11 = vld [vmem:[#allocation0 + $0x50] sm:$0x3] }
  0x9e   :  { %1607 = vst [vmem:[%s2608_s1 + $0x38] sm:$0x3] %v551_v5  ;;  %v449_v12 = vld [vmem:[#allocation0 + $0x58] sm:$0x3]  ;;  %v455_v13 = vld [vmem:[#allocation0 + $0x60] sm:$0x3] }
  0x9f   :  { %1608 = vst [vmem:[%s2608_s1 + $0x3a] sm:$0x3] %v557_v6  ;;  %v461_v14 = vld [vmem:[#allocation0 + $0x68] sm:$0x3]  ;;  %v467_v15 = vld [vmem:[#allocation0 + $0x70] sm:$0x3] }
  0xa0   :  { %1609 = vst [vmem:[%s2608_s1 + $0x3c] sm:$0x3] %v563_v7  ;;  %v473_v17 = vld [vmem:[#allocation0 + $0x78] sm:$0x3]  ;;  %v719_v30 = vld [vmem:[#allocation0 + $0x1c0] sm:$0x3] }
  0xa1   :  { %1610 = vst [vmem:[%s2608_s1 + $0x3e] sm:$0x3] %v569_v8  ;;  %v725_v31 = vld [vmem:[#allocation0 + $0x1c8] sm:$0x3]  ;;  %v731_v32 = vld [vmem:[#allocation0 + $0x1d0] sm:$0x3] }
  0xa2   :  { %1587 = vst [vmem:[%s2608_s1 + $0x10] sm:$0x3] %v431_v9  ;;  %v737_v33 = vld [vmem:[#allocation0 + $0x1d8] sm:$0x3] }
  0xa3   :  { %1588 = vst [vmem:[%s2608_s1 + $0x12] sm:$0x3] %v437_v10 }
  0xa4   :  { %1589 = vst [vmem:[%s2608_s1 + $0x14] sm:$0x3] %v443_v11 }
  0xa5   :  { %1590 = vst [vmem:[%s2608_s1 + $0x16] sm:$0x3] %v449_v12 }
  0xa6   :  { %1591 = vst [vmem:[%s2608_s1 + $0x18] sm:$0x3] %v455_v13 }
  0xa7   :  { %1592 = vst [vmem:[%s2608_s1 + $0x1a] sm:$0x3] %v461_v14  ;;  %v322_v14 = vpop.permute.xlu2 %321  }
  0xa8   :  { %1593 = vst [vmem:[%s2608_s1 + $0x1c] sm:$0x3] %v467_v15  ;;  %v313_v15 = vpop.permute.xlu1 %312  }
  0xa9   :  { %1594 = vst [vmem:[%s2608_s1 + $0x1e] sm:$0x3] %v473_v17 }
  0xaa   :  { %1645 = vst [vmem:[%s2608_s1 + $0x84] sm:$0x3] %v779_v22  ;;  %v2294_v22 = vpop.permute.xlu0 %303  }
  0xab   :  { %1646 = vst [vmem:[%s2608_s1 + $0x86] sm:$0x3] %v785_v24 }
  0xac   :  { %1647 = vst [vmem:[%s2608_s1 + $0x88] sm:$0x3] %v791_v25 }
  0xad   :  { %1648 = vst [vmem:[%s2608_s1 + $0x8a] sm:$0x3] %v797_v26 }
  0xae   :  { %1649 = vst [vmem:[%s2608_s1 + $0x8c] sm:$0x3] %v803_v27 }
  0xaf   :  { %1650 = vst [vmem:[%s2608_s1 + $0x8e] sm:$0x3] %v809_v29 }
  0xb0   :  { %237 = vst.msk [vmem:[#allocation0 + $0x1c1] ss:$8 sm:$0xf0] %vm3_vm0, %v2017_v57  }
  0xb1   :  { %1635 = vst [vmem:[%s2608_s1 + $0x70] sm:$0x3] %v719_v30 }
  0xb2   :  { %1636 = vst [vmem:[%s2608_s1 + $0x72] sm:$0x3] %v725_v31 }
  0xb3   :  { %1637 = vst [vmem:[%s2608_s1 + $0x74] sm:$0x3] %v731_v32 }
  0xb4   :  { %1638 = vst [vmem:[%s2608_s1 + $0x76] sm:$0x3] %v737_v33 }
  0xb5   :  { %226 = vst.msk [vmem:[#allocation0 + $0x181] ss:$8 sm:$0xf] %vm3_vm0, %v2049_v0  }
  0xb6   :  { %228 = vst.msk [vmem:[#allocation0 + $0x181] ss:$8 sm:$0xf0] %vm3_vm0, %v2049_v0  }
  0xb7   :  { %v743_v35 = vld [vmem:[#allocation0 + $0x1e0] sm:$0x3]  ;;  %v749_v36 = vld [vmem:[#allocation0 + $0x1e8] sm:$0x3]  ;;  %v755_v37 = vld [vmem:[#allocation0 + $0x1f0] sm:$0x3] }
  0xb8   :  { %1639 = vst [vmem:[%s2608_s1 + $0x78] sm:$0x3] %v743_v35  ;;  %v761_v38 = vld [vmem:[#allocation0 + $0x1f8] sm:$0x3] }
  0xb9   :  { %1640 = vst [vmem:[%s2608_s1 + $0x7a] sm:$0x3] %v749_v36 }
  0xba   :  { %1641 = vst [vmem:[%s2608_s1 + $0x7c] sm:$0x3] %v755_v37 }
  0xbb   :  { %1642 = vst [vmem:[%s2608_s1 + $0x7e] sm:$0x3] %v761_v38  ;;  %v349_v38 = vpop.permute.xlu2 %348  }
  0xbc   :  { %v671_v39 = vld [vmem:[#allocation0 + $0x180] sm:$0x3]  ;;  %v677_v40 = vld [vmem:[#allocation0 + $0x188] sm:$0x3]  ;;  %v683_v41 = vld [vmem:[#allocation0 + $0x190] sm:$0x3] }
  0xbd   :  { %1627 = vst [vmem:[%s2608_s1 + $0x60] sm:$0x3] %v671_v39  ;;  %v689_v42 = vld [vmem:[#allocation0 + $0x198] sm:$0x3]  ;;  %v695_v43 = vld [vmem:[#allocation0 + $0x1a0] sm:$0x3] }
  0xbe   :  { %1628 = vst [vmem:[%s2608_s1 + $0x62] sm:$0x3] %v677_v40  ;;  %v701_v44 = vld [vmem:[#allocation0 + $0x1a8] sm:$0x3]  ;;  %v707_v45 = vld [vmem:[#allocation0 + $0x1b0] sm:$0x3]  ;;  %v2342_v40 = vpop.permute.xlu1 %339  }
  0xbf   :  { %1629 = vst [vmem:[%s2608_s1 + $0x64] sm:$0x3] %v683_v41  ;;  %v713_v46 = vld [vmem:[#allocation0 + $0x1b8] sm:$0x3] }
  0xc0   :  { %1630 = vst [vmem:[%s2608_s1 + $0x66] sm:$0x3] %v689_v42 }
  0xc1   :  { %1631 = vst [vmem:[%s2608_s1 + $0x68] sm:$0x3] %v695_v43 }
  0xc2   :  { %1632 = vst [vmem:[%s2608_s1 + $0x6a] sm:$0x3] %v701_v44 }
  0xc3   :  { %1633 = vst [vmem:[%s2608_s1 + $0x6c] sm:$0x3] %v707_v45 }
  0xc4   :  { %1634 = vst [vmem:[%s2608_s1 + $0x6e] sm:$0x3] %v713_v46 }
  0xc5   :  { %271 = vst.msk [vmem:[#allocation0 + $0x2c1] ss:$8 sm:$0xf] %vm3_vm0, %v268_v16  }
  0xc6   :  { %273 = vst.msk [vmem:[#allocation0 + $0x2c1] ss:$8 sm:$0xf0] %vm3_vm0, %v268_v16  }
  0xc7   :  { %262 = vst.msk [vmem:[#allocation0 + $0x281] ss:$8 sm:$0xf] %vm3_vm0, %v259_v28  }
  0xc8   :  { %264 = vst.msk [vmem:[#allocation0 + $0x281] ss:$8 sm:$0xf0] %vm3_vm0, %v259_v28  }
  0xc9   :  { %253 = vst.msk [vmem:[#allocation0 + $0x241] ss:$8 sm:$0xf] %vm3_vm0, %v250_v34  }
  0xca   :  { %255 = vst.msk [vmem:[#allocation0 + $0x241] ss:$8 sm:$0xf0] %vm3_vm0, %v250_v34  }
  0xcb   :  { %298 = vst.msk [vmem:[#allocation0 + $0x381] ss:$8 sm:$0xf] %vm3_vm0, %v295_v47  }
  0xcc   :  { %v911_v49 = vld [vmem:[#allocation0 + $0x2c0] sm:$0x3]  ;;  %v917_v50 = vld [vmem:[#allocation0 + $0x2c8] sm:$0x3]  ;;  %v923_v51 = vld [vmem:[#allocation0 + $0x2d0] sm:$0x3] }
  0xcd   :  { %1667 = vst [vmem:[%s2608_s1 + $0xb0] sm:$0x3] %v911_v49  ;;  %v929_v52 = vld [vmem:[#allocation0 + $0x2d8] sm:$0x3]  ;;  %v935_v53 = vld [vmem:[#allocation0 + $0x2e0] sm:$0x3] }
  0xce   :  { %1668 = vst [vmem:[%s2608_s1 + $0xb2] sm:$0x3] %v917_v50  ;;  %v941_v54 = vld [vmem:[#allocation0 + $0x2e8] sm:$0x3]  ;;  %v947_v55 = vld [vmem:[#allocation0 + $0x2f0] sm:$0x3] }
  0xcf   :  { %1669 = vst [vmem:[%s2608_s1 + $0xb4] sm:$0x3] %v923_v51  ;;  %v953_v57 = vld [vmem:[#allocation0 + $0x2f8] sm:$0x3]  ;;  %v863_v58 = vld [vmem:[#allocation0 + $0x280] sm:$0x3] }
  0xd0   :  { %1670 = vst [vmem:[%s2608_s1 + $0xb6] sm:$0x3] %v929_v52  ;;  %v869_v59 = vld [vmem:[#allocation0 + $0x288] sm:$0x3]  ;;  %v875_v60 = vld [vmem:[#allocation0 + $0x290] sm:$0x3] }
  0xd1   :  { %1671 = vst [vmem:[%s2608_s1 + $0xb8] sm:$0x3] %v935_v53  ;;  %v881_v61 = vld [vmem:[#allocation0 + $0x298] sm:$0x3]  ;;  %v887_v62 = vld [vmem:[#allocation0 + $0x2a0] sm:$0x3] }
  0xd2   :  { %1672 = vst [vmem:[%s2608_s1 + $0xba] sm:$0x3] %v941_v54  ;;  %v893_v63 = vld [vmem:[#allocation0 + $0x2a8] sm:$0x3]  ;;  %v899_v0 = vld [vmem:[#allocation0 + $0x2b0] sm:$0x3] }
  0xd3   :  { %1673 = vst [vmem:[%s2608_s1 + $0xbc] sm:$0x3] %v947_v55  ;;  %v905_v1 = vld [vmem:[#allocation0 + $0x2b8] sm:$0x3]  ;;  %v815_v2 = vld [vmem:[#allocation0 + $0x240] sm:$0x3] }
  0xd4   :  { %1674 = vst [vmem:[%s2608_s1 + $0xbe] sm:$0x3] %v953_v57  ;;  %v821_v3 = vld [vmem:[#allocation0 + $0x248] sm:$0x3]  ;;  %v827_v4 = vld [vmem:[#allocation0 + $0x250] sm:$0x3]  ;;  %v331_v57 = vpop.permute.xlu0 %330  }
  0xd5   :  { %1659 = vst [vmem:[%s2608_s1 + $0xa0] sm:$0x3] %v863_v58  ;;  %v833_v5 = vld [vmem:[#allocation0 + $0x258] sm:$0x3]  ;;  %v839_v6 = vld [vmem:[#allocation0 + $0x260] sm:$0x3] }
  0xd6   :  { %1660 = vst [vmem:[%s2608_s1 + $0xa2] sm:$0x3] %v869_v59  ;;  %v845_v7 = vld [vmem:[#allocation0 + $0x268] sm:$0x3]  ;;  %v851_v8 = vld [vmem:[#allocation0 + $0x270] sm:$0x3] }
  0xd7   :  { %1661 = vst [vmem:[%s2608_s1 + $0xa4] sm:$0x3] %v875_v60  ;;  %v857_v9 = vld [vmem:[#allocation0 + $0x278] sm:$0x3]  ;;  %v1055_v10 = vld [vmem:[#allocation0 + $0x380] sm:$0x3] }
  0xd8   :  { %1662 = vst [vmem:[%s2608_s1 + $0xa6] sm:$0x3] %v881_v61  ;;  %v1061_v11 = vld [vmem:[#allocation0 + $0x388] sm:$0x3]  ;;  %v1067_v12 = vld [vmem:[#allocation0 + $0x390] sm:$0x3] }
  0xd9   :  { %1663 = vst [vmem:[%s2608_s1 + $0xa8] sm:$0x3] %v887_v62  ;;  %v1073_v13 = vld [vmem:[#allocation0 + $0x398] sm:$0x3] }
  0xda   :  { %1664 = vst [vmem:[%s2608_s1 + $0xaa] sm:$0x3] %v893_v63 }
  0xdb   :  { %1665 = vst [vmem:[%s2608_s1 + $0xac] sm:$0x3] %v899_v0 }
  0xdc   :  { %1666 = vst [vmem:[%s2608_s1 + $0xae] sm:$0x3] %v905_v1  ;;  %v2468_v19 = vpop.permute.xlu0 %357  }
  0xdd   :  { %1651 = vst [vmem:[%s2608_s1 + $0x90] sm:$0x3] %v815_v2 }
  0xde   :  { %1652 = vst [vmem:[%s2608_s1 + $0x92] sm:$0x3] %v821_v3  ;;  %v376_v3 = vpop.permute.xlu2 %375  }
  0xdf   :  { %1653 = vst [vmem:[%s2608_s1 + $0x94] sm:$0x3] %v827_v4 }
  0xe0   :  { %1654 = vst [vmem:[%s2608_s1 + $0x96] sm:$0x3] %v833_v5 }
  0xe1   :  { %1655 = vst [vmem:[%s2608_s1 + $0x98] sm:$0x3] %v839_v6 }
  0xe2   :  { %1656 = vst [vmem:[%s2608_s1 + $0x9a] sm:$0x3] %v845_v7 }
  0xe3   :  { %1657 = vst [vmem:[%s2608_s1 + $0x9c] sm:$0x3] %v851_v8 }
  0xe4   :  { %1658 = vst [vmem:[%s2608_s1 + $0x9e] sm:$0x3] %v857_v9 }
  0xe5   :  { %300 = vst.msk [vmem:[#allocation0 + $0x381] ss:$8 sm:$0xf0] %vm3_vm0, %v295_v47  }
  0xe6   :  { %1691 = vst [vmem:[%s2608_s1 + $0xe0] sm:$0x3] %v1055_v10 }
  0xe7   :  { %1692 = vst [vmem:[%s2608_s1 + $0xe2] sm:$0x3] %v1061_v11 }
  0xe8   :  { %1693 = vst [vmem:[%s2608_s1 + $0xe4] sm:$0x3] %v1067_v12  ;;  %v367_v12 = vpop.permute.xlu1 %366  }
  0xe9   :  { %1694 = vst [vmem:[%s2608_s1 + $0xe6] sm:$0x3] %v1073_v13 }
  0xea   :  { %289 = vst.msk [vmem:[#allocation0 + $0x341] ss:$8 sm:$0xf] %vm3_vm0, %v2185_v48  }
  0xeb   :  { %291 = vst.msk [vmem:[#allocation0 + $0x341] ss:$8 sm:$0xf0] %vm3_vm0, %v2185_v48  }
  0xec   :  { %v1079_v16 = vld [vmem:[#allocation0 + $0x3a0] sm:$0x3]  ;;  %v1085_v17 = vld [vmem:[#allocation0 + $0x3a8] sm:$0x3]  ;;  %v1091_v18 = vld [vmem:[#allocation0 + $0x3b0] sm:$0x3] }
  0xed   :  { %1695 = vst [vmem:[%s2608_s1 + $0xe8] sm:$0x3] %v1079_v16  ;;  %v1097_v20 = vld [vmem:[#allocation0 + $0x3b8] sm:$0x3] }
  0xee   :  { %1696 = vst [vmem:[%s2608_s1 + $0xea] sm:$0x3] %v1085_v17 }
  0xef   :  { %1697 = vst [vmem:[%s2608_s1 + $0xec] sm:$0x3] %v1091_v18 }
  0xf0   :  { %1698 = vst [vmem:[%s2608_s1 + $0xee] sm:$0x3] %v1097_v20 }
  0xf1   :  { %v1007_v24 = vld [vmem:[#allocation0 + $0x340] sm:$0x3]  ;;  %v1013_v25 = vld [vmem:[#allocation0 + $0x348] sm:$0x3]  ;;  %v1019_v26 = vld [vmem:[#allocation0 + $0x350] sm:$0x3] }
  0xf2   :  { %1683 = vst [vmem:[%s2608_s1 + $0xd0] sm:$0x3] %v1007_v24  ;;  %v1025_v27 = vld [vmem:[#allocation0 + $0x358] sm:$0x3]  ;;  %v1031_v28 = vld [vmem:[#allocation0 + $0x360] sm:$0x3] }
  0xf3   :  { %1684 = vst [vmem:[%s2608_s1 + $0xd2] sm:$0x3] %v1013_v25  ;;  %v1037_v29 = vld [vmem:[#allocation0 + $0x368] sm:$0x3]  ;;  %v1043_v30 = vld [vmem:[#allocation0 + $0x370] sm:$0x3] }
  0xf4   :  { %1685 = vst [vmem:[%s2608_s1 + $0xd4] sm:$0x3] %v1019_v26  ;;  %v1049_v31 = vld [vmem:[#allocation0 + $0x378] sm:$0x3] }
  0xf5   :  { %1686 = vst [vmem:[%s2608_s1 + $0xd6] sm:$0x3] %v1025_v27 }
  0xf6   :  { %1687 = vst [vmem:[%s2608_s1 + $0xd8] sm:$0x3] %v1031_v28 }
  0xf7   :  { %1688 = vst [vmem:[%s2608_s1 + $0xda] sm:$0x3] %v1037_v29 }
  0xf8   :  { %1689 = vst [vmem:[%s2608_s1 + $0xdc] sm:$0x3] %v1043_v30 }
  0xf9   :  { %1690 = vst [vmem:[%s2608_s1 + $0xde] sm:$0x3] %v1049_v31 }
  0xfa   :  { %280 = vst.msk [vmem:[#allocation0 + $0x301] ss:$8 sm:$0xf] %vm3_vm0, %v2203_v56  }
  0xfb   :  { %282 = vst.msk [vmem:[#allocation0 + $0x301] ss:$8 sm:$0xf0] %vm3_vm0, %v2203_v56  }
  0xfc   :  { %325 = vst.msk [vmem:[#allocation0 + $0x441] ss:$8 sm:$0xf] %vm3_vm0, %v322_v14  }
  0xfd   :  { %327 = vst.msk [vmem:[#allocation0 + $0x441] ss:$8 sm:$0xf0] %vm3_vm0, %v322_v14  }
  0xfe   :  { %316 = vst.msk [vmem:[#allocation0 + $0x401] ss:$8 sm:$0xf] %vm3_vm0, %v313_v15  }
  0xff   :  { %318 = vst.msk [vmem:[#allocation0 + $0x401] ss:$8 sm:$0xf0] %vm3_vm0, %v313_v15  }
 0x100   :  { %307 = vst.msk [vmem:[#allocation0 + $0x3c1] ss:$8 sm:$0xf] %vm3_vm0, %v2294_v22  }
 0x101   :  { %v959_v32 = vld [vmem:[#allocation0 + $0x300] sm:$0x3]  ;;  %v965_v33 = vld [vmem:[#allocation0 + $0x308] sm:$0x3]  ;;  %v971_v34 = vld [vmem:[#allocation0 + $0x310] sm:$0x3] }
 0x102   :  { %1675 = vst [vmem:[%s2608_s1 + $0xc0] sm:$0x3] %v959_v32  ;;  %v977_v35 = vld [vmem:[#allocation0 + $0x318] sm:$0x3]  ;;  %v983_v36 = vld [vmem:[#allocation0 + $0x320] sm:$0x3] }
 0x103   :  { %1676 = vst [vmem:[%s2608_s1 + $0xc2] sm:$0x3] %v965_v33  ;;  %v989_v37 = vld [vmem:[#allocation0 + $0x328] sm:$0x3]  ;;  %v995_v39 = vld [vmem:[#allocation0 + $0x330] sm:$0x3] }
 0x104   :  { %1677 = vst [vmem:[%s2608_s1 + $0xc4] sm:$0x3] %v971_v34  ;;  %v1001_v41 = vld [vmem:[#allocation0 + $0x338] sm:$0x3]  ;;  %v1199_v42 = vld [vmem:[#allocation0 + $0x440] sm:$0x3] }
 0x105   :  { %1678 = vst [vmem:[%s2608_s1 + $0xc6] sm:$0x3] %v977_v35  ;;  %v1205_v43 = vld [vmem:[#allocation0 + $0x448] sm:$0x3]  ;;  %v1211_v44 = vld [vmem:[#allocation0 + $0x450] sm:$0x3] }
 0x106   :  { %1679 = vst [vmem:[%s2608_s1 + $0xc8] sm:$0x3] %v983_v36  ;;  %v1217_v45 = vld [vmem:[#allocation0 + $0x458] sm:$0x3]  ;;  %v1223_v46 = vld [vmem:[#allocation0 + $0x460] sm:$0x3] }
 0x107   :  { %1680 = vst [vmem:[%s2608_s1 + $0xca] sm:$0x3] %v989_v37  ;;  %v1229_v47 = vld [vmem:[#allocation0 + $0x468] sm:$0x3]  ;;  %v1235_v48 = vld [vmem:[#allocation0 + $0x470] sm:$0x3] }
 0x108   :  { %1681 = vst [vmem:[%s2608_s1 + $0xcc] sm:$0x3] %v995_v39  ;;  %v1241_v49 = vld [vmem:[#allocation0 + $0x478] sm:$0x3]  ;;  %v1151_v50 = vld [vmem:[#allocation0 + $0x400] sm:$0x3] }
 0x109   :  { %1682 = vst [vmem:[%s2608_s1 + $0xce] sm:$0x3] %v1001_v41  ;;  %v1157_v51 = vld [vmem:[#allocation0 + $0x408] sm:$0x3]  ;;  %v1163_v52 = vld [vmem:[#allocation0 + $0x410] sm:$0x3] }
 0x10a   :  { %1715 = vst [vmem:[%s2608_s1 + $0x110] sm:$0x3] %v1199_v42  ;;  %v1169_v53 = vld [vmem:[#allocation0 + $0x418] sm:$0x3]  ;;  %v1175_v54 = vld [vmem:[#allocation0 + $0x420] sm:$0x3] }
 0x10b   :  { %1716 = vst [vmem:[%s2608_s1 + $0x112] sm:$0x3] %v1205_v43  ;;  %v1181_v55 = vld [vmem:[#allocation0 + $0x428] sm:$0x3]  ;;  %v1187_v56 = vld [vmem:[#allocation0 + $0x430] sm:$0x3] }
 0x10c   :  { %1717 = vst [vmem:[%s2608_s1 + $0x114] sm:$0x3] %v1211_v44  ;;  %v1193_v58 = vld [vmem:[#allocation0 + $0x438] sm:$0x3]  ;;  %v1103_v59 = vld [vmem:[#allocation0 + $0x3c0] sm:$0x3] }
 0x10d   :  { %1718 = vst [vmem:[%s2608_s1 + $0x116] sm:$0x3] %v1217_v45  ;;  %v1109_v60 = vld [vmem:[#allocation0 + $0x3c8] sm:$0x3]  ;;  %v1115_v61 = vld [vmem:[#allocation0 + $0x3d0] sm:$0x3] }
 0x10e   :  { %1719 = vst [vmem:[%s2608_s1 + $0x118] sm:$0x3] %v1223_v46  ;;  %v1121_v62 = vld [vmem:[#allocation0 + $0x3d8] sm:$0x3] }
 0x10f   :  { %1720 = vst [vmem:[%s2608_s1 + $0x11a] sm:$0x3] %v1229_v47 }
 0x110   :  { %1721 = vst [vmem:[%s2608_s1 + $0x11c] sm:$0x3] %v1235_v48 }
 0x111   :  { %1722 = vst [vmem:[%s2608_s1 + $0x11e] sm:$0x3] %v1241_v49 }
 0x112   :  { %1707 = vst [vmem:[%s2608_s1 + $0x100] sm:$0x3] %v1151_v50 }
 0x113   :  { %1708 = vst [vmem:[%s2608_s1 + $0x102] sm:$0x3] %v1157_v51 }
 0x114   :  { %1709 = vst [vmem:[%s2608_s1 + $0x104] sm:$0x3] %v1163_v52 }
 0x115   :  { %1710 = vst [vmem:[%s2608_s1 + $0x106] sm:$0x3] %v1169_v53 }
 0x116   :  { %1711 = vst [vmem:[%s2608_s1 + $0x108] sm:$0x3] %v1175_v54 }
 0x117   :  { %1712 = vst [vmem:[%s2608_s1 + $0x10a] sm:$0x3] %v1181_v55 }
 0x118   :  { %1713 = vst [vmem:[%s2608_s1 + $0x10c] sm:$0x3] %v1187_v56 }
 0x119   :  { %1714 = vst [vmem:[%s2608_s1 + $0x10e] sm:$0x3] %v1193_v58 }
 0x11a   :  { %309 = vst.msk [vmem:[#allocation0 + $0x3c1] ss:$8 sm:$0xf0] %vm3_vm0, %v2294_v22  }
 0x11b   :  { %1699 = vst [vmem:[%s2608_s1 + $0xf0] sm:$0x3] %v1103_v59 }
 0x11c   :  { %1700 = vst [vmem:[%s2608_s1 + $0xf2] sm:$0x3] %v1109_v60 }
 0x11d   :  { %1701 = vst [vmem:[%s2608_s1 + $0xf4] sm:$0x3] %v1115_v61 }
 0x11e   :  { %1702 = vst [vmem:[%s2608_s1 + $0xf6] sm:$0x3] %v1121_v62 }
 0x11f   :  { %352 = vst.msk [vmem:[#allocation0 + $0x501] ss:$8 sm:$0xf] %vm3_vm0, %v349_v38  }
 0x120   :  { %354 = vst.msk [vmem:[#allocation0 + $0x501] ss:$8 sm:$0xf0] %vm3_vm0, %v349_v38  }
 0x121   :  { %v1127_v63 = vld [vmem:[#allocation0 + $0x3e0] sm:$0x3]  ;;  %v1133_v0 = vld [vmem:[#allocation0 + $0x3e8] sm:$0x3]  ;;  %v1139_v1 = vld [vmem:[#allocation0 + $0x3f0] sm:$0x3] }
 0x122   :  { %1703 = vst [vmem:[%s2608_s1 + $0xf8] sm:$0x3] %v1127_v63  ;;  %v1145_v2 = vld [vmem:[#allocation0 + $0x3f8] sm:$0x3] }
 0x123   :  { %1704 = vst [vmem:[%s2608_s1 + $0xfa] sm:$0x3] %v1133_v0 }
 0x124   :  { %1705 = vst [vmem:[%s2608_s1 + $0xfc] sm:$0x3] %v1139_v1 }
 0x125   :  { %1706 = vst [vmem:[%s2608_s1 + $0xfe] sm:$0x3] %v1145_v2 }
 0x126   :  { %v1343_v4 = vld [vmem:[#allocation0 + $0x500] sm:$0x3]  ;;  %v1349_v5 = vld [vmem:[#allocation0 + $0x508] sm:$0x3]  ;;  %v1355_v6 = vld [vmem:[#allocation0 + $0x510] sm:$0x3] }
 0x127   :  { %1739 = vst [vmem:[%s2608_s1 + $0x140] sm:$0x3] %v1343_v4  ;;  %v1361_v7 = vld [vmem:[#allocation0 + $0x518] sm:$0x3]  ;;  %v1367_v8 = vld [vmem:[#allocation0 + $0x520] sm:$0x3] }
 0x128   :  { %1740 = vst [vmem:[%s2608_s1 + $0x142] sm:$0x3] %v1349_v5  ;;  %v1373_v9 = vld [vmem:[#allocation0 + $0x528] sm:$0x3]  ;;  %v1379_v10 = vld [vmem:[#allocation0 + $0x530] sm:$0x3] }
 0x129   :  { %1741 = vst [vmem:[%s2608_s1 + $0x144] sm:$0x3] %v1355_v6  ;;  %v1385_v11 = vld [vmem:[#allocation0 + $0x538] sm:$0x3] }
 0x12a   :  { %1742 = vst [vmem:[%s2608_s1 + $0x146] sm:$0x3] %v1361_v7 }
 0x12b   :  { %1743 = vst [vmem:[%s2608_s1 + $0x148] sm:$0x3] %v1367_v8 }
 0x12c   :  { %1744 = vst [vmem:[%s2608_s1 + $0x14a] sm:$0x3] %v1373_v9 }
 0x12d   :  { %1745 = vst [vmem:[%s2608_s1 + $0x14c] sm:$0x3] %v1379_v10 }
 0x12e   :  { %1746 = vst [vmem:[%s2608_s1 + $0x14e] sm:$0x3] %v1385_v11 }
 0x12f   :  { %343 = vst.msk [vmem:[#allocation0 + $0x4c1] ss:$8 sm:$0xf] %vm3_vm0, %v2342_v40  }
 0x130   :  { %345 = vst.msk [vmem:[#allocation0 + $0x4c1] ss:$8 sm:$0xf0] %vm3_vm0, %v2342_v40  }
 0x131   :  { %334 = vst.msk [vmem:[#allocation0 + $0x481] ss:$8 sm:$0xf] %vm3_vm0, %v331_v57  }
 0x132   :  { %336 = vst.msk [vmem:[#allocation0 + $0x481] ss:$8 sm:$0xf0] %vm3_vm0, %v331_v57  }
 0x133   :  { %379 = vst.msk [vmem:[#allocation0 + $0x5c1] ss:$8 sm:$0xf] %vm3_vm0, %v376_v3  }
 0x134   :  { %381 = vst.msk [vmem:[#allocation0 + $0x5c1] ss:$8 sm:$0xf0] %vm3_vm0, %v376_v3  }
 0x135   :  { %370 = vst.msk [vmem:[#allocation0 + $0x581] ss:$8 sm:$0xf] %vm3_vm0, %v367_v12  }
 0x136   :  { %v1295_v23 = vld [vmem:[#allocation0 + $0x4c0] sm:$0x3]  ;;  %v1301_v13 = vld [vmem:[#allocation0 + $0x4c8] sm:$0x3]  ;;  %v1307_v14 = vld [vmem:[#allocation0 + $0x4d0] sm:$0x3] }
 0x137   :  { %1731 = vst [vmem:[%s2608_s1 + $0x130] sm:$0x3] %v1295_v23  ;;  %v1313_v15 = vld [vmem:[#allocation0 + $0x4d8] sm:$0x3]  ;;  %v1319_v16 = vld [vmem:[#allocation0 + $0x4e0] sm:$0x3] }
 0x138   :  { %1732 = vst [vmem:[%s2608_s1 + $0x132] sm:$0x3] %v1301_v13  ;;  %v1325_v17 = vld [vmem:[#allocation0 + $0x4e8] sm:$0x3]  ;;  %v1331_v18 = vld [vmem:[#allocation0 + $0x4f0] sm:$0x3] }
 0x139   :  { %1733 = vst [vmem:[%s2608_s1 + $0x134] sm:$0x3] %v1307_v14  ;;  %v1337_v20 = vld [vmem:[#allocation0 + $0x4f8] sm:$0x3]  ;;  %v1247_v22 = vld [vmem:[#allocation0 + $0x480] sm:$0x3] }
 0x13a   :  { %1734 = vst [vmem:[%s2608_s1 + $0x136] sm:$0x3] %v1313_v15  ;;  %v1253_v24 = vld [vmem:[#allocation0 + $0x488] sm:$0x3]  ;;  %v1259_v25 = vld [vmem:[#allocation0 + $0x490] sm:$0x3] }
 0x13b   :  { %1735 = vst [vmem:[%s2608_s1 + $0x138] sm:$0x3] %v1319_v16  ;;  %v1265_v26 = vld [vmem:[#allocation0 + $0x498] sm:$0x3]  ;;  %v1271_v27 = vld [vmem:[#allocation0 + $0x4a0] sm:$0x3] }
 0x13c   :  { %1736 = vst [vmem:[%s2608_s1 + $0x13a] sm:$0x3] %v1325_v17  ;;  %v1277_v28 = vld [vmem:[#allocation0 + $0x4a8] sm:$0x3]  ;;  %v1283_v29 = vld [vmem:[#allocation0 + $0x4b0] sm:$0x3] }
 0x13d   :  { %1737 = vst [vmem:[%s2608_s1 + $0x13c] sm:$0x3] %v1331_v18  ;;  %v1289_v30 = vld [vmem:[#allocation0 + $0x4b8] sm:$0x3]  ;;  %v1487_v31 = vld [vmem:[#allocation0 + $0x5c0] sm:$0x3] }
 0x13e   :  { %1738 = vst [vmem:[%s2608_s1 + $0x13e] sm:$0x3] %v1337_v20  ;;  %v1493_v32 = vld [vmem:[#allocation0 + $0x5c8] sm:$0x3]  ;;  %v1499_v33 = vld [vmem:[#allocation0 + $0x5d0] sm:$0x3] }
 0x13f   :  { %1723 = vst [vmem:[%s2608_s1 + $0x120] sm:$0x3] %v1247_v22  ;;  %v1505_v34 = vld [vmem:[#allocation0 + $0x5d8] sm:$0x3]  ;;  %v1511_v35 = vld [vmem:[#allocation0 + $0x5e0] sm:$0x3] }
 0x140   :  { %1724 = vst [vmem:[%s2608_s1 + $0x122] sm:$0x3] %v1253_v24  ;;  %v1517_v36 = vld [vmem:[#allocation0 + $0x5e8] sm:$0x3]  ;;  %v1523_v37 = vld [vmem:[#allocation0 + $0x5f0] sm:$0x3] }
 0x141   :  { %1725 = vst [vmem:[%s2608_s1 + $0x124] sm:$0x3] %v1259_v25  ;;  %v1529_v38 = vld [vmem:[#allocation0 + $0x5f8] sm:$0x3]  ;;  %v1439_v39 = vld [vmem:[#allocation0 + $0x580] sm:$0x3] }
 0x142   :  { %1726 = vst [vmem:[%s2608_s1 + $0x126] sm:$0x3] %v1265_v26  ;;  %v1445_v40 = vld [vmem:[#allocation0 + $0x588] sm:$0x3]  ;;  %v1451_v41 = vld [vmem:[#allocation0 + $0x590] sm:$0x3] }
 0x143   :  { %1727 = vst [vmem:[%s2608_s1 + $0x128] sm:$0x3] %v1271_v27  ;;  %v1457_v42 = vld [vmem:[#allocation0 + $0x598] sm:$0x3] }
 0x144   :  { %1728 = vst [vmem:[%s2608_s1 + $0x12a] sm:$0x3] %v1277_v28 }
 0x145   :  { %1729 = vst [vmem:[%s2608_s1 + $0x12c] sm:$0x3] %v1283_v29 }
 0x146   :  { %1730 = vst [vmem:[%s2608_s1 + $0x12e] sm:$0x3] %v1289_v30 }
 0x147   :  { %372 = vst.msk [vmem:[#allocation0 + $0x581] ss:$8 sm:$0xf0] %vm3_vm0, %v367_v12  }
 0x148   :  { %1763 = vst [vmem:[%s2608_s1 + $0x170] sm:$0x3] %v1487_v31 }
 0x149   :  { %1764 = vst [vmem:[%s2608_s1 + $0x172] sm:$0x3] %v1493_v32 }
 0x14a   :  { %1765 = vst [vmem:[%s2608_s1 + $0x174] sm:$0x3] %v1499_v33 }
 0x14b   :  { %1766 = vst [vmem:[%s2608_s1 + $0x176] sm:$0x3] %v1505_v34 }
 0x14c   :  { %1767 = vst [vmem:[%s2608_s1 + $0x178] sm:$0x3] %v1511_v35 }
 0x14d   :  { %1768 = vst [vmem:[%s2608_s1 + $0x17a] sm:$0x3] %v1517_v36 }
 0x14e   :  { %1769 = vst [vmem:[%s2608_s1 + $0x17c] sm:$0x3] %v1523_v37  ;;  %v1463_v43 = vld [vmem:[#allocation0 + $0x5a0] sm:$0x3]  ;;  %v1469_v44 = vld [vmem:[#allocation0 + $0x5a8] sm:$0x3] }
 0x14f   :  { %1770 = vst [vmem:[%s2608_s1 + $0x17e] sm:$0x3] %v1529_v38  ;;  %v1475_v45 = vld [vmem:[#allocation0 + $0x5b0] sm:$0x3]  ;;  %v1481_v46 = vld [vmem:[#allocation0 + $0x5b8] sm:$0x3] }
 0x150   :  { %1755 = vst [vmem:[%s2608_s1 + $0x160] sm:$0x3] %v1439_v39 }
 0x151   :  { %1756 = vst [vmem:[%s2608_s1 + $0x162] sm:$0x3] %v1445_v40 }
 0x152   :  { %1757 = vst [vmem:[%s2608_s1 + $0x164] sm:$0x3] %v1451_v41 }
 0x153   :  { %1758 = vst [vmem:[%s2608_s1 + $0x166] sm:$0x3] %v1457_v42 }
 0x154   :  { %1759 = vst [vmem:[%s2608_s1 + $0x168] sm:$0x3] %v1463_v43 }
 0x155   :  { %1760 = vst [vmem:[%s2608_s1 + $0x16a] sm:$0x3] %v1469_v44 }
 0x156   :  { %1761 = vst [vmem:[%s2608_s1 + $0x16c] sm:$0x3] %v1475_v45 }
 0x157   :  { %1762 = vst [vmem:[%s2608_s1 + $0x16e] sm:$0x3] %v1481_v46 }
 0x158   :  { %361 = vst.msk [vmem:[#allocation0 + $0x541] ss:$8 sm:$0xf] %vm3_vm0, %v2468_v19  }
 0x159   :  { %363 = vst.msk [vmem:[#allocation0 + $0x541] ss:$8 sm:$0xf0] %vm3_vm0, %v2468_v19  }
 0x15f   :  { %v1391_v47 = vld [vmem:[#allocation0 + $0x540] sm:$0x3]  ;;  %v1397_v48 = vld [vmem:[#allocation0 + $0x548] sm:$0x3]  ;;  %v1403_v49 = vld [vmem:[#allocation0 + $0x550] sm:$0x3] }
 0x160   :  { %1747 = vst [vmem:[%s2608_s1 + $0x150] sm:$0x3] %v1391_v47  ;;  %v1409_v50 = vld [vmem:[#allocation0 + $0x558] sm:$0x3]  ;;  %v1415_v51 = vld [vmem:[#allocation0 + $0x560] sm:$0x3] }
 0x161   :  { %1748 = vst [vmem:[%s2608_s1 + $0x152] sm:$0x3] %v1397_v48  ;;  %v1421_v52 = vld [vmem:[#allocation0 + $0x568] sm:$0x3]  ;;  %v1427_v53 = vld [vmem:[#allocation0 + $0x570] sm:$0x3] }
 0x162   :  { %1749 = vst [vmem:[%s2608_s1 + $0x154] sm:$0x3] %v1403_v49  ;;  %v1433_v54 = vld [vmem:[#allocation0 + $0x578] sm:$0x3] }
 0x163   :  { %1750 = vst [vmem:[%s2608_s1 + $0x156] sm:$0x3] %v1409_v50 }
 0x164   :  { %1751 = vst [vmem:[%s2608_s1 + $0x158] sm:$0x3] %v1415_v51 }
 0x165   :  { %1752 = vst [vmem:[%s2608_s1 + $0x15a] sm:$0x3] %v1421_v52 }
 0x166   :  { %1753 = vst [vmem:[%s2608_s1 + $0x15c] sm:$0x3] %v1427_v53 }
 0x167   :  { %1754 = vst [vmem:[%s2608_s1 + $0x15e] sm:$0x3] %v1433_v54 }

// kernel: efficientdet_forward.1
= control target key start
LH: loop header
LB: loop body
LE: loop exit
PB: predicated region body
PF: predicated region fallthrough
CT: control target
= control target key end

     0   :  { %vm36_vm0 = vcmask 326656   ;;  %s793_s16 = smov 36   ;;  %s1380_s1 = inlined_call_operand.vmem [shape: f32[40,128], index: 1, kind: input, shape index: {}]   ;;  %s1381_s0 = inlined_call_operand.vmem [shape: f32[88,40], index: 0, kind: input, shape index: {}]   ;;  %s1382_s4 = inlined_call_operand.vmem [shape: f32[88,36], index: 4, kind: input, shape index: {}]   ;;  %s1383_s3 = inlined_call_operand.vmem [shape: f32[88,36], index: 3, kind: input, shape index: {}]   ;;  %s1384_s2 = inlined_call_operand.vmem [shape: f32[88,36], index: 2, kind: input, shape index: {}]   ;;  %s1385_s5 = inlined_call_operand.vmem [shape: f32[88,128], index: 5, kind: output, shape index: {}]  }
   0x1   :  { %v35_v0 = vld [vmem:[%s1380_s1 + $0x20] sm:$0xff]  ;;  %v34_v1 = vld [vmem:[%s1380_s1 + $0x18] sm:$0xff]  ;;  %v33_v2 = vld [vmem:[%s1380_s1 + $0x10] sm:$0xff] }
   0x2   :  { %81 = vmatpush.msra.mxu0 %v35_v0  ;;  %710 = vmatpush.msra.mxu1 %v35_v0  ;;  %v32_v3 = vld [vmem:[%s1380_s1 + $0x8] sm:$0xff]  ;;  %v31_v4 = vld [vmem:[%s1380_s1] sm:$0xff]  ;;  %v23_v6 = vld [vmem:[%s1381_s0 + $0x18] sm:$0xff] }
   0x3   :  { %711 = vmatpush.msra.mxu2 %v35_v0  ;;  %712 = vmatpush.msra.mxu3 %v35_v0  ;;  %v20_v5 = vld [vmem:[%s1381_s0] sm:$0xff]  ;;  %v26_v7 = vld [vmem:[%s1381_s0 + $0x30] sm:$0xff]  ;;  %v29_v8 = vld [vmem:[%s1381_s0 + $0x48] sm:$0xff] }
   0x4   :  { %82 = vmatpush.msra.mxu0 %v34_v1  ;;  %713 = vmatpush.msra.mxu1 %v34_v1  ;;  %v199_v9 = vld [vmem:[%s1382_s4 + $0x10] sm:$0xff]  ;;  %v197_v10 = vld [vmem:[%s1382_s4] sm:$0xff]  ;;  %v21_v12 = vld [vmem:[%s1381_s0 + $0x8] sm:$0xff] }
   0x5   :  { %714 = vmatpush.msra.mxu2 %v34_v1  ;;  %715 = vmatpush.msra.mxu3 %v34_v1  ;;  %v201_v11 = vld [vmem:[%s1382_s4 + $0x20] sm:$0xff]  ;;  %v27_v14 = vld [vmem:[%s1381_s0 + $0x38] sm:$0xff]  ;;  %v30_v15 = vld [vmem:[%s1381_s0 + $0x50] sm:$0xff] }
   0x6   :  { %83 = vmatpush.msra.mxu0 %v33_v2  ;;  %716 = vmatpush.msra.mxu1 %v33_v2  ;;  %v24_v13 = vld [vmem:[%s1381_s0 + $0x20] sm:$0xff]  ;;  %v200_v16 = vld [vmem:[%s1382_s4 + $0x18] sm:$0xff]  ;;  %v198_v17 = vld [vmem:[%s1382_s4 + $0x8] sm:$0xff] }
   0x7   :  { %717 = vmatpush.msra.mxu2 %v33_v2  ;;  %718 = vmatpush.msra.mxu3 %v33_v2  ;;  %v202_v18 = vld [vmem:[%s1382_s4 + $0x28] sm:$0xff]  ;;  %v22_v19 = vld [vmem:[%s1381_s0 + $0x10] sm:$0xff]  ;;  %v28_v21 = vld [vmem:[%s1381_s0 + $0x40] sm:$0xff] }
   0x8   :  { %84 = vmatpush.msra.mxu0 %v32_v3  ;;  %719 = vmatpush.msra.mxu1 %v32_v3  ;;  %v25_v20 = vld [vmem:[%s1381_s0 + $0x28] sm:$0xff]  ;;  %v203_v22 = vld [vmem:[%s1382_s4 + $0x30] sm:$0xff]  ;;  %v204_v23 = vld [vmem:[%s1382_s4 + $0x38] sm:$0xff] }
   0x9   :  { %720 = vmatpush.msra.mxu2 %v32_v3  ;;  %721 = vmatpush.msra.mxu3 %v32_v3  ;;  %v205_v24 = vld [vmem:[%s1382_s4 + $0x40] sm:$0xff]  ;;  %v206_v25 = vld [vmem:[%s1382_s4 + $0x48] sm:$0xff]  ;;  %v207_v26 = vld [vmem:[%s1382_s4 + $0x50] sm:$0xff]  ;;  %s794_s4 = smov 92  }
   0xa   :  { %85 = vmatpush.msra.mxu0 %v31_v4  ;;  %722 = vmatpush.msra.mxu1 %v31_v4 }
   0xb   :  { %688 = vmatmul.msk.f32.vlgmr.msra.gmra.mxu0 %vm36_vm0, %v20_v5  ;;  %691 = vmatmul.msk.f32.vlgmr.msra.gmra.mxu1 %vm36_vm0, %v23_v6 }
   0xc   :  { %723 = vmatpush.msra.mxu2 %v31_v4  ;;  %724 = vmatpush.msra.mxu3 %v31_v4 }
   0xd   :  { %694 = vmatmul.msk.f32.vlgmr.msra.gmra.mxu2 %vm36_vm0, %v26_v7  ;;  %697 = vmatmul.msk.f32.vlgmr.msra.gmra.mxu3 %vm36_vm0, %v29_v8 }
   0xe   :  { %223 = vrot.lane.b32.xlu1 %v199_v9, %s793_s16  ;;  %219 = vrot.lane.b32.xlu0 %v197_v10, %s793_s16 }
   0xf   :  { %227 = vrot.lane.b32.xlu2 %v201_v11, %s793_s16 }
  0x13   :  { %689 = vmatmul.msk.f32.gmra.mxu0 %vm36_vm0, %v21_v12  ;;  %692 = vmatmul.msk.f32.gmra.mxu1 %vm36_vm0, %v24_v13 }
  0x15   :  { %695 = vmatmul.msk.f32.gmra.mxu2 %vm36_vm0, %v27_v14  ;;  %698 = vmatmul.msk.f32.gmra.mxu3 %vm36_vm0, %v30_v15 }
  0x16   :  { %225 = vrot.lane.b32.xlu1 %v200_v16, %s793_s16  ;;  %221 = vrot.lane.b32.xlu0 %v198_v17, %s793_s16 }
  0x17   :  { %229 = vrot.lane.b32.xlu2 %v202_v18, %s793_s16 }
  0x1b   :  { %690 = vmatmul.msk.f32.gmra.mxu0 %vm36_vm0, %v22_v19  ;;  %693 = vmatmul.msk.f32.gmra.mxu1 %vm36_vm0, %v25_v20 }
  0x1d   :  { %696 = vmatmul.msk.f32.gmra.mxu2 %vm36_vm0, %v28_v21 }
  0x1e   :  { %231 = vrot.lane.b32.xlu0 %v203_v22, %s793_s16  ;;  %233 = vrot.lane.b32.xlu1 %v204_v23, %s793_s16 }
  0x1f   :  { %235 = vrot.lane.b32.xlu2 %v205_v24, %s793_s16 }
  0x26   :  { %237 = vrot.lane.b32.xlu0 %v206_v25, %s793_s16  ;;  %239 = vrot.lane.b32.xlu1 %v207_v26, %s793_s16 }
  0x69   :  { %v228_v59 = vpop.permute.xlu2 %227 }
  0x80   :  { %v220_v27 = vpop.permute.xlu0 %219  ;;  %v936_v36 = vpop.permute.xlu1 %223 }
  0x88   :  { %v928_v28 = vpop.f32.mrf.mxu0  ;;  %v930_v29 = vpop.f32.mrf.mxu1 }
  0x89   :  { %v120_v30 = vmin.f32 %v928_v28, 4.1351666  ;;  %v699_v31 = vmul.f32 -1.442695, %v928_v28  ;;  %v123_v32 = vmin.f32 %v930_v29, 4.1351666  ;;  %v222_v37 = vpop.permute.xlu0 %221  ;;  %v226_v58 = vpop.permute.xlu1 %225 }
  0x8a   :  { %v702_v33 = vmul.f32 -1.442695, %v930_v29 }
  0x8b   :  { %v131_v34 = vmul.f32 1.442695, %v120_v30  ;;  %727 = vpow2.f32 %v699_v31  ;;  %v137_v35 = vmul.f32 1.442695, %v123_v32 }
  0x8c   :  { %729 = vpow2.f32 %v702_v33 }
  0x8d   :  { %731 = vpow2.f32 %v131_v34 }
  0x8e   :  { %733 = vpow2.f32 %v137_v35 }
  0x90   :  { %v938_v38 = vpop.f32.mrf.mxu0  ;;  %v940_v39 = vpop.f32.mrf.mxu1 }
  0x91   :  { %v728_v40 = vpop.eup %727  ;;  %v121_v41 = vmin.f32 %v938_v38, 4.1351666  ;;  %v700_v42 = vmul.f32 -1.442695, %v938_v38  ;;  %v124_v43 = vmin.f32 %v940_v39, 4.1351666  ;;  %v945_v44 = vpop.f32.mrf.mxu2 }
  0x92   :  { %v730_v45 = vpop.eup %729  ;;  %v947_v46 = vadd.f32 1.0, %v728_v40  ;;  %v126_v47 = vmin.f32 %v945_v44, 4.1351666  ;;  %v950_v48 = vpop.f32.mrf.mxu3  ;;  %v703_v53 = vmul.f32 -1.442695, %v940_v39 }
  0x93   :  { %v732_v49 = vpop.eup %731  ;;  %v952_v50 = vadd.f32 1.0, %v730_v45  ;;  %v133_v51 = vmul.f32 1.442695, %v121_v41  ;;  %735 = vpow2.f32 %v700_v42  ;;  %v139_v52 = vmul.f32 1.442695, %v124_v43  ;;  %v232_v8 = vpop.permute.xlu0 %231 }
  0x94   :  { %737 = vrcp.f32 %v947_v46  ;;  %v143_v54 = vmul.f32 1.442695, %v126_v47  ;;  %v252_v55 = vmul.f32 %v732_v49, %v220_v27  ;;  %v705_v56 = vmul.f32 -1.442695, %v945_v44  ;;  %v734_v57 = vpop.eup %733  ;;  %v997_v42 = vpop.permute.xlu1 %233 }
  0x95   :  { %739 = vrcp.f32 %v952_v50  ;;  %v129_v62 = vmin.f32 %v950_v48, 4.1351666  ;;  %v708_v2 = vmul.f32 -1.442695, %v950_v48  ;;  %v255_v7 = vmul.f32 %v734_v57, %v226_v58 }
  0x96   :  { %741 = vpow2.f32 %v133_v51  ;;  %274 = vrot.lane.b32.xlu2 %v252_v55, %s794_s4  ;;  %v393_v17 = vand.u32 2147483647, %v947_v46  ;;  %v395_v21 = vand.u32 2147483648, %v947_v46  ;;  %v438_v24 = vand.u32 2147483647, %v952_v50 }
  0x97   :  { %743 = vpow2.f32 %v139_v52  ;;  %v149_v15 = vmul.f32 1.442695, %v129_v62  ;;  %v440_v25 = vand.u32 2147483648, %v952_v50  ;;  %v230_v52 = vpop.permute.xlu2 %229  ;;  %vm389_vm2 = vweird.f32 %v947_v46 }
  0x98   :  { %745 = vpow2.f32 %v703_v53  ;;  %v959_v60 = vpop.f32.mrf.mxu0  ;;  %v961_v61 = vpop.f32.mrf.mxu1  ;;  %vm1032_vm6 = vcmp.eq.f32.partialorder %v393_v17, 8.507059e+37  ;;  %vm434_vm13 = vweird.f32 %v952_v50 }
  0x99   :  { %v736_v63 = vpop.eup %735  ;;  %747 = vpow2.f32 %v143_v54  ;;  %v122_v0 = vmin.f32 %v959_v60, 4.1351666  ;;  %v701_v1 = vmul.f32 -1.442695, %v959_v60  ;;  %v967_v3 = vpop.f32.mrf.mxu2  ;;  %v125_v6 = vmin.f32 %v961_v61, 4.1351666 }
  0x9a   :  { %v969_v4 = vpop.eup %737  ;;  %v971_v5 = vadd.f32 1.0, %v736_v63  ;;  %749 = vpow2.f32 %v705_v56  ;;  %v704_v11 = vmul.f32 -1.442695, %v961_v61  ;;  %v127_v12 = vmin.f32 %v967_v3, 4.1351666  ;;  %v979_v16 = vpop.f32.mrf.mxu3 }
  0x9b   :  { %v974_v9 = vpop.eup %739  ;;  %v135_v10 = vmul.f32 1.442695, %v122_v0  ;;  %751 = vpow2.f32 %v701_v1  ;;  %v141_v14 = vmul.f32 1.442695, %v125_v6  ;;  %v130_v20 = vmin.f32 %v979_v16, 4.1351666  ;;  %v238_v62 = vpop.permute.xlu0 %237 }
  0x9c   :  { %v742_v13 = vpop.eup %741  ;;  %753 = vrcp.f32 %v971_v5  ;;  %v706_v23 = vmul.f32 -1.442695, %v967_v3  ;;  %v145_v30 = vmul.f32 1.442695, %v127_v12  ;;  %v709_v31 = vmul.f32 -1.442695, %v979_v16 }
  0x9d   :  { %v744_v18 = vpop.eup %743  ;;  %755 = vpow2.f32 %v135_v10  ;;  %v253_v19 = vmul.f32 %v742_v13, %v222_v37  ;;  %v151_v33 = vmul.f32 1.442695, %v130_v20  ;;  %vm404_vm1 = vweird.f32 %v971_v5 }
  0x9e   :  { %v746_v22 = vpop.eup %745  ;;  %757 = vpow2.f32 %v141_v14  ;;  %280 = vrot.lane.b32.xlu2 %v255_v7, %s794_s4  ;;  %v256_v34 = vmul.f32 %v744_v18, %v228_v59  ;;  %v408_v43 = vand.u32 2147483647, %v971_v5  ;;  %v410_v45 = vand.u32 2147483648, %v971_v5 }
  0x9f   :  { %v748_v26 = vpop.eup %747  ;;  %v987_v27 = vadd.f32 1.0, %v746_v22  ;;  %759 = vpow2.f32 %v704_v11  ;;  %276 = vrot.lane.b32.xlu0 %v253_v19, %s794_s4  ;;  %v385_v53 = vmul.f32 %v969_v4, %v947_v46  ;;  %vm390_vm3 = vweird.f32 %v969_v4 }
  0xa0   :  { %v750_v32 = vpop.eup %749  ;;  %761 = vpow2.f32 %v149_v15  ;;  %v258_v35 = vmul.f32 %v748_v26, %v232_v8  ;;  %vm1018_vm5 = vcmp.eq.f32.partialorder %v408_v43, 8.507059e+37  ;;  %v411_v8 = vor.u32 1.1754944e-38, %v410_v45  ;;  %vm391_vm10 = vmor %vm389_vm2, %vm390_vm3 }
  0xa1   :  { %v752_v37 = vpop.eup %751  ;;  %763 = vrcp.f32 %v987_v27  ;;  %v993_v40 = vadd.f32 1.0, %v750_v32  ;;  %v995_v41 = vpop.f32.mrf.mxu2  ;;  %v396_v18 = vor.u32 1.1754944e-38, %v395_v21  ;;  %vm449_vm7 = vweird.f32 %v987_v27 }
  0xa2   :  { %v1002_v47 = vpop.eup %753  ;;  %v1004_v49 = vadd.f32 1.0, %v752_v37  ;;  %765 = vpow2.f32 %v708_v2  ;;  %v128_v51 = vmin.f32 %v995_v41, 4.1351666  ;;  %v707_v55 = vmul.f32 -1.442695, %v995_v41  ;;  %v240_v32 = vpop.permute.xlu1 %239 }
  0xa3   :  { %v756_v54 = vpop.eup %755  ;;  %767 = vrcp.f32 %v993_v40  ;;  %v400_v56 = vmul.f32 %v1002_v47, %v971_v5  ;;  %vm405_vm4 = vweird.f32 %v1002_v47  ;;  %v430_v2 = vmul.f32 %v974_v9, %v952_v50 }
  0xa4   :  { %v758_v57 = vpop.eup %757  ;;  %769 = vrcp.f32 %v1004_v49  ;;  %v254_v58 = vmul.f32 %v756_v54, %v936_v36  ;;  %v147_v59 = vmul.f32 1.442695, %v128_v51  ;;  %v386_v36 = vsub.f32 1.0, %v385_v53  ;;  %vm406_vm8 = vmor %vm404_vm1, %vm405_vm4 }
  0xa5   :  { %v760_v63 = vpop.eup %759  ;;  %771 = vpow2.f32 %v145_v30  ;;  %v257_v0 = vmul.f32 %v758_v57, %v230_v52  ;;  %v401_v1 = vsub.f32 1.0, %v400_v56  ;;  %vm419_vm0 = vweird.f32 %v1004_v49 }
  0xa6   :  { %v762_v6 = vpop.eup %761  ;;  %v1022_v7 = vadd.f32 1.0, %v760_v63  ;;  %773 = vpow2.f32 %v706_v23  ;;  %278 = vrot.lane.b32.xlu1 %v254_v58, %s794_s4  ;;  %286 = vrot.lane.b32.xlu2 %v258_v35, %s794_s4  ;;  %v387_v15 = vmul.f32 %v969_v4, %v386_v36  ;;  %vm435_vm4 = vweird.f32 %v974_v9 }
  0xa7   :  { %v1025_v10 = vpop.eup %763  ;;  %775 = vpow2.f32 %v151_v33  ;;  %282 = vrot.lane.b32.xlu0 %v256_v34, %s794_s4  ;;  %v261_v11 = vmul.f32 %v762_v6, %v238_v62  ;;  %v402_v12 = vmul.f32 %v1002_v47, %v401_v1  ;;  %v453_v33 = vand.u32 2147483647, %v987_v27 }
  0xa8   :  { %v766_v14 = vpop.eup %765  ;;  %777 = vrcp.f32 %v1022_v7  ;;  %v445_v19 = vmul.f32 %v1025_v10, %v987_v27  ;;  %v388_v21 = vadd.f32 %v969_v4, %v387_v15  ;;  %vm450_vm9 = vweird.f32 %v1025_v10 }
  0xa9   :  { %v1042_v20 = vpop.eup %767  ;;  %v1044_v22 = vadd.f32 1.0, %v766_v14  ;;  %779 = vpow2.f32 %v709_v31  ;;  %v403_v17 = vadd.f32 %v1002_v47, %v402_v12  ;;  %v455_v34 = vand.u32 2147483648, %v987_v27  ;;  %vm451_vm15 = vmor %vm449_vm7, %vm450_vm9 }
  0xaa   :  { %v1048_v23 = vpop.eup %769  ;;  %781 = vpow2.f32 %v147_v59  ;;  %v446_v26 = vsub.f32 1.0, %v445_v19  ;;  %v392_v45 = vsel %vm391_vm10, %v969_v4, %v388_v21  ;;  %vm454_vm14 = vcmp.eq.f32.partialorder %v453_v33, 8.507059e+37 }
  0xab   :  { %v772_v30 = vpop.eup %771  ;;  %v407_v31 = vsel %vm406_vm8, %v1002_v47, %v403_v17  ;;  %v415_v5 = vmul.f32 %v1048_v23, %v1004_v49  ;;  %783 = vpow2.f32 %v707_v55  ;;  %v397_v46 = vsel %vm1032_vm6, %v396_v18, %v392_v45 }
  0xac   :  { %v774_v35 = vpop.eup %773  ;;  %v259_v37 = vmul.f32 %v772_v30, %v997_v42  ;;  %v412_v43 = vsel %vm1018_vm5, %v411_v8, %v407_v31  ;;  %v447_v52 = vmul.f32 %v1025_v10, %v446_v26  ;;  %785 = vrcp.f32 %v1044_v22 }
  0xad   :  { %v776_v47 = vpop.eup %775  ;;  %v1069_v51 = vadd.f32 1.0, %v774_v35  ;;  %vm573_vm11 = vcmp.gt.f32.partialorder %v412_v43, 0.05  ;;  %vm572_vm12 = vcmp.gt.f32.partialorder %v397_v46, 0.05  ;;  %v456_v59 = vor.u32 1.1754944e-38, %v455_v34 }
  0xae   :  { %v1074_v53 = vpop.eup %777  ;;  %284 = vrot.lane.b32.xlu1 %v257_v0, %s794_s4  ;;  %v262_v42 = vmul.f32 %v776_v47, %v240_v32  ;;  %v595_v54 = vsel %vm573_vm11, %v412_v43, 0.0  ;;  %292 = vrot.lane.b32.xlu2 %v261_v11, %s794_s4  ;;  %v594_v55 = vsel %vm572_vm12, %v397_v46, 0.0  ;;  %v448_v56 = vadd.f32 %v1025_v10, %v447_v52  ;;  %vm436_vm11 = vmor %vm434_vm13, %vm435_vm4 }
  0xaf   :  { %v780_v4 = vpop.eup %779  ;;  %787 = vrcp.f32 %v1069_v51  ;;  %288 = vrot.lane.b32.xlu0 %v259_v37, %s794_s4  ;;  %v416_v62 = vsub.f32 1.0, %v415_v5  ;;  %v423_v0 = vand.u32 2147483647, %v1004_v49  ;;  %v425_v1 = vand.u32 2147483648, %v1004_v49 }
  0xb0   :  { %v1083_v57 = vpop.eup %781  ;;  %v1085_v58 = vadd.f32 1.0, %v780_v4  ;;  %v452_v63 = vsel %vm451_vm15, %v1025_v10, %v448_v56  ;;  %vm420_vm1 = vweird.f32 %v1048_v23  ;;  %v431_v15 = vsub.f32 1.0, %v430_v2 }
  0xb1   :  { %v784_v6 = vpop.eup %783  ;;  %v457_v8 = vsel %vm454_vm14, %v456_v59, %v452_v63  ;;  %v417_v27 = vmul.f32 %v1048_v23, %v416_v62  ;;  %vm1102_vm3 = vcmp.eq.f32.partialorder %v423_v0, 8.507059e+37  ;;  %v426_v14 = vor.u32 1.1754944e-38, %v425_v1  ;;  %vm421_vm5 = vmor %vm419_vm0, %vm420_vm1  ;;  %v236_v63 = vpop.permute.xlu2 %235 }
  0xb2   :  { %789 = vrcp.f32 %v1085_v58  ;;  %v1100_v36 = vadd.f32 1.0, %v784_v6  ;;  %vm576_vm2 = vcmp.gt.f32.partialorder %v457_v8, 0.05  ;;  %v1107_v11 = vpop.eup %785  ;;  %vm1115_vm6 = vcmp.eq.f32.partialorder %v438_v24, 8.507059e+37 }
  0xb3   :  { %v598_v12 = vsel %vm576_vm2, %v457_v8, 0.0  ;;  %v418_v13 = vadd.f32 %v1048_v23, %v417_v27  ;;  %v441_v17 = vor.u32 1.1754944e-38, %v440_v25  ;;  %vm494_vm7 = vweird.f32 %v1069_v51 }
  0xb4   :  { %791 = vrcp.f32 %v1100_v36  ;;  %v432_v26 = vmul.f32 %v974_v9, %v431_v15  ;;  %v498_v25 = vand.u32 2147483647, %v1069_v51  ;;  %v500_v30 = vand.u32 2147483648, %v1069_v51 }
  0xb5   :  { %v788_v18 = vpop.eup %787  ;;  %v422_v21 = vsel %vm421_vm5, %v1048_v23, %v418_v13  ;;  %v460_v32 = vmul.f32 %v1074_v53, %v1022_v7  ;;  %vm464_vm10 = vweird.f32 %v1022_v7  ;;  %vm465_vm14 = vweird.f32 %v1074_v53 }
  0xb6   :  { %616 = vrot.lane.b32.xlu1 %v594_v55, %s794_s4  ;;  %v490_v49 = vmul.f32 %v788_v18, %v1069_v51  ;;  %vm495_vm8 = vweird.f32 %v788_v18  ;;  %618 = vrot.lane.b32.xlu2 %v595_v54, %s794_s4  ;;  %v427_v24 = vsel %vm1102_vm3, %v426_v14, %v422_v21  ;;  %v433_v31 = vadd.f32 %v974_v9, %v432_v26  ;;  %vm466_vm2 = vmor %vm464_vm10, %vm465_vm14 }
  0xb7   :  { %294 = vrot.lane.b32.xlu0 %v262_v42, %s794_s4  ;;  %vm574_vm9 = vcmp.gt.f32.partialorder %v427_v24, 0.05  ;;  %vm1140_vm12 = vcmp.eq.f32.partialorder %v498_v25, 8.507059e+37  ;;  %v501_v35 = vor.u32 1.1754944e-38, %v500_v30  ;;  %v461_v37 = vsub.f32 1.0, %v460_v32  ;;  %vm1154_vm13 = vmor %vm494_vm7, %vm495_vm8 }
  0xb8   :  { %v790_v23 = vpop.eup %789  ;;  %v491_v33 = vsub.f32 1.0, %v490_v49  ;;  %v596_v34 = vsel %vm574_vm9, %v427_v24, 0.0  ;;  %v437_v43 = vsel %vm436_vm11, %v974_v9, %v433_v31  ;;  %v468_v47 = vand.u32 2147483647, %v1022_v7 }
  0xb9   :  { %v442_v52 = vsel %vm1115_vm6, %v441_v17, %v437_v43  ;;  %v462_v42 = vmul.f32 %v1074_v53, %v461_v37  ;;  %v470_v9 = vand.u32 2147483648, %v1022_v7  ;;  %v535_v54 = vmul.f32 %v790_v23, %v1085_v58 }
  0xba   :  { %v492_v45 = vmul.f32 %v788_v18, %v491_v33  ;;  %v1147_v46 = vpop.eup %791  ;;  %vm575_vm15 = vcmp.gt.f32.partialorder %v442_v52, 0.05  ;;  %vm1161_vm0 = vcmp.eq.f32.partialorder %v468_v47, 8.507059e+37  ;;  %vm539_vm1 = vweird.f32 %v1085_v58 }
  0xbb   :  { %v597_v56 = vsel %vm575_vm15, %v442_v52, 0.0  ;;  %v463_v51 = vadd.f32 %v1074_v53, %v462_v42  ;;  %v471_v59 = vor.u32 1.1754944e-38, %v470_v9  ;;  %v536_v62 = vsub.f32 1.0, %v535_v54 }
  0xbc   :  { %v493_v4 = vadd.f32 %v788_v18, %v492_v45  ;;  %vm540_vm3 = vweird.f32 %v790_v23  ;;  %v543_v1 = vand.u32 2147483647, %v1085_v58  ;;  %v545_v2 = vand.u32 2147483648, %v1085_v58 }
  0xbd   :  { %v467_v8 = vsel %vm466_vm2, %v1074_v53, %v463_v51  ;;  %v537_v27 = vmul.f32 %v790_v23, %v536_v62  ;;  %v549_v10 = vlaneseq  ;;  %vm541_vm4 = vmor %vm539_vm1, %vm540_vm3  ;;  %v260_v14 = vmul.f32 %v1083_v57, %v236_v63 }
  0xbe   :  { %622 = vrot.lane.b32.xlu1 %v597_v56, %s794_s4  ;;  %v497_v0 = vsel %vm1154_vm13, %v788_v18, %v493_v4  ;;  %624 = vrot.lane.b32.xlu2 %v598_v12, %s794_s4  ;;  %v472_v7 = vsel %vm1161_vm0, %v471_v59, %v467_v8  ;;  %v546_v13 = vor.u32 1.1754944e-38, %v545_v2  ;;  %vm544_vm5 = vcmp.eq.f32.partialorder %v543_v1, 8.507059e+37  ;;  %v165_v1 = vld [vmem:[%s1383_s3 + $0x8] sm:$0xff] }
  0xbf   :  { %620 = vrot.lane.b32.xlu0 %v596_v34, %s794_s4  ;;  %v502_v6 = vsel %vm1140_vm12, %v501_v35, %v497_v0  ;;  %v538_v15 = vadd.f32 %v790_v23, %v537_v27  ;;  %v550_v12 = vshrl.u32 %v549_v10, 7  ;;  %vm577_vm7 = vcmp.gt.f32.partialorder %v472_v7, 0.05  ;;  %v168_v27 = vld [vmem:[%s1383_s3 + $0x20] sm:$0xff] }
  0xc0   :  { %vm579_vm6 = vcmp.gt.f32.partialorder %v502_v6, 0.05  ;;  %v505_v18 = vmul.f32 %v1147_v46, %v1100_v36  ;;  %vm509_vm8 = vweird.f32 %v1100_v36  ;;  %vm510_vm9 = vweird.f32 %v1147_v46 }
  0xc1   :  { %v542_v53 = vsel %vm541_vm4, %v790_v23, %v538_v15  ;;  %v560_v19 = vadd.s32 80, %v550_v12  ;;  %v515_v58 = vand.u32 2147483648, %v1100_v36  ;;  %v513_v57 = vand.u32 2147483647, %v1100_v36  ;;  %vm1205_vm13 = vmor %vm509_vm8, %vm510_vm9  ;;  %v164_v12 = vld [vmem:[%s1383_s3] sm:$0xff]  ;;  %v167_v23 = vld [vmem:[%s1383_s3 + $0x18] sm:$0xff] }
  0xc2   :  { %v547_v17 = vsel %vm544_vm5, %v546_v13, %v542_v53  ;;  %v506_v21 = vsub.f32 1.0, %v505_v18  ;;  %v475_v26 = vmul.f32 %v1042_v20, %v993_v40  ;;  %v601_v49 = vsel %vm579_vm6, %v502_v6, 0.0 }
  0xc3   :  { %v599_v24 = vsel %vm577_vm7, %v472_v7, 0.0  ;;  %vm571_vm10 = vcmp.lt.s32.totalorder %v560_v19, 84  ;;  %vm479_vm11 = vweird.f32 %v993_v40  ;;  %vm480_vm12 = vweird.f32 %v1042_v20 }
  0xc4   :  { %v507_v25 = vmul.f32 %v1147_v46, %v506_v21  ;;  %v476_v30 = vsub.f32 1.0, %v475_v26  ;;  %v483_v32 = vand.u32 2147483647, %v993_v40  ;;  %vm582_vm14 = vcmp.gt.f32.partialorder %v547_v17, 0.05  ;;  %vm1217_vm1 = vmor %vm479_vm11, %vm480_vm12  ;;  %v153_v26 = vld [vmem:[%s1384_s2] sm:$0xff] }
  0xc5   :  { %v516_v31 = vor.u32 1.1754944e-38, %v515_v58  ;;  %v485_v33 = vand.u32 2147483648, %v993_v40  ;;  %v520_v34 = vmul.f32 %v1107_v11, %v1044_v22  ;;  %vm514_vm15 = vcmp.eq.f32.partialorder %v513_v57, 8.507059e+37  ;;  %vm593_vm4 = vmand %vm571_vm10, %vm582_vm14 }
  0xc6   :  { %290 = vrot.lane.b32.xlu1 %v260_v14, %s794_s4  ;;  %630 = vrot.lane.b32.xlu2 %v601_v49, %s794_s4  ;;  %v508_v5 = vadd.f32 %v1147_v46, %v507_v25  ;;  %v477_v35 = vmul.f32 %v1042_v20, %v476_v30  ;;  %vm524_vm0 = vweird.f32 %v1044_v22  ;;  %vm525_vm2 = vweird.f32 %v1107_v11 }
  0xc7   :  { %626 = vrot.lane.b32.xlu0 %v599_v24, %s794_s4  ;;  %v486_v37 = vor.u32 1.1754944e-38, %v485_v33  ;;  %v521_v43 = vsub.f32 1.0, %v520_v34  ;;  %v530_v45 = vand.u32 2147483648, %v1044_v22  ;;  %vm484_vm3 = vcmp.eq.f32.partialorder %v483_v32, 8.507059e+37  ;;  %vm526_vm6 = vmor %vm524_vm0, %vm525_vm2  ;;  %v160_v32 = vld [vmem:[%s1384_s2 + $0x38] sm:$0xff]  ;;  %v166_v33 = vld [vmem:[%s1383_s3 + $0x10] sm:$0xff] }
  0xc8   :  { %v512_v47 = vsel %vm1205_vm13, %v1147_v46, %v508_v5  ;;  %v478_v52 = vadd.f32 %v1042_v20, %v477_v35  ;;  %v528_v50 = vand.u32 2147483647, %v1044_v22  ;;  %v604_v55 = vsel %vm593_vm4, %v547_v17, 0.0 }
  0xc9   :  { %v517_v40 = vsel %vm514_vm15, %v516_v31, %v512_v47  ;;  %v522_v42 = vmul.f32 %v1107_v11, %v521_v43  ;;  %v531_v4 = vor.u32 1.1754944e-38, %v530_v45  ;;  %v176_v6 = vmul.f32 %v165_v1, %v938_v38  ;;  %v157_v38 = vld [vmem:[%s1384_s2 + $0x20] sm:$0xff] }
  0xca   :  { %vm580_vm5 = vcmp.gt.f32.partialorder %v517_v40, 0.05  ;;  %v482_v9 = vsel %vm1217_vm1, %v1042_v20, %v478_v52  ;;  %vm529_vm8 = vcmp.eq.f32.partialorder %v528_v50, 8.507059e+37  ;;  %v179_v14 = vmul.f32 %v168_v27, %v940_v39  ;;  %v171_v39 = vld [vmem:[%s1383_s3 + $0x38] sm:$0xff] }
  0xcb   :  { %v487_v46 = vsel %vm484_vm3, %v486_v37, %v482_v9  ;;  %v523_v54 = vadd.f32 %v1107_v11, %v522_v42  ;;  %v602_v56 = vsel %vm580_vm5, %v517_v40, 0.0  ;;  %vm649_vm10 = vcmask 293888   ;;  %v174_v37 = vld [vmem:[%s1383_s3 + $0x50] sm:$0xff]  ;;  %v156_v52 = vld [vmem:[%s1384_s2 + $0x18] sm:$0xff] }
  0xcc   :  { %vm578_vm7 = vcmp.gt.f32.partialorder %v487_v46, 0.05  ;;  %vm661_vm11 = vcmask 424960   ;;  %v190_v19 = vadd.f32 %v179_v14, %v157_v38  ;;  %v175_v17 = vmul.f32 %v164_v12, %v928_v28 }
  0xcd   :  { %v600_v51 = vsel %vm578_vm7, %v487_v46, 0.0  ;;  %v527_v59 = vsel %vm526_vm6, %v1107_v11, %v523_v54  ;;  %v154_v11 = vld [vmem:[%s1384_s2 + $0x8] sm:$0xff]  ;;  %v182_v25 = vmul.f32 %v171_v39, %v967_v3  ;;  %v178_v36 = vmul.f32 %v167_v23, %v930_v29  ;;  %v155_v29 = vld [vmem:[%s1384_s2 + $0x10] sm:$0xff] }
  0xce   :  { %636 = vrot.lane.b32.xlu2 %v604_v55, %s794_s4  ;;  %628 = vrot.lane.b32.xlu1 %v600_v51, %s794_s4  ;;  %v532_v20 = vsel %vm529_vm8, %v531_v4, %v527_v59  ;;  %v187_v8 = vadd.f32 %v176_v6, %v154_v11  ;;  %v186_v30 = vadd.f32 %v175_v17, %v153_v26 }
  0xcf   :  { %632 = vrot.lane.b32.xlu0 %v602_v56, %s794_s4  ;;  %vm581_vm9 = vcmp.gt.f32.partialorder %v532_v20, 0.05  ;;  %v193_v35 = vadd.f32 %v182_v25, %v160_v32  ;;  %v177_v47 = vmul.f32 %v166_v33, %v959_v60  ;;  %v185_v42 = vmul.f32 %v174_v37, %v979_v16  ;;  %v163_v60 = vld [vmem:[%s1384_s2 + $0x50] sm:$0xff]  ;;  %v169_v56 = vld [vmem:[%s1383_s3 + $0x28] sm:$0xff] }
  0xd0   :  { %v603_v22 = vsel %vm581_vm9, %v532_v20, 0.0  ;;  %v189_v46 = vadd.f32 %v178_v36, %v156_v52  ;;  %v159_v32 = vld [vmem:[%s1384_s2 + $0x30] sm:$0xff]  ;;  %v173_v33 = vld [vmem:[%s1383_s3 + $0x48] sm:$0xff] }
  0xd1   :  { %v188_v4 = vadd.f32 %v177_v47, %v155_v29  ;;  %v162_v47 = vld [vmem:[%s1384_s2 + $0x48] sm:$0xff] }
  0xd6   :  { %634 = vrot.lane.b32.xlu1 %v603_v22, %s794_s4 }
  0xf0   :  { %v275_v62 = vpop.permute.xlu2 %274 }
  0xf1   :  { %v307_v34 = vadd.f32 %v275_v62, %v186_v30  ;;  %v196_v62 = vadd.f32 %v185_v42, %v163_v60 }
  0xf3   :  { %v318_v40 = vmax.f32 %v307_v34, 0.0 }
  0xf5   :  { %v329_v51 = vmin.f32 %v318_v40, 64.0 }
  0xf8   :  { %v281_v63 = vpop.permute.xlu2 %280 }
  0xf9   :  { %v310_v59 = vadd.f32 %v281_v63, %v189_v46 }
  0xfb   :  { %v321_v63 = vmax.f32 %v310_v59, 0.0 }
  0xfd   :  { %v332_v38 = vmin.f32 %v321_v63, 64.0 }
 0x100   :  { %v1242_v0 = vpop.permute.xlu2 %286 }
 0x108   :  { %v1247_v2 = vpop.permute.xlu2 %292 }
 0x110   :  { %v619_v10 = vpop.permute.xlu2 %618 }
 0x111   :  { %v277_v7 = vpop.permute.xlu0 %276 }
 0x112   :  { %v308_v13 = vadd.f32 %v277_v7, %v187_v8  ;;  %v180_v8 = vmul.f32 %v169_v56, %v961_v61  ;;  %v158_v7 = vld [vmem:[%s1384_s2 + $0x28] sm:$0xff] }
 0x114   :  { %v319_v15 = vmax.f32 %v308_v13, 0.0 }
 0x116   :  { %v330_v18 = vmin.f32 %v319_v15, 64.0  ;;  %v191_v15 = vadd.f32 %v180_v8, %v158_v7 }
 0x118   :  { %v651_v53 = vsel %vm649_vm10, %v330_v18, %v619_v10  ;;  %v279_v58 = vpop.permute.xlu1 %278  ;;  %v625_v24 = vpop.permute.xlu2 %624  ;;  %v170_v18 = vld [vmem:[%s1383_s3 + $0x30] sm:$0xff] }
 0x119   :  { %v663_v21 = vsel %vm661_vm11, %v651_v53, 0.0  ;;  %v283_v57 = vpop.permute.xlu0 %282  ;;  %v309_v20 = vadd.f32 %v279_v58, %v188_v4  ;;  %v172_v53 = vld [vmem:[%s1383_s3 + $0x40] sm:$0xff]  ;;  %v181_v25 = vmul.f32 %v170_v18, %v945_v44 }
 0x11a   :  { %674 = vst [vmem:[%s1385_s5 + $0x8] sm:$0xff] %v663_v21  ;;  %v311_v49 = vadd.f32 %v283_v57, %v190_v19  ;;  %v161_v44 = vld [vmem:[%s1384_s2 + $0x40] sm:$0xff] }
 0x11b   :  { %v320_v13 = vmax.f32 %v309_v20, 0.0 }
 0x11c   :  { %v322_v28 = vmax.f32 %v311_v49, 0.0 }
 0x11d   :  { %v331_v19 = vmin.f32 %v320_v13, 64.0 }
 0x11e   :  { %v333_v31 = vmin.f32 %v322_v28, 64.0  ;;  %v183_v28 = vmul.f32 %v172_v53, %v995_v41  ;;  %v192_v41 = vadd.f32 %v181_v25, %v159_v32 }
 0x120   :  { %v654_v5 = vsel %vm649_vm10, %v333_v31, %v625_v24  ;;  %v285_v3 = vpop.permute.xlu1 %284  ;;  %v631_v54 = vpop.permute.xlu2 %630  ;;  %v194_v31 = vadd.f32 %v183_v28, %v161_v44 }
 0x121   :  { %v666_v43 = vsel %vm661_vm11, %v654_v5, 0.0  ;;  %v289_v45 = vpop.permute.xlu0 %288  ;;  %v312_v58 = vadd.f32 %v285_v3, %v191_v15 }
 0x122   :  { %677 = vst [vmem:[%s1385_s5 + $0x20] sm:$0xff] %v666_v43  ;;  %v314_v50 = vadd.f32 %v289_v45, %v193_v35  ;;  %v313_v35 = vadd.f32 %v1242_v0, %v192_v41  ;;  %v184_v43 = vmul.f32 %v173_v33, %v950_v48 }
 0x123   :  { %v323_v23 = vmax.f32 %v312_v58, 0.0 }
 0x124   :  { %v325_v9 = vmax.f32 %v314_v50, 0.0  ;;  %v324_v50 = vmax.f32 %v313_v35, 0.0  ;;  %v195_v40 = vadd.f32 %v184_v43, %v162_v47 }
 0x125   :  { %v334_v34 = vmin.f32 %v323_v23, 64.0 }
 0x126   :  { %v336_v55 = vmin.f32 %v325_v9, 64.0  ;;  %v335_v29 = vmin.f32 %v324_v50, 64.0  ;;  %v316_v42 = vadd.f32 %v1247_v2, %v195_v40 }
 0x128   :  { %v657_v22 = vsel %vm649_vm10, %v336_v55, %v631_v54  ;;  %v617_v16 = vpop.permute.xlu1 %616  ;;  %v637_v12 = vpop.permute.xlu2 %636  ;;  %v327_v55 = vmax.f32 %v316_v42, 0.0 }
 0x129   :  { %v669_v1 = vsel %vm661_vm11, %v657_v22, 0.0  ;;  %v295_v6 = vpop.permute.xlu0 %294  ;;  %v650_v11 = vsel %vm649_vm10, %v329_v51, %v617_v16 }
 0x12a   :  { %680 = vst [vmem:[%s1385_s5 + $0x38] sm:$0xff] %v669_v1  ;;  %v317_v27 = vadd.f32 %v295_v6, %v196_v62  ;;  %v662_v10 = vsel %vm661_vm11, %v650_v11, 0.0  ;;  %v338_v2 = vmin.f32 %v327_v55, 64.0 }
 0x12b   :  { %673 = vst [vmem:[%s1385_s5] sm:$0xff] %v662_v10 }
 0x12c   :  { %v328_v14 = vmax.f32 %v317_v27, 0.0 }
 0x12e   :  { %v339_v61 = vmin.f32 %v328_v14, 64.0 }
 0x130   :  { %v660_v17 = vsel %vm649_vm10, %v339_v61, %v637_v12  ;;  %v623_v39 = vpop.permute.xlu1 %622 }
 0x131   :  { %v672_v21 = vsel %vm661_vm11, %v660_v17, 0.0  ;;  %v621_v57 = vpop.permute.xlu0 %620  ;;  %v653_v26 = vsel %vm649_vm10, %v332_v38, %v623_v39 }
 0x132   :  { %683 = vst [vmem:[%s1385_s5 + $0x50] sm:$0xff] %v672_v21  ;;  %v652_v49 = vsel %vm649_vm10, %v331_v19, %v621_v57  ;;  %v665_v24 = vsel %vm661_vm11, %v653_v26, 0.0 }
 0x133   :  { %v664_v30 = vsel %vm661_vm11, %v652_v49, 0.0  ;;  %676 = vst [vmem:[%s1385_s5 + $0x18] sm:$0xff] %v665_v24 }
 0x134   :  { %675 = vst [vmem:[%s1385_s5 + $0x10] sm:$0xff] %v664_v30 }
 0x138   :  { %v291_v5 = vpop.permute.xlu1 %290 }
 0x139   :  { %v627_v3 = vpop.permute.xlu0 %626  ;;  %v315_v36 = vadd.f32 %v291_v5, %v194_v31 }
 0x13a   :  { %v655_v37 = vsel %vm649_vm10, %v334_v34, %v627_v3 }
 0x13b   :  { %v667_v45 = vsel %vm661_vm11, %v655_v37, 0.0  ;;  %v326_v52 = vmax.f32 %v315_v36, 0.0 }
 0x13c   :  { %678 = vst [vmem:[%s1385_s5 + $0x28] sm:$0xff] %v667_v45 }
 0x13d   :  { %v337_v0 = vmin.f32 %v326_v52, 64.0 }
 0x140   :  { %v629_v46 = vpop.permute.xlu1 %628 }
 0x141   :  { %v633_v9 = vpop.permute.xlu0 %632  ;;  %v656_v60 = vsel %vm649_vm10, %v335_v29, %v629_v46 }
 0x142   :  { %v658_v48 = vsel %vm649_vm10, %v337_v0, %v633_v9  ;;  %v668_v4 = vsel %vm661_vm11, %v656_v60, 0.0 }
 0x143   :  { %v670_v54 = vsel %vm661_vm11, %v658_v48, 0.0  ;;  %679 = vst [vmem:[%s1385_s5 + $0x30] sm:$0xff] %v668_v4 }
 0x144   :  { %681 = vst [vmem:[%s1385_s5 + $0x40] sm:$0xff] %v670_v54 }
 0x148   :  { %v635_v56 = vpop.permute.xlu1 %634 }
 0x149   :  { %v659_v51 = vsel %vm649_vm10, %v338_v2, %v635_v56 }
 0x14a   :  { %v671_v59 = vsel %vm661_vm11, %v659_v51, 0.0 }
 0x14b   :  { %682 = vst [vmem:[%s1385_s5 + $0x48] sm:$0xff] %v671_v59 }

</bundles_post_ra>
